<compile_context>
chip_gen: v6e
topology: v6e:2x2x1
jax: 0.10.0
libtpu: 0.0.40
codegen_flags: <defaults>
</compile_context>

<pallas_src>
import math
from functools import partial

import jax
import jax.numpy as jnp
from jax.experimental import pallas as pl
from jax.experimental.pallas import tpu as pltpu


# ----------------------------- generation-aware config -----------------------------

def _tpu_vmem_capacity_bytes():
    try:
        return int(pltpu.get_tpu_info().vmem_capacity_bytes)
    except Exception:
        return 128 * 1024 * 1024   # assume v5e/v6e-class part if query unavailable


_VMEM_CAP = _tpu_vmem_capacity_bytes()
_BIG_VMEM = _VMEM_CAP >= 100 * 1024 * 1024            # v5e/v6e (128 MiB) vs v7x (64 MiB)
VMEM_LIMIT = min(96 * 1024 * 1024, (_VMEM_CAP * 3) // 4)
TILE_F = 512 if _BIG_VMEM else 256                     # FFN hidden-dim reduction tile
TILE_V = 512 if _BIG_VMEM else 256                     # generator vocab tile
TILE_SEQ = 512 if _BIG_VMEM else 256                   # attention Sq / Sk tiles


def _cp(sem):
    return pltpu.CompilerParams(dimension_semantics=sem,
                                vmem_limit_bytes=VMEM_LIMIT)


def _pick_tile(n, target, min_steps=1):
    """Largest tile t <= target with n % t == 0 and (t % 8 == 0 or t == n).

    If min_steps > 1, also cap the tile so the axis gets >= min_steps grid
    steps when possible (keeps both v7x TensorCores busy on parallel axes)."""
    if min_steps > 1 and n >= 8 * min_steps:
        target = min(target, n // min_steps)
    if n <= target:
        return n
    for t in range(min(target, n - 1), 0, -1):
        if n % t == 0 and t % 8 == 0:
            return t
    return n   # no aligned divisor: fall back to the full (untiled) dim


# ----------------------------- linear kernels -----------------------------

def _linear_kernel(x_ref, w_ref, b_ref, o_ref):
    acc = jnp.dot(x_ref[...], w_ref[...], preferred_element_type=jnp.float32)
    o_ref[...] = (acc + b_ref[...]).astype(o_ref.dtype)


def linear(x, w, b, tile_m=512):
    """y = x @ w + b, M-tiled; weights single-buffered (loop-invariant)."""
    M, K = x.shape
    N = w.shape[1]
    tm = _pick_tile(M, tile_m, min_steps=2)
    return pl.pallas_call(
        _linear_kernel,
        out_shape=jax.ShapeDtypeStruct((M, N), x.dtype),
        grid=(M // tm,),
        in_specs=[pl.BlockSpec((tm, K), lambda i: (i, 0)),
                  pl.BlockSpec((K, N), lambda i: (0, 0),
                               pipeline_mode=pl.Buffered(1)),
                  pl.BlockSpec((1, N), lambda i: (0, 0),
                               pipeline_mode=pl.Buffered(1))],
        out_specs=pl.BlockSpec((tm, N), lambda i: (i, 0)),
        compiler_params=_cp(("parallel",)),
    )(x, w, b.reshape(1, N))


def _linear_add_ln_kernel(x_ref, w_ref, b_ref, r_ref, g_ref, be_ref, o_ref):
    y = jnp.dot(x_ref[...], w_ref[...], preferred_element_type=jnp.float32)
    y = y + b_ref[...] + r_ref[...].astype(jnp.float32)
    mu = jnp.mean(y, axis=-1, keepdims=True)
    d = y - mu
    var = jnp.mean(d * d, axis=-1, keepdims=True)
    o_ref[...] = (d * jax.lax.rsqrt(var + 1e-5) * g_ref[...]
                  + be_ref[...]).astype(o_ref.dtype)


def linear_add_ln(x, w, b, resid, g, be, tile_m=512):
    """LayerNorm(resid + x @ w + b) in one kernel (out-projection fusion)."""
    M, K = x.shape
    N = w.shape[1]
    tm = _pick_tile(M, tile_m, min_steps=2)
    return pl.pallas_call(
        _linear_add_ln_kernel,
        out_shape=jax.ShapeDtypeStruct((M, N), x.dtype),
        grid=(M // tm,),
        in_specs=[pl.BlockSpec((tm, K), lambda i: (i, 0)),
                  pl.BlockSpec((K, N), lambda i: (0, 0),
                               pipeline_mode=pl.Buffered(1)),
                  pl.BlockSpec((1, N), lambda i: (0, 0),
                               pipeline_mode=pl.Buffered(1)),
                  pl.BlockSpec((tm, N), lambda i: (i, 0)),
                  pl.BlockSpec((1, N), lambda i: (0, 0),
                               pipeline_mode=pl.Buffered(1)),
                  pl.BlockSpec((1, N), lambda i: (0, 0),
                               pipeline_mode=pl.Buffered(1))],
        out_specs=pl.BlockSpec((tm, N), lambda i: (i, 0)),
        compiler_params=_cp(("parallel",)),
    )(x, w, b.reshape(1, N), resid, g.reshape(1, N), be.reshape(1, N))


def _ffn_ln_kernel(x_ref, w1_ref, b1_ref, w2_ref, b2_ref, g_ref, be_ref,
                   o_ref, acc_ref):
    j = pl.program_id(1)

    @pl.when(j == 0)
    def _():
        acc_ref[...] = jnp.zeros_like(acc_ref)

    h = jnp.dot(x_ref[...], w1_ref[...], preferred_element_type=jnp.float32)
    h = jnp.maximum(h + b1_ref[...], 0.0)                       # ReLU (f32)
    acc_ref[...] += jnp.dot(h.astype(w2_ref.dtype), w2_ref[...],
                            preferred_element_type=jnp.float32)

    @pl.when(j == pl.num_programs(1) - 1)
    def _():
        # residual == FFN input block; add + LayerNorm fused in the epilogue.
        y = acc_ref[...] + b2_ref[...] + x_ref[...].astype(jnp.float32)
        mu = jnp.mean(y, axis=-1, keepdims=True)
        d = y - mu
        var = jnp.mean(d * d, axis=-1, keepdims=True)
        o_ref[...] = (d * jax.lax.rsqrt(var + 1e-5) * g_ref[...]
                      + be_ref[...]).astype(o_ref.dtype)


def ffn_add_ln(x, p, g, b, tile_m=512, tile_f=TILE_F):
    """LayerNorm(x + Linear(ReLU(Linear(x)))); F tiled as reduction axis."""
    M, D = x.shape
    F = p["w1"].shape[1]
    tm = _pick_tile(M, tile_m, min_steps=2)
    tf = _pick_tile(F, tile_f)
    return pl.pallas_call(
        _ffn_ln_kernel,
        out_shape=jax.ShapeDtypeStruct((M, D), x.dtype),
        grid=(M // tm, F // tf),
        in_specs=[pl.BlockSpec((tm, D), lambda i, j: (i, 0)),
                  pl.BlockSpec((D, tf), lambda i, j: (0, j)),
                  pl.BlockSpec((1, tf), lambda i, j: (0, j)),
                  pl.BlockSpec((tf, D), lambda i, j: (j, 0)),
                  pl.BlockSpec((1, D), lambda i, j: (0, 0),
                               pipeline_mode=pl.Buffered(1)),
                  pl.BlockSpec((1, D), lambda i, j: (0, 0),
                               pipeline_mode=pl.Buffered(1)),
                  pl.BlockSpec((1, D), lambda i, j: (0, 0),
                               pipeline_mode=pl.Buffered(1))],
        out_specs=pl.BlockSpec((tm, D), lambda i, j: (i, 0)),
        scratch_shapes=[pltpu.VMEM((tm, D), jnp.float32)],
        compiler_params=_cp(("parallel", "arbitrary")),
    )(x, p["w1"], p["b1"].reshape(1, F), p["w2"], p["b2"].reshape(1, D),
      g.reshape(1, D), b.reshape(1, D))


# ----------------------------- flash attention -----------------------------

def _flash_attn_kernel(q_ref, k_ref, v_ref, kb_ref, o_ref, m_sc, l_sc, acc_sc,
                       *, nhead, dh, scale, causal, tq, tk):
    qi = pl.program_id(1)
    ki = pl.program_id(2)

    @pl.when(ki == 0)
    def _():
        m_sc[...] = jnp.full_like(m_sc, -jnp.inf)
        l_sc[...] = jnp.zeros_like(l_sc)
        acc_sc[...] = jnp.zeros_like(acc_sc)

    q = q_ref[0]                                    # (tq, nhead*dh) bf16
    k = k_ref[0]                                    # (tk, nhead*dh) bf16
    v = v_ref[0]                                    # (tk, nhead*dh) bf16
    bias = kb_ref[0].astype(jnp.float32)            # (1, tk) key-padding bias
    if causal:
        qpos = qi * tq + jax.lax.broadcasted_iota(jnp.int32, (tq, tk), 0)
        kpos = ki * tk + jax.lax.broadcasted_iota(jnp.int32, (tq, tk), 1)
        bias = bias + jnp.where(kpos > qpos, -1e9, 0.0).astype(jnp.float32)

    for h in range(nhead):
        qh = q[:, h * dh:(h + 1) * dh]
        kh = k[:, h * dh:(h + 1) * dh]
        vh = v[:, h * dh:(h + 1) * dh]
        # NT matmul (contract feature dims): no per-head XLU transpose of K.
        s = jax.lax.dot_general(qh, kh, (((1,), (1,)), ((), ())),
                                preferred_element_type=jnp.float32)
        s = s * scale + bias
        m_prev = m_sc[h]
        m_new = jnp.maximum(m_prev, jnp.max(s, axis=-1, keepdims=True))
        alpha = jnp.exp(m_prev - m_new)
        p = jnp.exp(s - m_new)
        l_sc[h] = alpha * l_sc[h] + jnp.sum(p, axis=-1, keepdims=True)
        acc_sc[h] = alpha * acc_sc[h] + jnp.dot(p.astype(vh.dtype), vh,
                                                preferred_element_type=jnp.float32)
        m_sc[h] = m_new

    @pl.when(ki == pl.num_programs(2) - 1)
    def _():
        # Normalize the (tq, dh) accumulators, not the (tq, tk) probabilities.
        o = jnp.concatenate(
            [acc_sc[h] * pl.reciprocal(l_sc[h], approx=True)
             for h in range(nhead)], axis=-1)
        o_ref[0] = o.astype(o_ref.dtype)
        # NOTE: fully-masked query rows yield a uniform softmax (PyTorch gives NaN).


def self_attention(qkv, key_bias, nhead, causal=False):
    """qkv: [B, S, 3D] fused projection (Q|K|V); key_bias: [B, 1, S] f32 additive."""
    B, S, D3 = qkv.shape
    D = D3 // 3
    dh = D // nhead
    tq = _pick_tile(S, TILE_SEQ)
    tk = _pick_tile(S, TILE_SEQ)
    kern = partial(_flash_attn_kernel, nhead=nhead, dh=dh,
                   scale=1.0 / math.sqrt(dh), causal=causal, tq=tq, tk=tk)
    return pl.pallas_call(
        kern,
        out_shape=jax.ShapeDtypeStruct((B, S, D), qkv.dtype),
        grid=(B, S // tq, S // tk),
        in_specs=[pl.BlockSpec((1, tq, D), lambda b, i, j: (b, i, 0)),   # Q slab
                  pl.BlockSpec((1, tk, D), lambda b, i, j: (b, j, 1)),   # K slab
                  pl.BlockSpec((1, tk, D), lambda b, i, j: (b, j, 2)),   # V slab
                  pl.BlockSpec((1, 1, tk), lambda b, i, j: (b, 0, j))],
        out_specs=pl.BlockSpec((1, tq, D), lambda b, i, j: (b, i, 0)),
        scratch_shapes=[pltpu.VMEM((nhead, tq, 1), jnp.float32),
                        pltpu.VMEM((nhead, tq, 1), jnp.float32),
                        pltpu.VMEM((nhead, tq, dh), jnp.float32)],
        compiler_params=_cp(("parallel", "parallel", "arbitrary")),
    )(qkv, qkv, qkv, key_bias)


def cross_attention(q, kv, key_bias, nhead):
    """q: [B, T, D]; kv: [B, S, 2D] fused (K|V); key_bias: [B, 1, S] f32 additive."""
    B, T, D = q.shape
    S = kv.shape[1]
    dh = D // nhead
    tq = _pick_tile(T, TILE_SEQ)
    tk = _pick_tile(S, TILE_SEQ)
    kern = partial(_flash_attn_kernel, nhead=nhead, dh=dh,
                   scale=1.0 / math.sqrt(dh), causal=False, tq=tq, tk=tk)
    return pl.pallas_call(
        kern,
        out_shape=jax.ShapeDtypeStruct((B, T, D), q.dtype),
        grid=(B, T // tq, S // tk),
        in_specs=[pl.BlockSpec((1, tq, D), lambda b, i, j: (b, i, 0)),
                  pl.BlockSpec((1, tk, D), lambda b, i, j: (b, j, 0)),
                  pl.BlockSpec((1, tk, D), lambda b, i, j: (b, j, 1)),
                  pl.BlockSpec((1, 1, tk), lambda b, i, j: (b, 0, j))],
        out_specs=pl.BlockSpec((1, tq, D), lambda b, i, j: (b, i, 0)),
        scratch_shapes=[pltpu.VMEM((nhead, tq, 1), jnp.float32),
                        pltpu.VMEM((nhead, tq, 1), jnp.float32),
                        pltpu.VMEM((nhead, tq, dh), jnp.float32)],
        compiler_params=_cp(("parallel", "parallel", "arbitrary")),
    )(q, kv, kv, key_bias)


# ----------------------------- generator (linear + log_softmax) -----------------------------

def _gen_logits_kernel(x_ref, w_ref, b_ref, logits_ref, lse_ref, m_sc, l_sc):
    j = pl.program_id(1)

    @pl.when(j == 0)
    def _():
        m_sc[...] = jnp.full_like(m_sc, -jnp.inf)
        l_sc[...] = jnp.zeros_like(l_sc)

    logits = jnp.dot(x_ref[...], w_ref[...],
                     preferred_element_type=jnp.float32) + b_ref[...]
    logits_ref[...] = logits
    m_new = jnp.maximum(m_sc[...], jnp.max(logits, axis=-1, keepdims=True))
    l_sc[...] = (l_sc[...] * jnp.exp(m_sc[...] - m_new)
                 + jnp.sum(jnp.exp(logits - m_new), axis=-1, keepdims=True))
    m_sc[...] = m_new

    @pl.when(j == pl.num_programs(1) - 1)
    def _():
        lse_ref[...] = m_sc[...] + jnp.log(l_sc[...])   # one (tm,1) store per M tile


def _sub_lse_kernel(logits_ref, lse_ref, o_ref):
    o_ref[...] = (logits_ref[...] - lse_ref[...]).astype(o_ref.dtype)


def generator_apply(x, w, b, tile_m=512, tile_v=TILE_V):
    """Linear + log_softmax over V; V tiled with online LSE, then in-place subtract."""
    M, D = x.shape
    V = w.shape[1]
    tm = _pick_tile(M, tile_m, min_steps=2)
    tv = _pick_tile(V, tile_v)
    logits, lse = pl.pallas_call(
        _gen_logits_kernel,
        out_shape=(jax.ShapeDtypeStruct((M, V), jnp.float32),
                   jax.ShapeDtypeStruct((M, 1), jnp.float32)),
        grid=(M // tm, V // tv),
        in_specs=[pl.BlockSpec((tm, D), lambda i, j: (i, 0)),
                  pl.BlockSpec((D, tv), lambda i, j: (0, j)),
                  pl.BlockSpec((1, tv), lambda i, j: (0, j))],
        out_specs=(pl.BlockSpec((tm, tv), lambda i, j: (i, j)),
                   pl.BlockSpec((tm, 1), lambda i, j: (i, 0))),
        scratch_shapes=[pltpu.VMEM((tm, 1), jnp.float32),
                        pltpu.VMEM((tm, 1), jnp.float32)],
        compiler_params=_cp(("parallel", "arbitrary")),
    )(x, w, b.reshape(1, V))

    # log_softmax = logits - lse, writing back into the aliased logits buffer.
    return pl.pallas_call(
        _sub_lse_kernel,
        out_shape=jax.ShapeDtypeStruct((M, V), jnp.float32),
        grid=(M // tm, V // tv),
        in_specs=[pl.BlockSpec((tm, tv), lambda i, j: (i, j)),
                  pl.BlockSpec((tm, 1), lambda i, j: (i, 0))],
        out_specs=pl.BlockSpec((tm, tv), lambda i, j: (i, j)),
        input_output_aliases={0: 0},
        compiler_params=_cp(("parallel", "parallel")),
    )(logits, lse)


# ----------------------------- model glue (plain JAX) -----------------------------

def sinusoidal_pe(max_len, d_model):
    pos = jnp.arange(max_len, dtype=jnp.float32)[:, None]
    div = jnp.exp(jnp.arange(0, d_model, 2, dtype=jnp.float32) *
                  (-math.log(10000.0) / d_model))
    pe = jnp.zeros((max_len, d_model), jnp.float32)
    pe = pe.at[:, 0::2].set(jnp.sin(pos * div))
    pe = pe.at[:, 1::2].set(jnp.cos(pos * div))
    return pe


def embed_and_pos(tokens, table, pe):
    # Embedding gather + PE add done in XLA (gather has no clean tiled Pallas form here).
    d_model = table.shape[1]
    x = jnp.take(table, tokens, axis=0).astype(jnp.float32) * math.sqrt(d_model)
    x = x + pe[None, : tokens.shape[1], :]
    return x.astype(jnp.bfloat16)
    # TODO(synk): dropout in the positional-encoding module is omitted (eval mode).


def key_padding_bias(kpm, B, S):
    """[B,1,S] f32 additive key-padding bias (True = padded key). Tiny HBM footprint."""
    if kpm is None:
        return jnp.zeros((B, 1, S), jnp.float32)
    return jnp.where(kpm, -1e9, 0.0).astype(jnp.float32).reshape(B, 1, S)


def self_attn_block(x, p, key_bias, ln_g, ln_b, nhead, causal=False):
    B, S, D = x.shape
    x2 = x.reshape(B * S, D)
    qkv = linear(x2, p["wqkv"], p["bqkv"]).reshape(B, S, 3 * D)
    o = self_attention(qkv, key_bias, nhead, causal)
    # output projection + residual-add + LayerNorm fused in one kernel
    return linear_add_ln(o.reshape(B * S, D), p["wo"], p["bo"],
                         x2, ln_g, ln_b).reshape(B, S, D)


def cross_attn_block(x, memory, p, mem_key_bias, ln_g, ln_b, nhead):
    B, T, D = x.shape
    S = memory.shape[1]
    x2 = x.reshape(B * T, D)
    q = linear(x2, p["wq"], p["bq"]).reshape(B, T, D)
    kv = linear(memory.reshape(B * S, D), p["wkv"], p["bkv"]).reshape(B, S, 2 * D)
    o = cross_attention(q, kv, mem_key_bias, nhead)
    return linear_add_ln(o.reshape(B * T, D), p["wo"], p["bo"],
                         x2, ln_g, ln_b).reshape(B, T, D)


def encoder_layer(x, p, key_bias, nhead):
    B, S, D = x.shape
    x = self_attn_block(x, p["attn"], key_bias, p["ln1_g"], p["ln1_b"], nhead)
    x = ffn_add_ln(x.reshape(B * S, D), p["ffn"],
                   p["ln2_g"], p["ln2_b"]).reshape(B, S, D)
    return x


def decoder_layer(x, memory, p, tgt_key_bias, mem_key_bias, nhead, causal):
    B, T, D = x.shape
    x = self_attn_block(x, p["self_attn"], tgt_key_bias,
                        p["ln1_g"], p["ln1_b"], nhead, causal)
    x = cross_attn_block(x, memory, p["cross_attn"], mem_key_bias,
                         p["ln2_g"], p["ln2_b"], nhead)
    x = ffn_add_ln(x.reshape(B * T, D), p["ffn"],
                   p["ln3_g"], p["ln3_b"]).reshape(B, T, D)
    return x


def run_encoder(x, layers, nhead, key_padding_mask=None):
    B, S, _ = x.shape
    key_bias = key_padding_bias(key_padding_mask, B, S)      # hoisted once per stack
    for lp in layers:
        x = encoder_layer(x, lp, key_bias, nhead)
    return x


def run_decoder(x, memory, layers, nhead, src_key_padding_mask=None, causal=True):
    B, T, _ = x.shape
    S = memory.shape[1]
    tgt_key_bias = jnp.zeros((B, 1, T), jnp.float32)          # no tgt key padding
    mem_key_bias = key_padding_bias(src_key_padding_mask, B, S)
    for lp in layers:
        x = decoder_layer(x, memory, lp, tgt_key_bias, mem_key_bias, nhead, causal)
    return x


# ----------------------------- IncrementalInformationAware forward -----------------------------

def iia_forward(params, nhead, src, low_tgt, high_tgt,
                low_src_key_padding_mask=None, high_src_key_padding_mask=None,
                tgt_attn_mask=None):
    pe = params["pe"]
    causal = tgt_attn_mask is not None
    # TODO(synk): only a causal tgt_attn_mask is supported in-kernel; an arbitrary
    #             boolean attention mask would need an extra additive-bias input.

    def encode(tokens, embed, layers):
        x = embed_and_pos(tokens, embed, pe)
        return run_encoder(x, layers, nhead, low_src_key_padding_mask)

    # encode_mix
    memory = encode(src, params["src_embed"], params["encoder"])
    memory_incre = encode(src, params["iia_embed"], params["iia_encoder"])
    memory_mix = jnp.concatenate((memory, memory_incre), axis=1)   # torch.cat(dim=1)

    def decode(mem, tgt, src_kpm):
        x = embed_and_pos(tgt, params["tgt_embed"], pe)
        out = run_decoder(x, mem, params["decoder"], nhead, src_kpm, causal)
        B, T, D = out.shape
        V = params["gen_w"].shape[1]
        return generator_apply(out.reshape(B * T, D),
                               params["gen_w"], params["gen_b"]).reshape(B, T, V)

    res_low = decode(memory, low_tgt, low_src_key_padding_mask)
    res_high = decode(memory_mix, high_tgt, high_src_key_padding_mask)
    return res_low, res_high


# ----------------------------- deterministic parameter init -----------------------------

_WDTYPE = jnp.bfloat16   # MXU operand dtype (weights + activations)


def _w(key, shape, fan_in):
    return (jax.random.normal(key, shape, jnp.float32) / math.sqrt(fan_in)).astype(_WDTYPE)


def init_self_attn(key, D):
    k1, k2 = jax.random.split(key)
    return dict(wqkv=_w(k1, (D, 3 * D), D), bqkv=jnp.zeros((3 * D,), jnp.float32),
                wo=_w(k2, (D, D), D), bo=jnp.zeros((D,), jnp.float32))


def init_cross_attn(key, D):
    k1, k2, k3 = jax.random.split(key, 3)
    return dict(wq=_w(k1, (D, D), D), bq=jnp.zeros((D,), jnp.float32),
                wkv=_w(k2, (D, 2 * D), D), bkv=jnp.zeros((2 * D,), jnp.float32),
                wo=_w(k3, (D, D), D), bo=jnp.zeros((D,), jnp.float32))


def init_ffn(key, D, F):
    k1, k2 = jax.random.split(key)
    return dict(w1=_w(k1, (D, F), D), b1=jnp.zeros((F,), jnp.float32),
                w2=_w(k2, (F, D), F), b2=jnp.zeros((D,), jnp.float32))


def init_encoder_layer(key, D, F):
    k1, k2 = jax.random.split(key)
    return dict(attn=init_self_attn(k1, D), ffn=init_ffn(k2, D, F),
                ln1_g=jnp.ones((D,), jnp.float32), ln1_b=jnp.zeros((D,), jnp.float32),
                ln2_g=jnp.ones((D,), jnp.float32), ln2_b=jnp.zeros((D,), jnp.float32))


def init_decoder_layer(key, D, F):
    k1, k2, k3 = jax.random.split(key, 3)
    return dict(self_attn=init_self_attn(k1, D), cross_attn=init_cross_attn(k2, D),
                ffn=init_ffn(k3, D, F),
                ln1_g=jnp.ones((D,), jnp.float32), ln1_b=jnp.zeros((D,), jnp.float32),
                ln2_g=jnp.ones((D,), jnp.float32), ln2_b=jnp.zeros((D,), jnp.float32),
                ln3_g=jnp.ones((D,), jnp.float32), ln3_b=jnp.zeros((D,), jnp.float32))


def init_params(key, D, F, vocab_src, vocab_tgt, n_enc, n_dec, max_len):
    ks = jax.random.split(key, 7)
    enc_keys = jax.random.split(ks[4], n_enc)
    iia_keys = jax.random.split(ks[5], n_enc)
    dec_keys = jax.random.split(ks[6], n_dec)
    return dict(
        pe=sinusoidal_pe(max_len, D),
        src_embed=_w(ks[0], (vocab_src, D), D),
        tgt_embed=_w(ks[1], (vocab_tgt, D), D),
        iia_embed=_w(ks[2], (vocab_src, D), D),
        gen_w=_w(ks[3], (D, vocab_tgt), D),
        gen_b=jnp.zeros((vocab_tgt,), jnp.float32),
        encoder=[init_encoder_layer(k, D, F) for k in enc_keys],
        iia_encoder=[init_encoder_layer(k, D, F) for k in iia_keys],
        decoder=[init_decoder_layer(k, D, F) for k in dec_keys],
    )


# ----------------------------- main -----------------------------

if __name__ == "__main__":
    # Small, lane-aligned demo dims (multiples of 8 / 128 where it matters).
    B, S, T = 2, 8, 8
    D, H, F = 256, 2, 512          # head_dim = 128 (lane-dense head slices)
    V_SRC, V_TGT = 512, 512

    key = jax.random.PRNGKey(0)
    k_par, k_src, k_low, k_high = jax.random.split(key, 4)

    params = init_params(k_par, D, F, V_SRC, V_TGT, n_enc=1, n_dec=1, max_len=64)

    src = jax.random.randint(k_src, (B, S), 0, V_SRC)
    low_tgt = jax.random.randint(k_low, (B, T), 0, V_TGT)
    high_tgt = jax.random.randint(k_high, (B, T), 0, V_TGT)

    # key-padding masks: True = pad (last two keys of batch 1 padded)
    low_kpm = jnp.zeros((B, S), dtype=bool).at[1, S - 2:].set(True)
    high_kpm = jnp.concatenate([low_kpm, low_kpm], axis=1)   # memory_mix has length 2S
    # causal target attention mask (used as a static causal flag in-kernel)
    tgt_attn_mask = jnp.triu(jnp.ones((T, T), dtype=bool), k=1)

    fwd = jax.jit(iia_forward, static_argnums=(1,))
    res_low, res_high = fwd(params, H, src, low_tgt, high_tgt,
                            low_kpm, high_kpm, tgt_attn_mask)
    jax.block_until_ready((res_low, res_high))

    assert res_low.shape == (B, T, V_TGT) and res_high.shape == (B, T, V_TGT)
    assert bool(jnp.all(jnp.isfinite(res_low))) and bool(jnp.all(jnp.isfinite(res_high)))
    # log_softmax rows should (log-)sum to ~0
    assert bool(jnp.allclose(jnp.sum(jnp.exp(res_low), axis=-1), 1.0, atol=2e-3))
    assert bool(jnp.allclose(jnp.sum(jnp.exp(res_high), axis=-1), 1.0, atol=2e-3))
    print("KERNEL_OK")
</pallas_src>

<mosaic_0001>
module attributes {stable_mosaic.version = 11 : i64} {
  func.func @_linear_kernel(%arg0: i32, %arg1: memref<8x256xbf16, #tpu.memory_space<vmem>>, %arg2: memref<256x768xbf16, #tpu.memory_space<vmem>>, %arg3: memref<1x768xf32, #tpu.memory_space<vmem>>, %arg4: memref<8x768xbf16, #tpu.memory_space<vmem>>) attributes {dimension_semantics = [#tpu.dimension_semantics<parallel>], iteration_bounds = array<i64: 2>, scalar_prefetch = 0 : i64, scratch_operands = 0 : i64, tpu.core_type = #tpu.core_type<tc>, window_params = [{transform_indices = @transform_0, window_bounds = array<i64: 8, 256>}, {pipeline_mode = #tpu.pipeline_mode<synchronous>, transform_indices = @transform_1, window_bounds = array<i64: 256, 768>}, {pipeline_mode = #tpu.pipeline_mode<synchronous>, transform_indices = @transform_2, window_bounds = array<i64: 1, 768>}, {transform_indices = @transform_3, window_bounds = array<i64: 8, 768>}]} {
    %c0 = arith.constant 0 : index
    %c0_0 = arith.constant 0 : index
    %0 = vector.load %arg1[%c0, %c0_0] : memref<8x256xbf16, #tpu.memory_space<vmem>>, vector<8x256xbf16>
    %c0_1 = arith.constant 0 : index
    %c0_2 = arith.constant 0 : index
    %1 = vector.load %arg2[%c0_1, %c0_2] : memref<256x768xbf16, #tpu.memory_space<vmem>>, vector<256x768xbf16>
    %cst = arith.constant dense<0.000000e+00> : vector<8x768xf32>
    %2 = tpu.matmul %0, %1, %cst {dimension_numbers = #tpu.dot_dimension_numbers<[1], [0], [0], [1], [0, 0, 1, 1], [], []>} : vector<8x256xbf16>, vector<256x768xbf16>, vector<8x768xf32> -> vector<8x768xf32>
    %c0_3 = arith.constant 0 : index
    %c0_4 = arith.constant 0 : index
    %3 = vector.load %arg3[%c0_3, %c0_4] : memref<1x768xf32, #tpu.memory_space<vmem>>, vector<1x768xf32>
    %4 = vector.broadcast %3 : vector<1x768xf32> to vector<8x768xf32>
    %5 = arith.addf %2, %4 : vector<8x768xf32>
    %6 = arith.truncf %5 : vector<8x768xf32> to vector<8x768xbf16>
    %c0_5 = arith.constant 0 : index
    %c0_6 = arith.constant 0 : index
    %7 = vector.load %arg4[%c0_5, %c0_6] : memref<8x768xbf16, #tpu.memory_space<vmem>>, vector<8x768xbf16>
    tpu.vector_store %arg4[%c0_5, %c0_6], %6 {strides = array<i32>} : memref<8x768xbf16, #tpu.memory_space<vmem>>, vector<8x768xbf16>,
    return
  }
  func.func @transform_0(%arg0: i32) -> (i32, i32) {
    %c0_i32 = arith.constant 0 : i32
    %c0_i32_0 = arith.constant 0 : i32
    return %arg0, %c0_i32 : i32, i32
  }
  func.func @transform_1(%arg0: i32) -> (i32, i32) {
    %c0_i32 = arith.constant 0 : i32
    %c0_i32_0 = arith.constant 0 : i32
    %c0_i32_1 = arith.constant 0 : i32
    return %c0_i32, %c0_i32_0 : i32, i32
  }
  func.func @transform_2(%arg0: i32) -> (i32, i32) {
    %c0_i32 = arith.constant 0 : i32
    %c0_i32_0 = arith.constant 0 : i32
    %c0_i32_1 = arith.constant 0 : i32
    return %c0_i32, %c0_i32_0 : i32, i32
  }
  func.func @transform_3(%arg0: i32) -> (i32, i32) {
    %c0_i32 = arith.constant 0 : i32
    %c0_i32_0 = arith.constant 0 : i32
    return %arg0, %c0_i32 : i32, i32
  }
}

module attributes {stable_mosaic.version = 11 : i64} {
  func.func @_flash_attn_kernel(%arg0: i32, %arg1: i32, %arg2: i32, %arg3: memref<1x8x256xbf16, #tpu.memory_space<vmem>>, %arg4: memref<1x8x256xbf16, #tpu.memory_space<vmem>>, %arg5: memref<1x8x256xbf16, #tpu.memory_space<vmem>>, %arg6: memref<1x1x8xf32, #tpu.memory_space<vmem>>, %arg7: memref<1x8x256xbf16, #tpu.memory_space<vmem>>, %arg8: memref<2x8x1xf32, #tpu.memory_space<vmem>>, %arg9: memref<2x8x1xf32, #tpu.memory_space<vmem>>, %arg10: memref<2x8x128xf32, #tpu.memory_space<vmem>>) attributes {dimension_semantics = [#tpu.dimension_semantics<parallel>, #tpu.dimension_semantics<parallel>, #tpu.dimension_semantics<arbitrary>], iteration_bounds = array<i64: 2, 1, 1>, scalar_prefetch = 0 : i64, scratch_operands = 3 : i64, tpu.core_type = #tpu.core_type<tc>, window_params = [{transform_indices = @transform_0, window_bounds = array<i64: 1, 8, 256>}, {transform_indices = @transform_1, window_bounds = array<i64: 1, 8, 256>}, {transform_indices = @transform_2, window_bounds = array<i64: 1, 8, 256>}, {transform_indices = @transform_3, window_bounds = array<i64: 1, 1, 8>}, {transform_indices = @transform_4, window_bounds = array<i64: 1, 8, 256>}]} {
    %c0_i32 = arith.constant 0 : i32
    %0 = arith.cmpi eq, %arg2, %c0_i32 : i32
    %1 = arith.extui %0 : i1 to i32
    %c0_i32_0 = arith.constant 0 : i32
    %2 = arith.cmpi ne, %1, %c0_i32_0 : i32
    scf.if %2 {
      %cst_58 = arith.constant 0xFF800000 : f32
      %94 = vector.broadcast %cst_58 : f32 to vector<2x8x1xf32>
      %c0_59 = arith.constant 0 : index
      %c0_60 = arith.constant 0 : index
      %c0_61 = arith.constant 0 : index
      %95 = vector.load %arg8[%c0_59, %c0_60, %c0_61] : memref<2x8x1xf32, #tpu.memory_space<vmem>>, vector<2x8x1xf32>
      tpu.vector_store %arg8[%c0_59, %c0_60, %c0_61], %94 {strides = array<i32>} : memref<2x8x1xf32, #tpu.memory_space<vmem>>, vector<2x8x1xf32>,
      %cst_62 = arith.constant 0.000000e+00 : f32
      %96 = vector.broadcast %cst_62 : f32 to vector<2x8x1xf32>
      %c0_63 = arith.constant 0 : index
      %c0_64 = arith.constant 0 : index
      %c0_65 = arith.constant 0 : index
      %97 = vector.load %arg9[%c0_63, %c0_64, %c0_65] : memref<2x8x1xf32, #tpu.memory_space<vmem>>, vector<2x8x1xf32>
      tpu.vector_store %arg9[%c0_63, %c0_64, %c0_65], %96 {strides = array<i32>} : memref<2x8x1xf32, #tpu.memory_space<vmem>>, vector<2x8x1xf32>,
      %cst_66 = arith.constant 0.000000e+00 : f32
      %98 = vector.broadcast %cst_66 : f32 to vector<2x8x128xf32>
      %c0_67 = arith.constant 0 : index
      %c0_68 = arith.constant 0 : index
      %c0_69 = arith.constant 0 : index
      %99 = vector.load %arg10[%c0_67, %c0_68, %c0_69] : memref<2x8x128xf32, #tpu.memory_space<vmem>>, vector<2x8x128xf32>
      tpu.vector_store %arg10[%c0_67, %c0_68, %c0_69], %98 {strides = array<i32>} : memref<2x8x128xf32, #tpu.memory_space<vmem>>, vector<2x8x128xf32>,
    } else {
    }
    %c0 = arith.constant 0 : index
    %c0_1 = arith.constant 0 : index
    %c0_2 = arith.constant 0 : index
    %3 = vector.load %arg3[%c0, %c0_1, %c0_2] : memref<1x8x256xbf16, #tpu.memory_space<vmem>>, vector<1x8x256xbf16>
    %4 = vector.shape_cast %3 : vector<1x8x256xbf16> to vector<8x256xbf16>
    %c0_3 = arith.constant 0 : index
    %c0_4 = arith.constant 0 : index
    %c0_5 = arith.constant 0 : index
    %5 = vector.load %arg4[%c0_3, %c0_4, %c0_5] : memref<1x8x256xbf16, #tpu.memory_space<vmem>>, vector<1x8x256xbf16>
    %6 = vector.shape_cast %5 : vector<1x8x256xbf16> to vector<8x256xbf16>
    %c0_6 = arith.constant 0 : index
    %c0_7 = arith.constant 0 : index
    %c0_8 = arith.constant 0 : index
    %7 = vector.load %arg5[%c0_6, %c0_7, %c0_8] : memref<1x8x256xbf16, #tpu.memory_space<vmem>>, vector<1x8x256xbf16>
    %8 = vector.shape_cast %7 : vector<1x8x256xbf16> to vector<8x256xbf16>
    %c0_9 = arith.constant 0 : index
    %c0_10 = arith.constant 0 : index
    %c0_11 = arith.constant 0 : index
    %9 = vector.load %arg6[%c0_9, %c0_10, %c0_11] : memref<1x1x8xf32, #tpu.memory_space<vmem>>, vector<1x1x8xf32>
    %10 = vector.shape_cast %9 : vector<1x1x8xf32> to vector<1x8xf32>
    %11 = vector.extract_strided_slice %4 {offsets = [0, 0], sizes = [8, 128], strides = [1, 1]} : vector<8x256xbf16> to vector<8x128xbf16>
    %12 = vector.extract_strided_slice %6 {offsets = [0, 0], sizes = [8, 128], strides = [1, 1]} : vector<8x256xbf16> to vector<8x128xbf16>
    %13 = vector.extract_strided_slice %8 {offsets = [0, 0], sizes = [8, 128], strides = [1, 1]} : vector<8x256xbf16> to vector<8x128xbf16>
    %cst = arith.constant dense<0.000000e+00> : vector<8x8xf32>
    %14 = tpu.matmul %11, %12, %cst {dimension_numbers = #tpu.dot_dimension_numbers<[1], [1], [0], [0], [0, 0, 1, 0], [], []>} : vector<8x128xbf16>, vector<8x128xbf16>, vector<8x8xf32> -> vector<8x8xf32>
    %cst_12 = arith.constant 0.0883883461 : f32
    %15 = vector.broadcast %cst_12 : f32 to vector<8x8xf32>
    %16 = arith.mulf %14, %15 : vector<8x8xf32>
    %17 = vector.broadcast %10 : vector<1x8xf32> to vector<8x8xf32>
    %18 = arith.addf %16, %17 : vector<8x8xf32>
    %c0_13 = arith.constant 0 : index
    %c0_14 = arith.constant 0 : index
    %c0_15 = arith.constant 0 : index
    %19 = vector.load %arg8[%c0_13, %c0_14, %c0_15] : memref<2x8x1xf32, #tpu.memory_space<vmem>>, vector<1x8x1xf32>
    %20 = vector.shape_cast %19 : vector<1x8x1xf32> to vector<8x1xf32>
    %cst_16 = arith.constant dense<0xFF800000> : vector<8xf32>
    %21 = vector.multi_reduction <maximumf>, %18, %cst_16 [1] : vector<8x8xf32> to vector<8xf32>
    %22 = vector.shape_cast %21 : vector<8xf32> to vector<8x1xf32>
    %23 = arith.maximumf %20, %22 : vector<8x1xf32>
    %24 = arith.subf %20, %23 : vector<8x1xf32>
    %25 = math.exp %24 : vector<8x1xf32>
    %26 = vector.broadcast %23 : vector<8x1xf32> to vector<8x8xf32>
    %27 = arith.subf %18, %26 : vector<8x8xf32>
    %28 = math.exp %27 : vector<8x8xf32>
    %c0_17 = arith.constant 0 : index
    %c0_18 = arith.constant 0 : index
    %c0_19 = arith.constant 0 : index
    %29 = vector.load %arg9[%c0_17, %c0_18, %c0_19] : memref<2x8x1xf32, #tpu.memory_space<vmem>>, vector<1x8x1xf32>
    %30 = vector.shape_cast %29 : vector<1x8x1xf32> to vector<8x1xf32>
    %31 = arith.mulf %25, %30 : vector<8x1xf32>
    %cst_20 = arith.constant dense<0.000000e+00> : vector<8xf32>
    %32 = vector.multi_reduction <add>, %28, %cst_20 [1] : vector<8x8xf32> to vector<8xf32>
    %33 = vector.shape_cast %32 : vector<8xf32> to vector<8x1xf32>
    %34 = arith.addf %31, %33 : vector<8x1xf32>
    %c0_21 = arith.constant 0 : index
    %c0_22 = arith.constant 0 : index
    %c0_23 = arith.constant 0 : index
    %35 = vector.load %arg9[%c0_21, %c0_22, %c0_23] : memref<2x8x1xf32, #tpu.memory_space<vmem>>, vector<1x8x1xf32>
    %36 = vector.shape_cast %35 : vector<1x8x1xf32> to vector<8x1xf32>
    %37 = vector.shape_cast %34 : vector<8x1xf32> to vector<1x8x1xf32>
    tpu.vector_store %arg9[%c0_21, %c0_22, %c0_23], %37 {strides = array<i32>} : memref<2x8x1xf32, #tpu.memory_space<vmem>>, vector<1x8x1xf32>,
    %c0_24 = arith.constant 0 : index
    %c0_25 = arith.constant 0 : index
    %c0_26 = arith.constant 0 : index
    %38 = vector.load %arg10[%c0_24, %c0_25, %c0_26] : memref<2x8x128xf32, #tpu.memory_space<vmem>>, vector<1x8x128xf32>
    %39 = vector.shape_cast %38 : vector<1x8x128xf32> to vector<8x128xf32>
    %40 = vector.broadcast %25 : vector<8x1xf32> to vector<8x128xf32>
    %41 = arith.mulf %40, %39 : vector<8x128xf32>
    %42 = arith.truncf %28 : vector<8x8xf32> to vector<8x8xbf16>
    %cst_27 = arith.constant dense<0.000000e+00> : vector<8x128xf32>
    %43 = tpu.matmul %42, %13, %cst_27 {dimension_numbers = #tpu.dot_dimension_numbers<[1], [0], [0], [1], [0, 0, 1, 1], [], []>} : vector<8x8xbf16>, vector<8x128xbf16>, vector<8x128xf32> -> vector<8x128xf32>
    %44 = arith.addf %41, %43 : vector<8x128xf32>
    %c0_28 = arith.constant 0 : index
    %c0_29 = arith.constant 0 : index
    %c0_30 = arith.constant 0 : index
    %45 = vector.load %arg10[%c0_28, %c0_29, %c0_30] : memref<2x8x128xf32, #tpu.memory_space<vmem>>, vector<1x8x128xf32>
    %46 = vector.shape_cast %45 : vector<1x8x128xf32> to vector<8x128xf32>
    %47 = vector.shape_cast %44 : vector<8x128xf32> to vector<1x8x128xf32>
    tpu.vector_store %arg10[%c0_28, %c0_29, %c0_30], %47 {strides = array<i32>} : memref<2x8x128xf32, #tpu.memory_space<vmem>>, vector<1x8x128xf32>,
    %c0_31 = arith.constant 0 : index
    %c0_32 = arith.constant 0 : index
    %c0_33 = arith.constant 0 : index
    %48 = vector.load %arg8[%c0_31, %c0_32, %c0_33] : memref<2x8x1xf32, #tpu.memory_space<vmem>>, vector<1x8x1xf32>
    %49 = vector.shape_cast %48 : vector<1x8x1xf32> to vector<8x1xf32>
    %50 = vector.shape_cast %23 : vector<8x1xf32> to vector<1x8x1xf32>
    tpu.vector_store %arg8[%c0_31, %c0_32, %c0_33], %50 {strides = array<i32>} : memref<2x8x1xf32, #tpu.memory_space<vmem>>, vector<1x8x1xf32>,
    %51 = vector.extract_strided_slice %4 {offsets = [0, 128], sizes = [8, 128], strides = [1, 1]} : vector<8x256xbf16> to vector<8x128xbf16>
    %52 = vector.extract_strided_slice %6 {offsets = [0, 128], sizes = [8, 128], strides = [1, 1]} : vector<8x256xbf16> to vector<8x128xbf16>
    %53 = vector.extract_strided_slice %8 {offsets = [0, 128], sizes = [8, 128], strides = [1, 1]} : vector<8x256xbf16> to vector<8x128xbf16>
    %cst_34 = arith.constant dense<0.000000e+00> : vector<8x8xf32>
    %54 = tpu.matmul %51, %52, %cst_34 {dimension_numbers = #tpu.dot_dimension_numbers<[1], [1], [0], [0], [0, 0, 1, 0], [], []>} : vector<8x128xbf16>, vector<8x128xbf16>, vector<8x8xf32> -> vector<8x8xf32>
    %cst_35 = arith.constant 0.0883883461 : f32
    %55 = vector.broadcast %cst_35 : f32 to vector<8x8xf32>
    %56 = arith.mulf %54, %55 : vector<8x8xf32>
    %57 = vector.broadcast %10 : vector<1x8xf32> to vector<8x8xf32>
    %58 = arith.addf %56, %57 : vector<8x8xf32>
    %c1 = arith.constant 1 : index
    %c0_36 = arith.constant 0 : index
    %c0_37 = arith.constant 0 : index
    %59 = vector.load %arg8[%c1, %c0_36, %c0_37] : memref<2x8x1xf32, #tpu.memory_space<vmem>>, vector<1x8x1xf32>
    %60 = vector.shape_cast %59 : vector<1x8x1xf32> to vector<8x1xf32>
    %cst_38 = arith.constant dense<0xFF800000> : vector<8xf32>
    %61 = vector.multi_reduction <maximumf>, %58, %cst_38 [1] : vector<8x8xf32> to vector<8xf32>
    %62 = vector.shape_cast %61 : vector<8xf32> to vector<8x1xf32>
    %63 = arith.maximumf %60, %62 : vector<8x1xf32>
    %64 = arith.subf %60, %63 : vector<8x1xf32>
    %65 = math.exp %64 : vector<8x1xf32>
    %66 = vector.broadcast %63 : vector<8x1xf32> to vector<8x8xf32>
    %67 = arith.subf %58, %66 : vector<8x8xf32>
    %68 = math.exp %67 : vector<8x8xf32>
    %c1_39 = arith.constant 1 : index
    %c0_40 = arith.constant 0 : index
    %c0_41 = arith.constant 0 : index
    %69 = vector.load %arg9[%c1_39, %c0_40, %c0_41] : memref<2x8x1xf32, #tpu.memory_space<vmem>>, vector<1x8x1xf32>
    %70 = vector.shape_cast %69 : vector<1x8x1xf32> to vector<8x1xf32>
    %71 = arith.mulf %65, %70 : vector<8x1xf32>
    %cst_42 = arith.constant dense<0.000000e+00> : vector<8xf32>
    %72 = vector.multi_reduction <add>, %68, %cst_42 [1] : vector<8x8xf32> to vector<8xf32>
    %73 = vector.shape_cast %72 : vector<8xf32> to vector<8x1xf32>
    %74 = arith.addf %71, %73 : vector<8x1xf32>
    %c1_43 = arith.constant 1 : index
    %c0_44 = arith.constant 0 : index
    %c0_45 = arith.constant 0 : index
    %75 = vector.load %arg9[%c1_43, %c0_44, %c0_45] : memref<2x8x1xf32, #tpu.memory_space<vmem>>, vector<1x8x1xf32>
    %76 = vector.shape_cast %75 : vector<1x8x1xf32> to vector<8x1xf32>
    %77 = vector.shape_cast %74 : vector<8x1xf32> to vector<1x8x1xf32>
    tpu.vector_store %arg9[%c1_43, %c0_44, %c0_45], %77 {strides = array<i32>} : memref<2x8x1xf32, #tpu.memory_space<vmem>>, vector<1x8x1xf32>,
    %c1_46 = arith.constant 1 : index
    %c0_47 = arith.constant 0 : index
    %c0_48 = arith.constant 0 : index
    %78 = vector.load %arg10[%c1_46, %c0_47, %c0_48] : memref<2x8x128xf32, #tpu.memory_space<vmem>>, vector<1x8x128xf32>
    %79 = vector.shape_cast %78 : vector<1x8x128xf32> to vector<8x128xf32>
    %80 = vector.broadcast %65 : vector<8x1xf32> to vector<8x128xf32>
    %81 = arith.mulf %80, %79 : vector<8x128xf32>
    %82 = arith.truncf %68 : vector<8x8xf32> to vector<8x8xbf16>
    %cst_49 = arith.constant dense<0.000000e+00> : vector<8x128xf32>
    %83 = tpu.matmul %82, %53, %cst_49 {dimension_numbers = #tpu.dot_dimension_numbers<[1], [0], [0], [1], [0, 0, 1, 1], [], []>} : vector<8x8xbf16>, vector<8x128xbf16>, vector<8x128xf32> -> vector<8x128xf32>
    %84 = arith.addf %81, %83 : vector<8x128xf32>
    %c1_50 = arith.constant 1 : index
    %c0_51 = arith.constant 0 : index
    %c0_52 = arith.constant 0 : index
    %85 = vector.load %arg10[%c1_50, %c0_51, %c0_52] : memref<2x8x128xf32, #tpu.memory_space<vmem>>, vector<1x8x128xf32>
    %86 = vector.shape_cast %85 : vector<1x8x128xf32> to vector<8x128xf32>
    %87 = vector.shape_cast %84 : vector<8x128xf32> to vector<1x8x128xf32>
    tpu.vector_store %arg10[%c1_50, %c0_51, %c0_52], %87 {strides = array<i32>} : memref<2x8x128xf32, #tpu.memory_space<vmem>>, vector<1x8x128xf32>,
    %c1_53 = arith.constant 1 : index
    %c0_54 = arith.constant 0 : index
    %c0_55 = arith.constant 0 : index
    %88 = vector.load %arg8[%c1_53, %c0_54, %c0_55] : memref<2x8x1xf32, #tpu.memory_space<vmem>>, vector<1x8x1xf32>
    %89 = vector.shape_cast %88 : vector<1x8x1xf32> to vector<8x1xf32>
    %90 = vector.shape_cast %63 : vector<8x1xf32> to vector<1x8x1xf32>
    tpu.vector_store %arg8[%c1_53, %c0_54, %c0_55], %90 {strides = array<i32>} : memref<2x8x1xf32, #tpu.memory_space<vmem>>, vector<1x8x1xf32>,
    %c0_i32_56 = arith.constant 0 : i32
    %91 = arith.cmpi eq, %arg2, %c0_i32_56 : i32
    %92 = arith.extui %91 : i1 to i32
    %c0_i32_57 = arith.constant 0 : i32
    %93 = arith.cmpi ne, %92, %c0_i32_57 : i32
    scf.if %93 {
      %c0_58 = arith.constant 0 : index
      %c0_59 = arith.constant 0 : index
      %c0_60 = arith.constant 0 : index
      %94 = vector.load %arg10[%c0_58, %c0_59, %c0_60] : memref<2x8x128xf32, #tpu.memory_space<vmem>>, vector<1x8x128xf32>
      %95 = vector.shape_cast %94 : vector<1x8x128xf32> to vector<8x128xf32>
      %c0_61 = arith.constant 0 : index
      %c0_62 = arith.constant 0 : index
      %c0_63 = arith.constant 0 : index
      %96 = vector.load %arg9[%c0_61, %c0_62, %c0_63] : memref<2x8x1xf32, #tpu.memory_space<vmem>>, vector<1x8x1xf32>
      %97 = vector.shape_cast %96 : vector<1x8x1xf32> to vector<8x1xf32>
      %98 = tpu.reciprocal %97 {approx = true} : vector<8x1xf32> -> vector<8x1xf32>
      %99 = vector.broadcast %98 : vector<8x1xf32> to vector<8x128xf32>
      %100 = arith.mulf %95, %99 : vector<8x128xf32>
      %c1_64 = arith.constant 1 : index
      %c0_65 = arith.constant 0 : index
      %c0_66 = arith.constant 0 : index
      %101 = vector.load %arg10[%c1_64, %c0_65, %c0_66] : memref<2x8x128xf32, #tpu.memory_space<vmem>>, vector<1x8x128xf32>
      %102 = vector.shape_cast %101 : vector<1x8x128xf32> to vector<8x128xf32>
      %c1_67 = arith.constant 1 : index
      %c0_68 = arith.constant 0 : index
      %c0_69 = arith.constant 0 : index
      %103 = vector.load %arg9[%c1_67, %c0_68, %c0_69] : memref<2x8x1xf32, #tpu.memory_space<vmem>>, vector<1x8x1xf32>
      %104 = vector.shape_cast %103 : vector<1x8x1xf32> to vector<8x1xf32>
      %105 = tpu.reciprocal %104 {approx = true} : vector<8x1xf32> -> vector<8x1xf32>
      %106 = vector.broadcast %105 : vector<8x1xf32> to vector<8x128xf32>
      %107 = arith.mulf %102, %106 : vector<8x128xf32>
      %108 = tpu.concatenate %100, %107 in 1 : vector<8x128xf32>, vector<8x128xf32> -> vector<8x256xf32>
      %109 = arith.truncf %108 : vector<8x256xf32> to vector<8x256xbf16>
      %c0_70 = arith.constant 0 : index
      %c0_71 = arith.constant 0 : index
      %c0_72 = arith.constant 0 : index
      %110 = vector.load %arg7[%c0_70, %c0_71, %c0_72] : memref<1x8x256xbf16, #tpu.memory_space<vmem>>, vector<1x8x256xbf16>
      %111 = vector.shape_cast %110 : vector<1x8x256xbf16> to vector<8x256xbf16>
      %112 = vector.shape_cast %109 : vector<8x256xbf16> to vector<1x8x256xbf16>
      tpu.vector_store %arg7[%c0_70, %c0_71, %c0_72], %112 {strides = array<i32>} : memref<1x8x256xbf16, #tpu.memory_space<vmem>>, vector<1x8x256xbf16>,
    } else {
    }
    return
  }
  func.func @transform_0(%arg0: i32, %arg1: i32, %arg2: i32) -> (i32, i32, i32) {
    %c0_i32 = arith.constant 0 : i32
    %c0_i32_0 = arith.constant 0 : i32
    return %arg0, %arg1, %c0_i32 : i32, i32, i32
  }
  func.func @transform_1(%arg0: i32, %arg1: i32, %arg2: i32) -> (i32, i32, i32) {
    %c1_i32 = arith.constant 1 : i32
    %c0_i32 = arith.constant 0 : i32
    return %arg0, %arg2, %c1_i32 : i32, i32, i32
  }
  func.func @transform_2(%arg0: i32, %arg1: i32, %arg2: i32) -> (i32, i32, i32) {
    %c2_i32 = arith.constant 2 : i32
    %c0_i32 = arith.constant 0 : i32
    return %arg0, %arg2, %c2_i32 : i32, i32, i32
  }
  func.func @transform_3(%arg0: i32, %arg1: i32, %arg2: i32) -> (i32, i32, i32) {
    %c0_i32 = arith.constant 0 : i32
    %c0_i32_0 = arith.constant 0 : i32
    return %arg0, %c0_i32, %arg2 : i32, i32, i32
  }
  func.func @transform_4(%arg0: i32, %arg1: i32, %arg2: i32) -> (i32, i32, i32) {
    %c0_i32 = arith.constant 0 : i32
    %c0_i32_0 = arith.constant 0 : i32
    return %arg0, %arg1, %c0_i32 : i32, i32, i32
  }
}

module attributes {stable_mosaic.version = 11 : i64} {
  func.func @_linear_add_ln_kernel(%arg0: i32, %arg1: memref<8x256xbf16, #tpu.memory_space<vmem>>, %arg2: memref<256x256xbf16, #tpu.memory_space<vmem>>, %arg3: memref<1x256xf32, #tpu.memory_space<vmem>>, %arg4: memref<8x256xbf16, #tpu.memory_space<vmem>>, %arg5: memref<1x256xf32, #tpu.memory_space<vmem>>, %arg6: memref<1x256xf32, #tpu.memory_space<vmem>>, %arg7: memref<8x256xbf16, #tpu.memory_space<vmem>>) attributes {dimension_semantics = [#tpu.dimension_semantics<parallel>], iteration_bounds = array<i64: 2>, scalar_prefetch = 0 : i64, scratch_operands = 0 : i64, tpu.core_type = #tpu.core_type<tc>, window_params = [{transform_indices = @transform_0, window_bounds = array<i64: 8, 256>}, {pipeline_mode = #tpu.pipeline_mode<synchronous>, transform_indices = @transform_1, window_bounds = array<i64: 256, 256>}, {pipeline_mode = #tpu.pipeline_mode<synchronous>, transform_indices = @transform_2, window_bounds = array<i64: 1, 256>}, {transform_indices = @transform_3, window_bounds = array<i64: 8, 256>}, {pipeline_mode = #tpu.pipeline_mode<synchronous>, transform_indices = @transform_4, window_bounds = array<i64: 1, 256>}, {pipeline_mode = #tpu.pipeline_mode<synchronous>, transform_indices = @transform_5, window_bounds = array<i64: 1, 256>}, {transform_indices = @transform_6, window_bounds = array<i64: 8, 256>}]} {
    %c0 = arith.constant 0 : index
    %c0_0 = arith.constant 0 : index
    %0 = vector.load %arg1[%c0, %c0_0] : memref<8x256xbf16, #tpu.memory_space<vmem>>, vector<8x256xbf16>
    %c0_1 = arith.constant 0 : index
    %c0_2 = arith.constant 0 : index
    %1 = vector.load %arg2[%c0_1, %c0_2] : memref<256x256xbf16, #tpu.memory_space<vmem>>, vector<256x256xbf16>
    %cst = arith.constant dense<0.000000e+00> : vector<8x256xf32>
    %2 = tpu.matmul %0, %1, %cst {dimension_numbers = #tpu.dot_dimension_numbers<[1], [0], [0], [1], [0, 0, 1, 1], [], []>} : vector<8x256xbf16>, vector<256x256xbf16>, vector<8x256xf32> -> vector<8x256xf32>
    %c0_3 = arith.constant 0 : index
    %c0_4 = arith.constant 0 : index
    %3 = vector.load %arg3[%c0_3, %c0_4] : memref<1x256xf32, #tpu.memory_space<vmem>>, vector<1x256xf32>
    %4 = vector.broadcast %3 : vector<1x256xf32> to vector<8x256xf32>
    %5 = arith.addf %2, %4 : vector<8x256xf32>
    %c0_5 = arith.constant 0 : index
    %c0_6 = arith.constant 0 : index
    %6 = vector.load %arg4[%c0_5, %c0_6] : memref<8x256xbf16, #tpu.memory_space<vmem>>, vector<8x256xbf16>
    %7 = arith.extf %6 : vector<8x256xbf16> to vector<8x256xf32>
    %8 = arith.addf %5, %7 : vector<8x256xf32>
    %cst_7 = arith.constant dense<0.000000e+00> : vector<8xf32>
    %9 = vector.multi_reduction <add>, %8, %cst_7 [1] : vector<8x256xf32> to vector<8xf32>
    %10 = vector.shape_cast %9 : vector<8xf32> to vector<8x1xf32>
    %cst_8 = arith.constant 2.560000e+02 : f32
    %11 = vector.broadcast %cst_8 : f32 to vector<8x1xf32>
    %12 = arith.divf %10, %11 : vector<8x1xf32>
    %13 = vector.broadcast %12 : vector<8x1xf32> to vector<8x256xf32>
    %14 = arith.subf %8, %13 : vector<8x256xf32>
    %15 = arith.mulf %14, %14 : vector<8x256xf32>
    %cst_9 = arith.constant dense<0.000000e+00> : vector<8xf32>
    %16 = vector.multi_reduction <add>, %15, %cst_9 [1] : vector<8x256xf32> to vector<8xf32>
    %17 = vector.shape_cast %16 : vector<8xf32> to vector<8x1xf32>
    %cst_10 = arith.constant 2.560000e+02 : f32
    %18 = vector.broadcast %cst_10 : f32 to vector<8x1xf32>
    %19 = arith.divf %17, %18 : vector<8x1xf32>
    %cst_11 = arith.constant 9.99999974E-6 : f32
    %20 = vector.broadcast %cst_11 : f32 to vector<8x1xf32>
    %21 = arith.addf %19, %20 : vector<8x1xf32>
    %22 = math.rsqrt %21 : vector<8x1xf32>
    %23 = vector.broadcast %22 : vector<8x1xf32> to vector<8x256xf32>
    %24 = arith.mulf %14, %23 : vector<8x256xf32>
    %c0_12 = arith.constant 0 : index
    %c0_13 = arith.constant 0 : index
    %25 = vector.load %arg5[%c0_12, %c0_13] : memref<1x256xf32, #tpu.memory_space<vmem>>, vector<1x256xf32>
    %26 = vector.broadcast %25 : vector<1x256xf32> to vector<8x256xf32>
    %27 = arith.mulf %24, %26 : vector<8x256xf32>
    %c0_14 = arith.constant 0 : index
    %c0_15 = arith.constant 0 : index
    %28 = vector.load %arg6[%c0_14, %c0_15] : memref<1x256xf32, #tpu.memory_space<vmem>>, vector<1x256xf32>
    %29 = vector.broadcast %28 : vector<1x256xf32> to vector<8x256xf32>
    %30 = arith.addf %27, %29 : vector<8x256xf32>
    %31 = arith.truncf %30 : vector<8x256xf32> to vector<8x256xbf16>
    %c0_16 = arith.constant 0 : index
    %c0_17 = arith.constant 0 : index
    %32 = vector.load %arg7[%c0_16, %c0_17] : memref<8x256xbf16, #tpu.memory_space<vmem>>, vector<8x256xbf16>
    tpu.vector_store %arg7[%c0_16, %c0_17], %31 {strides = array<i32>} : memref<8x256xbf16, #tpu.memory_space<vmem>>, vector<8x256xbf16>,
    return
  }
  func.func @transform_0(%arg0: i32) -> (i32, i32) {
    %c0_i32 = arith.constant 0 : i32
    %c0_i32_0 = arith.constant 0 : i32
    return %arg0, %c0_i32 : i32, i32
  }
  func.func @transform_1(%arg0: i32) -> (i32, i32) {
    %c0_i32 = arith.constant 0 : i32
    %c0_i32_0 = arith.constant 0 : i32
    %c0_i32_1 = arith.constant 0 : i32
    return %c0_i32, %c0_i32_0 : i32, i32
  }
  func.func @transform_2(%arg0: i32) -> (i32, i32) {
    %c0_i32 = arith.constant 0 : i32
    %c0_i32_0 = arith.constant 0 : i32
    %c0_i32_1 = arith.constant 0 : i32
    return %c0_i32, %c0_i32_0 : i32, i32
  }
  func.func @transform_3(%arg0: i32) -> (i32, i32) {
    %c0_i32 = arith.constant 0 : i32
    %c0_i32_0 = arith.constant 0 : i32
    return %arg0, %c0_i32 : i32, i32
  }
  func.func @transform_4(%arg0: i32) -> (i32, i32) {
    %c0_i32 = arith.constant 0 : i32
    %c0_i32_0 = arith.constant 0 : i32
    %c0_i32_1 = arith.constant 0 : i32
    return %c0_i32, %c0_i32_0 : i32, i32
  }
  func.func @transform_5(%arg0: i32) -> (i32, i32) {
    %c0_i32 = arith.constant 0 : i32
    %c0_i32_0 = arith.constant 0 : i32
    %c0_i32_1 = arith.constant 0 : i32
    return %c0_i32, %c0_i32_0 : i32, i32
  }
  func.func @transform_6(%arg0: i32) -> (i32, i32) {
    %c0_i32 = arith.constant 0 : i32
    %c0_i32_0 = arith.constant 0 : i32
    return %arg0, %c0_i32 : i32, i32
  }
}

module attributes {stable_mosaic.version = 11 : i64} {
  func.func @_ffn_ln_kernel(%arg0: i32, %arg1: i32, %arg2: memref<8x256xbf16, #tpu.memory_space<vmem>>, %arg3: memref<256x512xbf16, #tpu.memory_space<vmem>>, %arg4: memref<1x512xf32, #tpu.memory_space<vmem>>, %arg5: memref<512x256xbf16, #tpu.memory_space<vmem>>, %arg6: memref<1x256xf32, #tpu.memory_space<vmem>>, %arg7: memref<1x256xf32, #tpu.memory_space<vmem>>, %arg8: memref<1x256xf32, #tpu.memory_space<vmem>>, %arg9: memref<8x256xbf16, #tpu.memory_space<vmem>>, %arg10: memref<8x256xf32, #tpu.memory_space<vmem>>) attributes {dimension_semantics = [#tpu.dimension_semantics<parallel>, #tpu.dimension_semantics<arbitrary>], iteration_bounds = array<i64: 2, 1>, scalar_prefetch = 0 : i64, scratch_operands = 1 : i64, tpu.core_type = #tpu.core_type<tc>, window_params = [{transform_indices = @transform_0, window_bounds = array<i64: 8, 256>}, {transform_indices = @transform_1, window_bounds = array<i64: 256, 512>}, {transform_indices = @transform_2, window_bounds = array<i64: 1, 512>}, {transform_indices = @transform_3, window_bounds = array<i64: 512, 256>}, {pipeline_mode = #tpu.pipeline_mode<synchronous>, transform_indices = @transform_4, window_bounds = array<i64: 1, 256>}, {pipeline_mode = #tpu.pipeline_mode<synchronous>, transform_indices = @transform_5, window_bounds = array<i64: 1, 256>}, {pipeline_mode = #tpu.pipeline_mode<synchronous>, transform_indices = @transform_6, window_bounds = array<i64: 1, 256>}, {transform_indices = @transform_7, window_bounds = array<i64: 8, 256>}]} {
    %c0_i32 = arith.constant 0 : i32
    %0 = arith.cmpi eq, %arg1, %c0_i32 : i32
    %1 = arith.extui %0 : i1 to i32
    %c0_i32_0 = arith.constant 0 : i32
    %2 = arith.cmpi ne, %1, %c0_i32_0 : i32
    scf.if %2 {
      %cst_16 = arith.constant 0.000000e+00 : f32
      %20 = vector.broadcast %cst_16 : f32 to vector<8x256xf32>
      %c0_17 = arith.constant 0 : index
      %c0_18 = arith.constant 0 : index
      %21 = vector.load %arg10[%c0_17, %c0_18] : memref<8x256xf32, #tpu.memory_space<vmem>>, vector<8x256xf32>
      tpu.vector_store %arg10[%c0_17, %c0_18], %20 {strides = array<i32>} : memref<8x256xf32, #tpu.memory_space<vmem>>, vector<8x256xf32>,
    } else {
    }
    %c0 = arith.constant 0 : index
    %c0_1 = arith.constant 0 : index
    %3 = vector.load %arg2[%c0, %c0_1] : memref<8x256xbf16, #tpu.memory_space<vmem>>, vector<8x256xbf16>
    %c0_2 = arith.constant 0 : index
    %c0_3 = arith.constant 0 : index
    %4 = vector.load %arg3[%c0_2, %c0_3] : memref<256x512xbf16, #tpu.memory_space<vmem>>, vector<256x512xbf16>
    %cst = arith.constant dense<0.000000e+00> : vector<8x512xf32>
    %5 = tpu.matmul %3, %4, %cst {dimension_numbers = #tpu.dot_dimension_numbers<[1], [0], [0], [1], [0, 0, 1, 1], [], []>} : vector<8x256xbf16>, vector<256x512xbf16>, vector<8x512xf32> -> vector<8x512xf32>
    %c0_4 = arith.constant 0 : index
    %c0_5 = arith.constant 0 : index
    %6 = vector.load %arg4[%c0_4, %c0_5] : memref<1x512xf32, #tpu.memory_space<vmem>>, vector<1x512xf32>
    %7 = vector.broadcast %6 : vector<1x512xf32> to vector<8x512xf32>
    %8 = arith.addf %5, %7 : vector<8x512xf32>
    %cst_6 = arith.constant 0.000000e+00 : f32
    %9 = vector.broadcast %cst_6 : f32 to vector<8x512xf32>
    %10 = arith.maximumf %8, %9 : vector<8x512xf32>
    %c0_7 = arith.constant 0 : index
    %c0_8 = arith.constant 0 : index
    %11 = vector.load %arg10[%c0_7, %c0_8] : memref<8x256xf32, #tpu.memory_space<vmem>>, vector<8x256xf32>
    %12 = arith.truncf %10 : vector<8x512xf32> to vector<8x512xbf16>
    %c0_9 = arith.constant 0 : index
    %c0_10 = arith.constant 0 : index
    %13 = vector.load %arg5[%c0_9, %c0_10] : memref<512x256xbf16, #tpu.memory_space<vmem>>, vector<512x256xbf16>
    %cst_11 = arith.constant dense<0.000000e+00> : vector<8x256xf32>
    %14 = tpu.matmul %12, %13, %cst_11 {dimension_numbers = #tpu.dot_dimension_numbers<[1], [0], [0], [1], [0, 0, 1, 1], [], []>} : vector<8x512xbf16>, vector<512x256xbf16>, vector<8x256xf32> -> vector<8x256xf32>
    %15 = arith.addf %11, %14 : vector<8x256xf32>
    %c0_12 = arith.constant 0 : index
    %c0_13 = arith.constant 0 : index
    %16 = vector.load %arg10[%c0_12, %c0_13] : memref<8x256xf32, #tpu.memory_space<vmem>>, vector<8x256xf32>
    tpu.vector_store %arg10[%c0_12, %c0_13], %15 {strides = array<i32>} : memref<8x256xf32, #tpu.memory_space<vmem>>, vector<8x256xf32>,
    %c0_i32_14 = arith.constant 0 : i32
    %17 = arith.cmpi eq, %arg1, %c0_i32_14 : i32
    %18 = arith.extui %17 : i1 to i32
    %c0_i32_15 = arith.constant 0 : i32
    %19 = arith.cmpi ne, %18, %c0_i32_15 : i32
    scf.if %19 {
      %c0_16 = arith.constant 0 : index
      %c0_17 = arith.constant 0 : index
      %20 = vector.load %arg10[%c0_16, %c0_17] : memref<8x256xf32, #tpu.memory_space<vmem>>, vector<8x256xf32>
      %c0_18 = arith.constant 0 : index
      %c0_19 = arith.constant 0 : index
      %21 = vector.load %arg6[%c0_18, %c0_19] : memref<1x256xf32, #tpu.memory_space<vmem>>, vector<1x256xf32>
      %22 = vector.broadcast %21 : vector<1x256xf32> to vector<8x256xf32>
      %23 = arith.addf %20, %22 : vector<8x256xf32>
      %c0_20 = arith.constant 0 : index
      %c0_21 = arith.constant 0 : index
      %24 = vector.load %arg2[%c0_20, %c0_21] : memref<8x256xbf16, #tpu.memory_space<vmem>>, vector<8x256xbf16>
      %25 = arith.extf %24 : vector<8x256xbf16> to vector<8x256xf32>
      %26 = arith.addf %23, %25 : vector<8x256xf32>
      %cst_22 = arith.constant dense<0.000000e+00> : vector<8xf32>
      %27 = vector.multi_reduction <add>, %26, %cst_22 [1] : vector<8x256xf32> to vector<8xf32>
      %28 = vector.shape_cast %27 : vector<8xf32> to vector<8x1xf32>
      %cst_23 = arith.constant 2.560000e+02 : f32
      %29 = vector.broadcast %cst_23 : f32 to vector<8x1xf32>
      %30 = arith.divf %28, %29 : vector<8x1xf32>
      %31 = vector.broadcast %30 : vector<8x1xf32> to vector<8x256xf32>
      %32 = arith.subf %26, %31 : vector<8x256xf32>
      %33 = arith.mulf %32, %32 : vector<8x256xf32>
      %cst_24 = arith.constant dense<0.000000e+00> : vector<8xf32>
      %34 = vector.multi_reduction <add>, %33, %cst_24 [1] : vector<8x256xf32> to vector<8xf32>
      %35 = vector.shape_cast %34 : vector<8xf32> to vector<8x1xf32>
      %cst_25 = arith.constant 2.560000e+02 : f32
      %36 = vector.broadcast %cst_25 : f32 to vector<8x1xf32>
      %37 = arith.divf %35, %36 : vector<8x1xf32>
      %cst_26 = arith.constant 9.99999974E-6 : f32
      %38 = vector.broadcast %cst_26 : f32 to vector<8x1xf32>
      %39 = arith.addf %37, %38 : vector<8x1xf32>
      %40 = math.rsqrt %39 : vector<8x1xf32>
      %41 = vector.broadcast %40 : vector<8x1xf32> to vector<8x256xf32>
      %42 = arith.mulf %32, %41 : vector<8x256xf32>
      %c0_27 = arith.constant 0 : index
      %c0_28 = arith.constant 0 : index
      %43 = vector.load %arg7[%c0_27, %c0_28] : memref<1x256xf32, #tpu.memory_space<vmem>>, vector<1x256xf32>
      %44 = vector.broadcast %43 : vector<1x256xf32> to vector<8x256xf32>
      %45 = arith.mulf %42, %44 : vector<8x256xf32>
      %c0_29 = arith.constant 0 : index
      %c0_30 = arith.constant 0 : index
      %46 = vector.load %arg8[%c0_29, %c0_30] : memref<1x256xf32, #tpu.memory_space<vmem>>, vector<1x256xf32>
      %47 = vector.broadcast %46 : vector<1x256xf32> to vector<8x256xf32>
      %48 = arith.addf %45, %47 : vector<8x256xf32>
      %49 = arith.truncf %48 : vector<8x256xf32> to vector<8x256xbf16>
      %c0_31 = arith.constant 0 : index
      %c0_32 = arith.constant 0 : index
      %50 = vector.load %arg9[%c0_31, %c0_32] : memref<8x256xbf16, #tpu.memory_space<vmem>>, vector<8x256xbf16>
      tpu.vector_store %arg9[%c0_31, %c0_32], %49 {strides = array<i32>} : memref<8x256xbf16, #tpu.memory_space<vmem>>, vector<8x256xbf16>,
    } else {
    }
    return
  }
  func.func @transform_0(%arg0: i32, %arg1: i32) -> (i32, i32) {
    %c0_i32 = arith.constant 0 : i32
    %c0_i32_0 = arith.constant 0 : i32
    return %arg0, %c0_i32 : i32, i32
  }
  func.func @transform_1(%arg0: i32, %arg1: i32) -> (i32, i32) {
    %c0_i32 = arith.constant 0 : i32
    %c0_i32_0 = arith.constant 0 : i32
    return %c0_i32, %arg1 : i32, i32
  }
  func.func @transform_2(%arg0: i32, %arg1: i32) -> (i32, i32) {
    %c0_i32 = arith.constant 0 : i32
    %c0_i32_0 = arith.constant 0 : i32
    return %c0_i32, %arg1 : i32, i32
  }
  func.func @transform_3(%arg0: i32, %arg1: i32) -> (i32, i32) {
    %c0_i32 = arith.constant 0 : i32
    %c0_i32_0 = arith.constant 0 : i32
    return %arg1, %c0_i32 : i32, i32
  }
  func.func @transform_4(%arg0: i32, %arg1: i32) -> (i32, i32) {
    %c0_i32 = arith.constant 0 : i32
    %c0_i32_0 = arith.constant 0 : i32
    %c0_i32_1 = arith.constant 0 : i32
    return %c0_i32, %c0_i32_0 : i32, i32
  }
  func.func @transform_5(%arg0: i32, %arg1: i32) -> (i32, i32) {
    %c0_i32 = arith.constant 0 : i32
    %c0_i32_0 = arith.constant 0 : i32
    %c0_i32_1 = arith.constant 0 : i32
    return %c0_i32, %c0_i32_0 : i32, i32
  }
  func.func @transform_6(%arg0: i32, %arg1: i32) -> (i32, i32) {
    %c0_i32 = arith.constant 0 : i32
    %c0_i32_0 = arith.constant 0 : i32
    %c0_i32_1 = arith.constant 0 : i32
    return %c0_i32, %c0_i32_0 : i32, i32
  }
  func.func @transform_7(%arg0: i32, %arg1: i32) -> (i32, i32) {
    %c0_i32 = arith.constant 0 : i32
    %c0_i32_0 = arith.constant 0 : i32
    return %arg0, %c0_i32 : i32, i32
  }
}

module attributes {stable_mosaic.version = 11 : i64} {
  func.func @_linear_kernel(%arg0: i32, %arg1: memref<16x256xbf16, #tpu.memory_space<vmem>>, %arg2: memref<256x512xbf16, #tpu.memory_space<vmem>>, %arg3: memref<1x512xf32, #tpu.memory_space<vmem>>, %arg4: memref<16x512xbf16, #tpu.memory_space<vmem>>) attributes {dimension_semantics = [#tpu.dimension_semantics<parallel>], iteration_bounds = array<i64: 2>, scalar_prefetch = 0 : i64, scratch_operands = 0 : i64, tpu.core_type = #tpu.core_type<tc>, window_params = [{transform_indices = @transform_0, window_bounds = array<i64: 16, 256>}, {pipeline_mode = #tpu.pipeline_mode<synchronous>, transform_indices = @transform_1, window_bounds = array<i64: 256, 512>}, {pipeline_mode = #tpu.pipeline_mode<synchronous>, transform_indices = @transform_2, window_bounds = array<i64: 1, 512>}, {transform_indices = @transform_3, window_bounds = array<i64: 16, 512>}]} {
    %c0 = arith.constant 0 : index
    %c0_0 = arith.constant 0 : index
    %0 = vector.load %arg1[%c0, %c0_0] : memref<16x256xbf16, #tpu.memory_space<vmem>>, vector<16x256xbf16>
    %c0_1 = arith.constant 0 : index
    %c0_2 = arith.constant 0 : index
    %1 = vector.load %arg2[%c0_1, %c0_2] : memref<256x512xbf16, #tpu.memory_space<vmem>>, vector<256x512xbf16>
    %cst = arith.constant dense<0.000000e+00> : vector<16x512xf32>
    %2 = tpu.matmul %0, %1, %cst {dimension_numbers = #tpu.dot_dimension_numbers<[1], [0], [0], [1], [0, 0, 1, 1], [], []>} : vector<16x256xbf16>, vector<256x512xbf16>, vector<16x512xf32> -> vector<16x512xf32>
    %c0_3 = arith.constant 0 : index
    %c0_4 = arith.constant 0 : index
    %3 = vector.load %arg3[%c0_3, %c0_4] : memref<1x512xf32, #tpu.memory_space<vmem>>, vector<1x512xf32>
    %4 = vector.broadcast %3 : vector<1x512xf32> to vector<16x512xf32>
    %5 = arith.addf %2, %4 : vector<16x512xf32>
    %6 = arith.truncf %5 : vector<16x512xf32> to vector<16x512xbf16>
    %c0_5 = arith.constant 0 : index
    %c0_6 = arith.constant 0 : index
    %7 = vector.load %arg4[%c0_5, %c0_6] : memref<16x512xbf16, #tpu.memory_space<vmem>>, vector<16x512xbf16>
    tpu.vector_store %arg4[%c0_5, %c0_6], %6 {strides = array<i32>} : memref<16x512xbf16, #tpu.memory_space<vmem>>, vector<16x512xbf16>,
    return
  }
  func.func @transform_0(%arg0: i32) -> (i32, i32) {
    %c0_i32 = arith.constant 0 : i32
    %c0_i32_0 = arith.constant 0 : i32
    return %arg0, %c0_i32 : i32, i32
  }
  func.func @transform_1(%arg0: i32) -> (i32, i32) {
    %c0_i32 = arith.constant 0 : i32
    %c0_i32_0 = arith.constant 0 : i32
    %c0_i32_1 = arith.constant 0 : i32
    return %c0_i32, %c0_i32_0 : i32, i32
  }
  func.func @transform_2(%arg0: i32) -> (i32, i32) {
    %c0_i32 = arith.constant 0 : i32
    %c0_i32_0 = arith.constant 0 : i32
    %c0_i32_1 = arith.constant 0 : i32
    return %c0_i32, %c0_i32_0 : i32, i32
  }
  func.func @transform_3(%arg0: i32) -> (i32, i32) {
    %c0_i32 = arith.constant 0 : i32
    %c0_i32_0 = arith.constant 0 : i32
    return %arg0, %c0_i32 : i32, i32
  }
}

module attributes {stable_mosaic.version = 11 : i64} {
  func.func @_linear_kernel(%arg0: i32, %arg1: memref<8x256xbf16, #tpu.memory_space<vmem>>, %arg2: memref<256x512xbf16, #tpu.memory_space<vmem>>, %arg3: memref<1x512xf32, #tpu.memory_space<vmem>>, %arg4: memref<8x512xbf16, #tpu.memory_space<vmem>>) attributes {dimension_semantics = [#tpu.dimension_semantics<parallel>], iteration_bounds = array<i64: 2>, scalar_prefetch = 0 : i64, scratch_operands = 0 : i64, tpu.core_type = #tpu.core_type<tc>, window_params = [{transform_indices = @transform_0, window_bounds = array<i64: 8, 256>}, {pipeline_mode = #tpu.pipeline_mode<synchronous>, transform_indices = @transform_1, window_bounds = array<i64: 256, 512>}, {pipeline_mode = #tpu.pipeline_mode<synchronous>, transform_indices = @transform_2, window_bounds = array<i64: 1, 512>}, {transform_indices = @transform_3, window_bounds = array<i64: 8, 512>}]} {
    %c0 = arith.constant 0 : index
    %c0_0 = arith.constant 0 : index
    %0 = vector.load %arg1[%c0, %c0_0] : memref<8x256xbf16, #tpu.memory_space<vmem>>, vector<8x256xbf16>
    %c0_1 = arith.constant 0 : index
    %c0_2 = arith.constant 0 : index
    %1 = vector.load %arg2[%c0_1, %c0_2] : memref<256x512xbf16, #tpu.memory_space<vmem>>, vector<256x512xbf16>
    %cst = arith.constant dense<0.000000e+00> : vector<8x512xf32>
    %2 = tpu.matmul %0, %1, %cst {dimension_numbers = #tpu.dot_dimension_numbers<[1], [0], [0], [1], [0, 0, 1, 1], [], []>} : vector<8x256xbf16>, vector<256x512xbf16>, vector<8x512xf32> -> vector<8x512xf32>
    %c0_3 = arith.constant 0 : index
    %c0_4 = arith.constant 0 : index
    %3 = vector.load %arg3[%c0_3, %c0_4] : memref<1x512xf32, #tpu.memory_space<vmem>>, vector<1x512xf32>
    %4 = vector.broadcast %3 : vector<1x512xf32> to vector<8x512xf32>
    %5 = arith.addf %2, %4 : vector<8x512xf32>
    %6 = arith.truncf %5 : vector<8x512xf32> to vector<8x512xbf16>
    %c0_5 = arith.constant 0 : index
    %c0_6 = arith.constant 0 : index
    %7 = vector.load %arg4[%c0_5, %c0_6] : memref<8x512xbf16, #tpu.memory_space<vmem>>, vector<8x512xbf16>
    tpu.vector_store %arg4[%c0_5, %c0_6], %6 {strides = array<i32>} : memref<8x512xbf16, #tpu.memory_space<vmem>>, vector<8x512xbf16>,
    return
  }
  func.func @transform_0(%arg0: i32) -> (i32, i32) {
    %c0_i32 = arith.constant 0 : i32
    %c0_i32_0 = arith.constant 0 : i32
    return %arg0, %c0_i32 : i32, i32
  }
  func.func @transform_1(%arg0: i32) -> (i32, i32) {
    %c0_i32 = arith.constant 0 : i32
    %c0_i32_0 = arith.constant 0 : i32
    %c0_i32_1 = arith.constant 0 : i32
    return %c0_i32, %c0_i32_0 : i32, i32
  }
  func.func @transform_2(%arg0: i32) -> (i32, i32) {
    %c0_i32 = arith.constant 0 : i32
    %c0_i32_0 = arith.constant 0 : i32
    %c0_i32_1 = arith.constant 0 : i32
    return %c0_i32, %c0_i32_0 : i32, i32
  }
  func.func @transform_3(%arg0: i32) -> (i32, i32) {
    %c0_i32 = arith.constant 0 : i32
    %c0_i32_0 = arith.constant 0 : i32
    return %arg0, %c0_i32 : i32, i32
  }
}

module attributes {stable_mosaic.version = 11 : i64} {
  func.func @_flash_attn_kernel(%arg0: i32, %arg1: i32, %arg2: i32, %arg3: memref<1x8x256xbf16, #tpu.memory_space<vmem>>, %arg4: memref<1x8x256xbf16, #tpu.memory_space<vmem>>, %arg5: memref<1x8x256xbf16, #tpu.memory_space<vmem>>, %arg6: memref<1x1x8xf32, #tpu.memory_space<vmem>>, %arg7: memref<1x8x256xbf16, #tpu.memory_space<vmem>>, %arg8: memref<2x8x1xf32, #tpu.memory_space<vmem>>, %arg9: memref<2x8x1xf32, #tpu.memory_space<vmem>>, %arg10: memref<2x8x128xf32, #tpu.memory_space<vmem>>) attributes {dimension_semantics = [#tpu.dimension_semantics<parallel>, #tpu.dimension_semantics<parallel>, #tpu.dimension_semantics<arbitrary>], iteration_bounds = array<i64: 2, 1, 1>, scalar_prefetch = 0 : i64, scratch_operands = 3 : i64, tpu.core_type = #tpu.core_type<tc>, window_params = [{transform_indices = @transform_0, window_bounds = array<i64: 1, 8, 256>}, {transform_indices = @transform_1, window_bounds = array<i64: 1, 8, 256>}, {transform_indices = @transform_2, window_bounds = array<i64: 1, 8, 256>}, {transform_indices = @transform_3, window_bounds = array<i64: 1, 1, 8>}, {transform_indices = @transform_4, window_bounds = array<i64: 1, 8, 256>}]} {
    %c0_i32 = arith.constant 0 : i32
    %0 = arith.cmpi eq, %arg2, %c0_i32 : i32
    %1 = arith.extui %0 : i1 to i32
    %c0_i32_0 = arith.constant 0 : i32
    %2 = arith.cmpi ne, %1, %c0_i32_0 : i32
    scf.if %2 {
      %cst_61 = arith.constant 0xFF800000 : f32
      %106 = vector.broadcast %cst_61 : f32 to vector<2x8x1xf32>
      %c0_62 = arith.constant 0 : index
      %c0_63 = arith.constant 0 : index
      %c0_64 = arith.constant 0 : index
      %107 = vector.load %arg8[%c0_62, %c0_63, %c0_64] : memref<2x8x1xf32, #tpu.memory_space<vmem>>, vector<2x8x1xf32>
      tpu.vector_store %arg8[%c0_62, %c0_63, %c0_64], %106 {strides = array<i32>} : memref<2x8x1xf32, #tpu.memory_space<vmem>>, vector<2x8x1xf32>,
      %cst_65 = arith.constant 0.000000e+00 : f32
      %108 = vector.broadcast %cst_65 : f32 to vector<2x8x1xf32>
      %c0_66 = arith.constant 0 : index
      %c0_67 = arith.constant 0 : index
      %c0_68 = arith.constant 0 : index
      %109 = vector.load %arg9[%c0_66, %c0_67, %c0_68] : memref<2x8x1xf32, #tpu.memory_space<vmem>>, vector<2x8x1xf32>
      tpu.vector_store %arg9[%c0_66, %c0_67, %c0_68], %108 {strides = array<i32>} : memref<2x8x1xf32, #tpu.memory_space<vmem>>, vector<2x8x1xf32>,
      %cst_69 = arith.constant 0.000000e+00 : f32
      %110 = vector.broadcast %cst_69 : f32 to vector<2x8x128xf32>
      %c0_70 = arith.constant 0 : index
      %c0_71 = arith.constant 0 : index
      %c0_72 = arith.constant 0 : index
      %111 = vector.load %arg10[%c0_70, %c0_71, %c0_72] : memref<2x8x128xf32, #tpu.memory_space<vmem>>, vector<2x8x128xf32>
      tpu.vector_store %arg10[%c0_70, %c0_71, %c0_72], %110 {strides = array<i32>} : memref<2x8x128xf32, #tpu.memory_space<vmem>>, vector<2x8x128xf32>,
    } else {
    }
    %c0 = arith.constant 0 : index
    %c0_1 = arith.constant 0 : index
    %c0_2 = arith.constant 0 : index
    %3 = vector.load %arg3[%c0, %c0_1, %c0_2] : memref<1x8x256xbf16, #tpu.memory_space<vmem>>, vector<1x8x256xbf16>
    %4 = vector.shape_cast %3 : vector<1x8x256xbf16> to vector<8x256xbf16>
    %c0_3 = arith.constant 0 : index
    %c0_4 = arith.constant 0 : index
    %c0_5 = arith.constant 0 : index
    %5 = vector.load %arg4[%c0_3, %c0_4, %c0_5] : memref<1x8x256xbf16, #tpu.memory_space<vmem>>, vector<1x8x256xbf16>
    %6 = vector.shape_cast %5 : vector<1x8x256xbf16> to vector<8x256xbf16>
    %c0_6 = arith.constant 0 : index
    %c0_7 = arith.constant 0 : index
    %c0_8 = arith.constant 0 : index
    %7 = vector.load %arg5[%c0_6, %c0_7, %c0_8] : memref<1x8x256xbf16, #tpu.memory_space<vmem>>, vector<1x8x256xbf16>
    %8 = vector.shape_cast %7 : vector<1x8x256xbf16> to vector<8x256xbf16>
    %c0_9 = arith.constant 0 : index
    %c0_10 = arith.constant 0 : index
    %c0_11 = arith.constant 0 : index
    %9 = vector.load %arg6[%c0_9, %c0_10, %c0_11] : memref<1x1x8xf32, #tpu.memory_space<vmem>>, vector<1x1x8xf32>
    %10 = vector.shape_cast %9 : vector<1x1x8xf32> to vector<1x8xf32>
    %c8_i32 = arith.constant 8 : i32
    %11 = arith.muli %arg1, %c8_i32 : i32
    %12 = tpu.iota {dimensions = array<i32: 0>} : vector<8x8xi32>
    %13 = vector.broadcast %11 : i32 to vector<8x8xi32>
    %14 = arith.addi %13, %12 : vector<8x8xi32>
    %c8_i32_12 = arith.constant 8 : i32
    %15 = arith.muli %arg2, %c8_i32_12 : i32
    %16 = tpu.iota {dimensions = array<i32: 1>} : vector<8x8xi32>
    %17 = vector.broadcast %15 : i32 to vector<8x8xi32>
    %18 = arith.addi %17, %16 : vector<8x8xi32>
    %19 = arith.cmpi sgt, %18, %14 : vector<8x8xi32>
    %cst = arith.constant -1.000000e+09 : f32
    %cst_13 = arith.constant 0.000000e+00 : f32
    %20 = vector.broadcast %cst : f32 to vector<8x8xf32>
    %21 = vector.broadcast %cst_13 : f32 to vector<8x8xf32>
    %22 = arith.select %19, %20, %21 : vector<8x8xi1>, vector<8x8xf32>
    %23 = vector.broadcast %10 : vector<1x8xf32> to vector<8x8xf32>
    %24 = arith.addf %23, %22 : vector<8x8xf32>
    %25 = vector.extract_strided_slice %4 {offsets = [0, 0], sizes = [8, 128], strides = [1, 1]} : vector<8x256xbf16> to vector<8x128xbf16>
    %26 = vector.extract_strided_slice %6 {offsets = [0, 0], sizes = [8, 128], strides = [1, 1]} : vector<8x256xbf16> to vector<8x128xbf16>
    %27 = vector.extract_strided_slice %8 {offsets = [0, 0], sizes = [8, 128], strides = [1, 1]} : vector<8x256xbf16> to vector<8x128xbf16>
    %cst_14 = arith.constant dense<0.000000e+00> : vector<8x8xf32>
    %28 = tpu.matmul %25, %26, %cst_14 {dimension_numbers = #tpu.dot_dimension_numbers<[1], [1], [0], [0], [0, 0, 1, 0], [], []>} : vector<8x128xbf16>, vector<8x128xbf16>, vector<8x8xf32> -> vector<8x8xf32>
    %cst_15 = arith.constant 0.0883883461 : f32
    %29 = vector.broadcast %cst_15 : f32 to vector<8x8xf32>
    %30 = arith.mulf %28, %29 : vector<8x8xf32>
    %31 = arith.addf %30, %24 : vector<8x8xf32>
    %c0_16 = arith.constant 0 : index
    %c0_17 = arith.constant 0 : index
    %c0_18 = arith.constant 0 : index
    %32 = vector.load %arg8[%c0_16, %c0_17, %c0_18] : memref<2x8x1xf32, #tpu.memory_space<vmem>>, vector<1x8x1xf32>
    %33 = vector.shape_cast %32 : vector<1x8x1xf32> to vector<8x1xf32>
    %cst_19 = arith.constant dense<0xFF800000> : vector<8xf32>
    %34 = vector.multi_reduction <maximumf>, %31, %cst_19 [1] : vector<8x8xf32> to vector<8xf32>
    %35 = vector.shape_cast %34 : vector<8xf32> to vector<8x1xf32>
    %36 = arith.maximumf %33, %35 : vector<8x1xf32>
    %37 = arith.subf %33, %36 : vector<8x1xf32>
    %38 = math.exp %37 : vector<8x1xf32>
    %39 = vector.broadcast %36 : vector<8x1xf32> to vector<8x8xf32>
    %40 = arith.subf %31, %39 : vector<8x8xf32>
    %41 = math.exp %40 : vector<8x8xf32>
    %c0_20 = arith.constant 0 : index
    %c0_21 = arith.constant 0 : index
    %c0_22 = arith.constant 0 : index
    %42 = vector.load %arg9[%c0_20, %c0_21, %c0_22] : memref<2x8x1xf32, #tpu.memory_space<vmem>>, vector<1x8x1xf32>
    %43 = vector.shape_cast %42 : vector<1x8x1xf32> to vector<8x1xf32>
    %44 = arith.mulf %38, %43 : vector<8x1xf32>
    %cst_23 = arith.constant dense<0.000000e+00> : vector<8xf32>
    %45 = vector.multi_reduction <add>, %41, %cst_23 [1] : vector<8x8xf32> to vector<8xf32>
    %46 = vector.shape_cast %45 : vector<8xf32> to vector<8x1xf32>
    %47 = arith.addf %44, %46 : vector<8x1xf32>
    %c0_24 = arith.constant 0 : index
    %c0_25 = arith.constant 0 : index
    %c0_26 = arith.constant 0 : index
    %48 = vector.load %arg9[%c0_24, %c0_25, %c0_26] : memref<2x8x1xf32, #tpu.memory_space<vmem>>, vector<1x8x1xf32>
    %49 = vector.shape_cast %48 : vector<1x8x1xf32> to vector<8x1xf32>
    %50 = vector.shape_cast %47 : vector<8x1xf32> to vector<1x8x1xf32>
    tpu.vector_store %arg9[%c0_24, %c0_25, %c0_26], %50 {strides = array<i32>} : memref<2x8x1xf32, #tpu.memory_space<vmem>>, vector<1x8x1xf32>,
    %c0_27 = arith.constant 0 : index
    %c0_28 = arith.constant 0 : index
    %c0_29 = arith.constant 0 : index
    %51 = vector.load %arg10[%c0_27, %c0_28, %c0_29] : memref<2x8x128xf32, #tpu.memory_space<vmem>>, vector<1x8x128xf32>
    %52 = vector.shape_cast %51 : vector<1x8x128xf32> to vector<8x128xf32>
    %53 = vector.broadcast %38 : vector<8x1xf32> to vector<8x128xf32>
    %54 = arith.mulf %53, %52 : vector<8x128xf32>
    %55 = arith.truncf %41 : vector<8x8xf32> to vector<8x8xbf16>
    %cst_30 = arith.constant dense<0.000000e+00> : vector<8x128xf32>
    %56 = tpu.matmul %55, %27, %cst_30 {dimension_numbers = #tpu.dot_dimension_numbers<[1], [0], [0], [1], [0, 0, 1, 1], [], []>} : vector<8x8xbf16>, vector<8x128xbf16>, vector<8x128xf32> -> vector<8x128xf32>
    %57 = arith.addf %54, %56 : vector<8x128xf32>
    %c0_31 = arith.constant 0 : index
    %c0_32 = arith.constant 0 : index
    %c0_33 = arith.constant 0 : index
    %58 = vector.load %arg10[%c0_31, %c0_32, %c0_33] : memref<2x8x128xf32, #tpu.memory_space<vmem>>, vector<1x8x128xf32>
    %59 = vector.shape_cast %58 : vector<1x8x128xf32> to vector<8x128xf32>
    %60 = vector.shape_cast %57 : vector<8x128xf32> to vector<1x8x128xf32>
    tpu.vector_store %arg10[%c0_31, %c0_32, %c0_33], %60 {strides = array<i32>} : memref<2x8x128xf32, #tpu.memory_space<vmem>>, vector<1x8x128xf32>,
    %c0_34 = arith.constant 0 : index
    %c0_35 = arith.constant 0 : index
    %c0_36 = arith.constant 0 : index
    %61 = vector.load %arg8[%c0_34, %c0_35, %c0_36] : memref<2x8x1xf32, #tpu.memory_space<vmem>>, vector<1x8x1xf32>
    %62 = vector.shape_cast %61 : vector<1x8x1xf32> to vector<8x1xf32>
    %63 = vector.shape_cast %36 : vector<8x1xf32> to vector<1x8x1xf32>
    tpu.vector_store %arg8[%c0_34, %c0_35, %c0_36], %63 {strides = array<i32>} : memref<2x8x1xf32, #tpu.memory_space<vmem>>, vector<1x8x1xf32>,
    %64 = vector.extract_strided_slice %4 {offsets = [0, 128], sizes = [8, 128], strides = [1, 1]} : vector<8x256xbf16> to vector<8x128xbf16>
    %65 = vector.extract_strided_slice %6 {offsets = [0, 128], sizes = [8, 128], strides = [1, 1]} : vector<8x256xbf16> to vector<8x128xbf16>
    %66 = vector.extract_strided_slice %8 {offsets = [0, 128], sizes = [8, 128], strides = [1, 1]} : vector<8x256xbf16> to vector<8x128xbf16>
    %cst_37 = arith.constant dense<0.000000e+00> : vector<8x8xf32>
    %67 = tpu.matmul %64, %65, %cst_37 {dimension_numbers = #tpu.dot_dimension_numbers<[1], [1], [0], [0], [0, 0, 1, 0], [], []>} : vector<8x128xbf16>, vector<8x128xbf16>, vector<8x8xf32> -> vector<8x8xf32>
    %cst_38 = arith.constant 0.0883883461 : f32
    %68 = vector.broadcast %cst_38 : f32 to vector<8x8xf32>
    %69 = arith.mulf %67, %68 : vector<8x8xf32>
    %70 = arith.addf %69, %24 : vector<8x8xf32>
    %c1 = arith.constant 1 : index
    %c0_39 = arith.constant 0 : index
    %c0_40 = arith.constant 0 : index
    %71 = vector.load %arg8[%c1, %c0_39, %c0_40] : memref<2x8x1xf32, #tpu.memory_space<vmem>>, vector<1x8x1xf32>
    %72 = vector.shape_cast %71 : vector<1x8x1xf32> to vector<8x1xf32>
    %cst_41 = arith.constant dense<0xFF800000> : vector<8xf32>
    %73 = vector.multi_reduction <maximumf>, %70, %cst_41 [1] : vector<8x8xf32> to vector<8xf32>
    %74 = vector.shape_cast %73 : vector<8xf32> to vector<8x1xf32>
    %75 = arith.maximumf %72, %74 : vector<8x1xf32>
    %76 = arith.subf %72, %75 : vector<8x1xf32>
    %77 = math.exp %76 : vector<8x1xf32>
    %78 = vector.broadcast %75 : vector<8x1xf32> to vector<8x8xf32>
    %79 = arith.subf %70, %78 : vector<8x8xf32>
    %80 = math.exp %79 : vector<8x8xf32>
    %c1_42 = arith.constant 1 : index
    %c0_43 = arith.constant 0 : index
    %c0_44 = arith.constant 0 : index
    %81 = vector.load %arg9[%c1_42, %c0_43, %c0_44] : memref<2x8x1xf32, #tpu.memory_space<vmem>>, vector<1x8x1xf32>
    %82 = vector.shape_cast %81 : vector<1x8x1xf32> to vector<8x1xf32>
    %83 = arith.mulf %77, %82 : vector<8x1xf32>
    %cst_45 = arith.constant dense<0.000000e+00> : vector<8xf32>
    %84 = vector.multi_reduction <add>, %80, %cst_45 [1] : vector<8x8xf32> to vector<8xf32>
    %85 = vector.shape_cast %84 : vector<8xf32> to vector<8x1xf32>
    %86 = arith.addf %83, %85 : vector<8x1xf32>
    %c1_46 = arith.constant 1 : index
    %c0_47 = arith.constant 0 : index
    %c0_48 = arith.constant 0 : index
    %87 = vector.load %arg9[%c1_46, %c0_47, %c0_48] : memref<2x8x1xf32, #tpu.memory_space<vmem>>, vector<1x8x1xf32>
    %88 = vector.shape_cast %87 : vector<1x8x1xf32> to vector<8x1xf32>
    %89 = vector.shape_cast %86 : vector<8x1xf32> to vector<1x8x1xf32>
    tpu.vector_store %arg9[%c1_46, %c0_47, %c0_48], %89 {strides = array<i32>} : memref<2x8x1xf32, #tpu.memory_space<vmem>>, vector<1x8x1xf32>,
    %c1_49 = arith.constant 1 : index
    %c0_50 = arith.constant 0 : index
    %c0_51 = arith.constant 0 : index
    %90 = vector.load %arg10[%c1_49, %c0_50, %c0_51] : memref<2x8x128xf32, #tpu.memory_space<vmem>>, vector<1x8x128xf32>
    %91 = vector.shape_cast %90 : vector<1x8x128xf32> to vector<8x128xf32>
    %92 = vector.broadcast %77 : vector<8x1xf32> to vector<8x128xf32>
    %93 = arith.mulf %92, %91 : vector<8x128xf32>
    %94 = arith.truncf %80 : vector<8x8xf32> to vector<8x8xbf16>
    %cst_52 = arith.constant dense<0.000000e+00> : vector<8x128xf32>
    %95 = tpu.matmul %94, %66, %cst_52 {dimension_numbers = #tpu.dot_dimension_numbers<[1], [0], [0], [1], [0, 0, 1, 1], [], []>} : vector<8x8xbf16>, vector<8x128xbf16>, vector<8x128xf32> -> vector<8x128xf32>
    %96 = arith.addf %93, %95 : vector<8x128xf32>
    %c1_53 = arith.constant 1 : index
    %c0_54 = arith.constant 0 : index
    %c0_55 = arith.constant 0 : index
    %97 = vector.load %arg10[%c1_53, %c0_54, %c0_55] : memref<2x8x128xf32, #tpu.memory_space<vmem>>, vector<1x8x128xf32>
    %98 = vector.shape_cast %97 : vector<1x8x128xf32> to vector<8x128xf32>
    %99 = vector.shape_cast %96 : vector<8x128xf32> to vector<1x8x128xf32>
    tpu.vector_store %arg10[%c1_53, %c0_54, %c0_55], %99 {strides = array<i32>} : memref<2x8x128xf32, #tpu.memory_space<vmem>>, vector<1x8x128xf32>,
    %c1_56 = arith.constant 1 : index
    %c0_57 = arith.constant 0 : index
    %c0_58 = arith.constant 0 : index
    %100 = vector.load %arg8[%c1_56, %c0_57, %c0_58] : memref<2x8x1xf32, #tpu.memory_space<vmem>>, vector<1x8x1xf32>
    %101 = vector.shape_cast %100 : vector<1x8x1xf32> to vector<8x1xf32>
    %102 = vector.shape_cast %75 : vector<8x1xf32> to vector<1x8x1xf32>
    tpu.vector_store %arg8[%c1_56, %c0_57, %c0_58], %102 {strides = array<i32>} : memref<2x8x1xf32, #tpu.memory_space<vmem>>, vector<1x8x1xf32>,
    %c0_i32_59 = arith.constant 0 : i32
    %103 = arith.cmpi eq, %arg2, %c0_i32_59 : i32
    %104 = arith.extui %103 : i1 to i32
    %c0_i32_60 = arith.constant 0 : i32
    %105 = arith.cmpi ne, %104, %c0_i32_60 : i32
    scf.if %105 {
      %c0_61 = arith.constant 0 : index
      %c0_62 = arith.constant 0 : index
      %c0_63 = arith.constant 0 : index
      %106 = vector.load %arg10[%c0_61, %c0_62, %c0_63] : memref<2x8x128xf32, #tpu.memory_space<vmem>>, vector<1x8x128xf32>
      %107 = vector.shape_cast %106 : vector<1x8x128xf32> to vector<8x128xf32>
      %c0_64 = arith.constant 0 : index
      %c0_65 = arith.constant 0 : index
      %c0_66 = arith.constant 0 : index
      %108 = vector.load %arg9[%c0_64, %c0_65, %c0_66] : memref<2x8x1xf32, #tpu.memory_space<vmem>>, vector<1x8x1xf32>
      %109 = vector.shape_cast %108 : vector<1x8x1xf32> to vector<8x1xf32>
      %110 = tpu.reciprocal %109 {approx = true} : vector<8x1xf32> -> vector<8x1xf32>
      %111 = vector.broadcast %110 : vector<8x1xf32> to vector<8x128xf32>
      %112 = arith.mulf %107, %111 : vector<8x128xf32>
      %c1_67 = arith.constant 1 : index
      %c0_68 = arith.constant 0 : index
      %c0_69 = arith.constant 0 : index
      %113 = vector.load %arg10[%c1_67, %c0_68, %c0_69] : memref<2x8x128xf32, #tpu.memory_space<vmem>>, vector<1x8x128xf32>
      %114 = vector.shape_cast %113 : vector<1x8x128xf32> to vector<8x128xf32>
      %c1_70 = arith.constant 1 : index
      %c0_71 = arith.constant 0 : index
      %c0_72 = arith.constant 0 : index
      %115 = vector.load %arg9[%c1_70, %c0_71, %c0_72] : memref<2x8x1xf32, #tpu.memory_space<vmem>>, vector<1x8x1xf32>
      %116 = vector.shape_cast %115 : vector<1x8x1xf32> to vector<8x1xf32>
      %117 = tpu.reciprocal %116 {approx = true} : vector<8x1xf32> -> vector<8x1xf32>
      %118 = vector.broadcast %117 : vector<8x1xf32> to vector<8x128xf32>
      %119 = arith.mulf %114, %118 : vector<8x128xf32>
      %120 = tpu.concatenate %112, %119 in 1 : vector<8x128xf32>, vector<8x128xf32> -> vector<8x256xf32>
      %121 = arith.truncf %120 : vector<8x256xf32> to vector<8x256xbf16>
      %c0_73 = arith.constant 0 : index
      %c0_74 = arith.constant 0 : index
      %c0_75 = arith.constant 0 : index
      %122 = vector.load %arg7[%c0_73, %c0_74, %c0_75] : memref<1x8x256xbf16, #tpu.memory_space<vmem>>, vector<1x8x256xbf16>
      %123 = vector.shape_cast %122 : vector<1x8x256xbf16> to vector<8x256xbf16>
      %124 = vector.shape_cast %121 : vector<8x256xbf16> to vector<1x8x256xbf16>
      tpu.vector_store %arg7[%c0_73, %c0_74, %c0_75], %124 {strides = array<i32>} : memref<1x8x256xbf16, #tpu.memory_space<vmem>>, vector<1x8x256xbf16>,
    } else {
    }
    return
  }
  func.func @transform_0(%arg0: i32, %arg1: i32, %arg2: i32) -> (i32, i32, i32) {
    %c0_i32 = arith.constant 0 : i32
    %c0_i32_0 = arith.constant 0 : i32
    return %arg0, %arg1, %c0_i32 : i32, i32, i32
  }
  func.func @transform_1(%arg0: i32, %arg1: i32, %arg2: i32) -> (i32, i32, i32) {
    %c1_i32 = arith.constant 1 : i32
    %c0_i32 = arith.constant 0 : i32
    return %arg0, %arg2, %c1_i32 : i32, i32, i32
  }
  func.func @transform_2(%arg0: i32, %arg1: i32, %arg2: i32) -> (i32, i32, i32) {
    %c2_i32 = arith.constant 2 : i32
    %c0_i32 = arith.constant 0 : i32
    return %arg0, %arg2, %c2_i32 : i32, i32, i32
  }
  func.func @transform_3(%arg0: i32, %arg1: i32, %arg2: i32) -> (i32, i32, i32) {
    %c0_i32 = arith.constant 0 : i32
    %c0_i32_0 = arith.constant 0 : i32
    return %arg0, %c0_i32, %arg2 : i32, i32, i32
  }
  func.func @transform_4(%arg0: i32, %arg1: i32, %arg2: i32) -> (i32, i32, i32) {
    %c0_i32 = arith.constant 0 : i32
    %c0_i32_0 = arith.constant 0 : i32
    return %arg0, %arg1, %c0_i32 : i32, i32, i32
  }
}

module attributes {stable_mosaic.version = 11 : i64} {
  func.func @_linear_kernel(%arg0: i32, %arg1: memref<8x256xbf16, #tpu.memory_space<vmem>>, %arg2: memref<256x256xbf16, #tpu.memory_space<vmem>>, %arg3: memref<1x256xf32, #tpu.memory_space<vmem>>, %arg4: memref<8x256xbf16, #tpu.memory_space<vmem>>) attributes {dimension_semantics = [#tpu.dimension_semantics<parallel>], iteration_bounds = array<i64: 2>, scalar_prefetch = 0 : i64, scratch_operands = 0 : i64, tpu.core_type = #tpu.core_type<tc>, window_params = [{transform_indices = @transform_0, window_bounds = array<i64: 8, 256>}, {pipeline_mode = #tpu.pipeline_mode<synchronous>, transform_indices = @transform_1, window_bounds = array<i64: 256, 256>}, {pipeline_mode = #tpu.pipeline_mode<synchronous>, transform_indices = @transform_2, window_bounds = array<i64: 1, 256>}, {transform_indices = @transform_3, window_bounds = array<i64: 8, 256>}]} {
    %c0 = arith.constant 0 : index
    %c0_0 = arith.constant 0 : index
    %0 = vector.load %arg1[%c0, %c0_0] : memref<8x256xbf16, #tpu.memory_space<vmem>>, vector<8x256xbf16>
    %c0_1 = arith.constant 0 : index
    %c0_2 = arith.constant 0 : index
    %1 = vector.load %arg2[%c0_1, %c0_2] : memref<256x256xbf16, #tpu.memory_space<vmem>>, vector<256x256xbf16>
    %cst = arith.constant dense<0.000000e+00> : vector<8x256xf32>
    %2 = tpu.matmul %0, %1, %cst {dimension_numbers = #tpu.dot_dimension_numbers<[1], [0], [0], [1], [0, 0, 1, 1], [], []>} : vector<8x256xbf16>, vector<256x256xbf16>, vector<8x256xf32> -> vector<8x256xf32>
    %c0_3 = arith.constant 0 : index
    %c0_4 = arith.constant 0 : index
    %3 = vector.load %arg3[%c0_3, %c0_4] : memref<1x256xf32, #tpu.memory_space<vmem>>, vector<1x256xf32>
    %4 = vector.broadcast %3 : vector<1x256xf32> to vector<8x256xf32>
    %5 = arith.addf %2, %4 : vector<8x256xf32>
    %6 = arith.truncf %5 : vector<8x256xf32> to vector<8x256xbf16>
    %c0_5 = arith.constant 0 : index
    %c0_6 = arith.constant 0 : index
    %7 = vector.load %arg4[%c0_5, %c0_6] : memref<8x256xbf16, #tpu.memory_space<vmem>>, vector<8x256xbf16>
    tpu.vector_store %arg4[%c0_5, %c0_6], %6 {strides = array<i32>} : memref<8x256xbf16, #tpu.memory_space<vmem>>, vector<8x256xbf16>,
    return
  }
  func.func @transform_0(%arg0: i32) -> (i32, i32) {
    %c0_i32 = arith.constant 0 : i32
    %c0_i32_0 = arith.constant 0 : i32
    return %arg0, %c0_i32 : i32, i32
  }
  func.func @transform_1(%arg0: i32) -> (i32, i32) {
    %c0_i32 = arith.constant 0 : i32
    %c0_i32_0 = arith.constant 0 : i32
    %c0_i32_1 = arith.constant 0 : i32
    return %c0_i32, %c0_i32_0 : i32, i32
  }
  func.func @transform_2(%arg0: i32) -> (i32, i32) {
    %c0_i32 = arith.constant 0 : i32
    %c0_i32_0 = arith.constant 0 : i32
    %c0_i32_1 = arith.constant 0 : i32
    return %c0_i32, %c0_i32_0 : i32, i32
  }
  func.func @transform_3(%arg0: i32) -> (i32, i32) {
    %c0_i32 = arith.constant 0 : i32
    %c0_i32_0 = arith.constant 0 : i32
    return %arg0, %c0_i32 : i32, i32
  }
}

module attributes {stable_mosaic.version = 11 : i64} {
  func.func @_flash_attn_kernel(%arg0: i32, %arg1: i32, %arg2: i32, %arg3: memref<1x8x256xbf16, #tpu.memory_space<vmem>>, %arg4: memref<1x16x256xbf16, #tpu.memory_space<vmem>>, %arg5: memref<1x16x256xbf16, #tpu.memory_space<vmem>>, %arg6: memref<1x1x16xf32, #tpu.memory_space<vmem>>, %arg7: memref<1x8x256xbf16, #tpu.memory_space<vmem>>, %arg8: memref<2x8x1xf32, #tpu.memory_space<vmem>>, %arg9: memref<2x8x1xf32, #tpu.memory_space<vmem>>, %arg10: memref<2x8x128xf32, #tpu.memory_space<vmem>>) attributes {dimension_semantics = [#tpu.dimension_semantics<parallel>, #tpu.dimension_semantics<parallel>, #tpu.dimension_semantics<arbitrary>], iteration_bounds = array<i64: 2, 1, 1>, scalar_prefetch = 0 : i64, scratch_operands = 3 : i64, tpu.core_type = #tpu.core_type<tc>, window_params = [{transform_indices = @transform_0, window_bounds = array<i64: 1, 8, 256>}, {transform_indices = @transform_1, window_bounds = array<i64: 1, 16, 256>}, {transform_indices = @transform_2, window_bounds = array<i64: 1, 16, 256>}, {transform_indices = @transform_3, window_bounds = array<i64: 1, 1, 16>}, {transform_indices = @transform_4, window_bounds = array<i64: 1, 8, 256>}]} {
    %c0_i32 = arith.constant 0 : i32
    %0 = arith.cmpi eq, %arg2, %c0_i32 : i32
    %1 = arith.extui %0 : i1 to i32
    %c0_i32_0 = arith.constant 0 : i32
    %2 = arith.cmpi ne, %1, %c0_i32_0 : i32
    scf.if %2 {
      %cst_58 = arith.constant 0xFF800000 : f32
      %94 = vector.broadcast %cst_58 : f32 to vector<2x8x1xf32>
      %c0_59 = arith.constant 0 : index
      %c0_60 = arith.constant 0 : index
      %c0_61 = arith.constant 0 : index
      %95 = vector.load %arg8[%c0_59, %c0_60, %c0_61] : memref<2x8x1xf32, #tpu.memory_space<vmem>>, vector<2x8x1xf32>
      tpu.vector_store %arg8[%c0_59, %c0_60, %c0_61], %94 {strides = array<i32>} : memref<2x8x1xf32, #tpu.memory_space<vmem>>, vector<2x8x1xf32>,
      %cst_62 = arith.constant 0.000000e+00 : f32
      %96 = vector.broadcast %cst_62 : f32 to vector<2x8x1xf32>
      %c0_63 = arith.constant 0 : index
      %c0_64 = arith.constant 0 : index
      %c0_65 = arith.constant 0 : index
      %97 = vector.load %arg9[%c0_63, %c0_64, %c0_65] : memref<2x8x1xf32, #tpu.memory_space<vmem>>, vector<2x8x1xf32>
      tpu.vector_store %arg9[%c0_63, %c0_64, %c0_65], %96 {strides = array<i32>} : memref<2x8x1xf32, #tpu.memory_space<vmem>>, vector<2x8x1xf32>,
      %cst_66 = arith.constant 0.000000e+00 : f32
      %98 = vector.broadcast %cst_66 : f32 to vector<2x8x128xf32>
      %c0_67 = arith.constant 0 : index
      %c0_68 = arith.constant 0 : index
      %c0_69 = arith.constant 0 : index
      %99 = vector.load %arg10[%c0_67, %c0_68, %c0_69] : memref<2x8x128xf32, #tpu.memory_space<vmem>>, vector<2x8x128xf32>
      tpu.vector_store %arg10[%c0_67, %c0_68, %c0_69], %98 {strides = array<i32>} : memref<2x8x128xf32, #tpu.memory_space<vmem>>, vector<2x8x128xf32>,
    } else {
    }
    %c0 = arith.constant 0 : index
    %c0_1 = arith.constant 0 : index
    %c0_2 = arith.constant 0 : index
    %3 = vector.load %arg3[%c0, %c0_1, %c0_2] : memref<1x8x256xbf16, #tpu.memory_space<vmem>>, vector<1x8x256xbf16>
    %4 = vector.shape_cast %3 : vector<1x8x256xbf16> to vector<8x256xbf16>
    %c0_3 = arith.constant 0 : index
    %c0_4 = arith.constant 0 : index
    %c0_5 = arith.constant 0 : index
    %5 = vector.load %arg4[%c0_3, %c0_4, %c0_5] : memref<1x16x256xbf16, #tpu.memory_space<vmem>>, vector<1x16x256xbf16>
    %6 = vector.shape_cast %5 : vector<1x16x256xbf16> to vector<16x256xbf16>
    %c0_6 = arith.constant 0 : index
    %c0_7 = arith.constant 0 : index
    %c0_8 = arith.constant 0 : index
    %7 = vector.load %arg5[%c0_6, %c0_7, %c0_8] : memref<1x16x256xbf16, #tpu.memory_space<vmem>>, vector<1x16x256xbf16>
    %8 = vector.shape_cast %7 : vector<1x16x256xbf16> to vector<16x256xbf16>
    %c0_9 = arith.constant 0 : index
    %c0_10 = arith.constant 0 : index
    %c0_11 = arith.constant 0 : index
    %9 = vector.load %arg6[%c0_9, %c0_10, %c0_11] : memref<1x1x16xf32, #tpu.memory_space<vmem>>, vector<1x1x16xf32>
    %10 = vector.shape_cast %9 : vector<1x1x16xf32> to vector<1x16xf32>
    %11 = vector.extract_strided_slice %4 {offsets = [0, 0], sizes = [8, 128], strides = [1, 1]} : vector<8x256xbf16> to vector<8x128xbf16>
    %12 = vector.extract_strided_slice %6 {offsets = [0, 0], sizes = [16, 128], strides = [1, 1]} : vector<16x256xbf16> to vector<16x128xbf16>
    %13 = vector.extract_strided_slice %8 {offsets = [0, 0], sizes = [16, 128], strides = [1, 1]} : vector<16x256xbf16> to vector<16x128xbf16>
    %cst = arith.constant dense<0.000000e+00> : vector<8x16xf32>
    %14 = tpu.matmul %11, %12, %cst {dimension_numbers = #tpu.dot_dimension_numbers<[1], [1], [0], [0], [0, 0, 1, 0], [], []>} : vector<8x128xbf16>, vector<16x128xbf16>, vector<8x16xf32> -> vector<8x16xf32>
    %cst_12 = arith.constant 0.0883883461 : f32
    %15 = vector.broadcast %cst_12 : f32 to vector<8x16xf32>
    %16 = arith.mulf %14, %15 : vector<8x16xf32>
    %17 = vector.broadcast %10 : vector<1x16xf32> to vector<8x16xf32>
    %18 = arith.addf %16, %17 : vector<8x16xf32>
    %c0_13 = arith.constant 0 : index
    %c0_14 = arith.constant 0 : index
    %c0_15 = arith.constant 0 : index
    %19 = vector.load %arg8[%c0_13, %c0_14, %c0_15] : memref<2x8x1xf32, #tpu.memory_space<vmem>>, vector<1x8x1xf32>
    %20 = vector.shape_cast %19 : vector<1x8x1xf32> to vector<8x1xf32>
    %cst_16 = arith.constant dense<0xFF800000> : vector<8xf32>
    %21 = vector.multi_reduction <maximumf>, %18, %cst_16 [1] : vector<8x16xf32> to vector<8xf32>
    %22 = vector.shape_cast %21 : vector<8xf32> to vector<8x1xf32>
    %23 = arith.maximumf %20, %22 : vector<8x1xf32>
    %24 = arith.subf %20, %23 : vector<8x1xf32>
    %25 = math.exp %24 : vector<8x1xf32>
    %26 = vector.broadcast %23 : vector<8x1xf32> to vector<8x16xf32>
    %27 = arith.subf %18, %26 : vector<8x16xf32>
    %28 = math.exp %27 : vector<8x16xf32>
    %c0_17 = arith.constant 0 : index
    %c0_18 = arith.constant 0 : index
    %c0_19 = arith.constant 0 : index
    %29 = vector.load %arg9[%c0_17, %c0_18, %c0_19] : memref<2x8x1xf32, #tpu.memory_space<vmem>>, vector<1x8x1xf32>
    %30 = vector.shape_cast %29 : vector<1x8x1xf32> to vector<8x1xf32>
    %31 = arith.mulf %25, %30 : vector<8x1xf32>
    %cst_20 = arith.constant dense<0.000000e+00> : vector<8xf32>
    %32 = vector.multi_reduction <add>, %28, %cst_20 [1] : vector<8x16xf32> to vector<8xf32>
    %33 = vector.shape_cast %32 : vector<8xf32> to vector<8x1xf32>
    %34 = arith.addf %31, %33 : vector<8x1xf32>
    %c0_21 = arith.constant 0 : index
    %c0_22 = arith.constant 0 : index
    %c0_23 = arith.constant 0 : index
    %35 = vector.load %arg9[%c0_21, %c0_22, %c0_23] : memref<2x8x1xf32, #tpu.memory_space<vmem>>, vector<1x8x1xf32>
    %36 = vector.shape_cast %35 : vector<1x8x1xf32> to vector<8x1xf32>
    %37 = vector.shape_cast %34 : vector<8x1xf32> to vector<1x8x1xf32>
    tpu.vector_store %arg9[%c0_21, %c0_22, %c0_23], %37 {strides = array<i32>} : memref<2x8x1xf32, #tpu.memory_space<vmem>>, vector<1x8x1xf32>,
    %c0_24 = arith.constant 0 : index
    %c0_25 = arith.constant 0 : index
    %c0_26 = arith.constant 0 : index
    %38 = vector.load %arg10[%c0_24, %c0_25, %c0_26] : memref<2x8x128xf32, #tpu.memory_space<vmem>>, vector<1x8x128xf32>
    %39 = vector.shape_cast %38 : vector<1x8x128xf32> to vector<8x128xf32>
    %40 = vector.broadcast %25 : vector<8x1xf32> to vector<8x128xf32>
    %41 = arith.mulf %40, %39 : vector<8x128xf32>
    %42 = arith.truncf %28 : vector<8x16xf32> to vector<8x16xbf16>
    %cst_27 = arith.constant dense<0.000000e+00> : vector<8x128xf32>
    %43 = tpu.matmul %42, %13, %cst_27 {dimension_numbers = #tpu.dot_dimension_numbers<[1], [0], [0], [1], [0, 0, 1, 1], [], []>} : vector<8x16xbf16>, vector<16x128xbf16>, vector<8x128xf32> -> vector<8x128xf32>
    %44 = arith.addf %41, %43 : vector<8x128xf32>
    %c0_28 = arith.constant 0 : index
    %c0_29 = arith.constant 0 : index
    %c0_30 = arith.constant 0 : index
    %45 = vector.load %arg10[%c0_28, %c0_29, %c0_30] : memref<2x8x128xf32, #tpu.memory_space<vmem>>, vector<1x8x128xf32>
    %46 = vector.shape_cast %45 : vector<1x8x128xf32> to vector<8x128xf32>
    %47 = vector.shape_cast %44 : vector<8x128xf32> to vector<1x8x128xf32>
    tpu.vector_store %arg10[%c0_28, %c0_29, %c0_30], %47 {strides = array<i32>} : memref<2x8x128xf32, #tpu.memory_space<vmem>>, vector<1x8x128xf32>,
    %c0_31 = arith.constant 0 : index
    %c0_32 = arith.constant 0 : index
    %c0_33 = arith.constant 0 : index
    %48 = vector.load %arg8[%c0_31, %c0_32, %c0_33] : memref<2x8x1xf32, #tpu.memory_space<vmem>>, vector<1x8x1xf32>
    %49 = vector.shape_cast %48 : vector<1x8x1xf32> to vector<8x1xf32>
    %50 = vector.shape_cast %23 : vector<8x1xf32> to vector<1x8x1xf32>
    tpu.vector_store %arg8[%c0_31, %c0_32, %c0_33], %50 {strides = array<i32>} : memref<2x8x1xf32, #tpu.memory_space<vmem>>, vector<1x8x1xf32>,
    %51 = vector.extract_strided_slice %4 {offsets = [0, 128], sizes = [8, 128], strides = [1, 1]} : vector<8x256xbf16> to vector<8x128xbf16>
    %52 = vector.extract_strided_slice %6 {offsets = [0, 128], sizes = [16, 128], strides = [1, 1]} : vector<16x256xbf16> to vector<16x128xbf16>
    %53 = vector.extract_strided_slice %8 {offsets = [0, 128], sizes = [16, 128], strides = [1, 1]} : vector<16x256xbf16> to vector<16x128xbf16>
    %cst_34 = arith.constant dense<0.000000e+00> : vector<8x16xf32>
    %54 = tpu.matmul %51, %52, %cst_34 {dimension_numbers = #tpu.dot_dimension_numbers<[1], [1], [0], [0], [0, 0, 1, 0], [], []>} : vector<8x128xbf16>, vector<16x128xbf16>, vector<8x16xf32> -> vector<8x16xf32>
    %cst_35 = arith.constant 0.0883883461 : f32
    %55 = vector.broadcast %cst_35 : f32 to vector<8x16xf32>
    %56 = arith.mulf %54, %55 : vector<8x16xf32>
    %57 = vector.broadcast %10 : vector<1x16xf32> to vector<8x16xf32>
    %58 = arith.addf %56, %57 : vector<8x16xf32>
    %c1 = arith.constant 1 : index
    %c0_36 = arith.constant 0 : index
    %c0_37 = arith.constant 0 : index
    %59 = vector.load %arg8[%c1, %c0_36, %c0_37] : memref<2x8x1xf32, #tpu.memory_space<vmem>>, vector<1x8x1xf32>
    %60 = vector.shape_cast %59 : vector<1x8x1xf32> to vector<8x1xf32>
    %cst_38 = arith.constant dense<0xFF800000> : vector<8xf32>
    %61 = vector.multi_reduction <maximumf>, %58, %cst_38 [1] : vector<8x16xf32> to vector<8xf32>
    %62 = vector.shape_cast %61 : vector<8xf32> to vector<8x1xf32>
    %63 = arith.maximumf %60, %62 : vector<8x1xf32>
    %64 = arith.subf %60, %63 : vector<8x1xf32>
    %65 = math.exp %64 : vector<8x1xf32>
    %66 = vector.broadcast %63 : vector<8x1xf32> to vector<8x16xf32>
    %67 = arith.subf %58, %66 : vector<8x16xf32>
    %68 = math.exp %67 : vector<8x16xf32>
    %c1_39 = arith.constant 1 : index
    %c0_40 = arith.constant 0 : index
    %c0_41 = arith.constant 0 : index
    %69 = vector.load %arg9[%c1_39, %c0_40, %c0_41] : memref<2x8x1xf32, #tpu.memory_space<vmem>>, vector<1x8x1xf32>
    %70 = vector.shape_cast %69 : vector<1x8x1xf32> to vector<8x1xf32>
    %71 = arith.mulf %65, %70 : vector<8x1xf32>
    %cst_42 = arith.constant dense<0.000000e+00> : vector<8xf32>
    %72 = vector.multi_reduction <add>, %68, %cst_42 [1] : vector<8x16xf32> to vector<8xf32>
    %73 = vector.shape_cast %72 : vector<8xf32> to vector<8x1xf32>
    %74 = arith.addf %71, %73 : vector<8x1xf32>
    %c1_43 = arith.constant 1 : index
    %c0_44 = arith.constant 0 : index
    %c0_45 = arith.constant 0 : index
    %75 = vector.load %arg9[%c1_43, %c0_44, %c0_45] : memref<2x8x1xf32, #tpu.memory_space<vmem>>, vector<1x8x1xf32>
    %76 = vector.shape_cast %75 : vector<1x8x1xf32> to vector<8x1xf32>
    %77 = vector.shape_cast %74 : vector<8x1xf32> to vector<1x8x1xf32>
    tpu.vector_store %arg9[%c1_43, %c0_44, %c0_45], %77 {strides = array<i32>} : memref<2x8x1xf32, #tpu.memory_space<vmem>>, vector<1x8x1xf32>,
    %c1_46 = arith.constant 1 : index
    %c0_47 = arith.constant 0 : index
    %c0_48 = arith.constant 0 : index
    %78 = vector.load %arg10[%c1_46, %c0_47, %c0_48] : memref<2x8x128xf32, #tpu.memory_space<vmem>>, vector<1x8x128xf32>
    %79 = vector.shape_cast %78 : vector<1x8x128xf32> to vector<8x128xf32>
    %80 = vector.broadcast %65 : vector<8x1xf32> to vector<8x128xf32>
    %81 = arith.mulf %80, %79 : vector<8x128xf32>
    %82 = arith.truncf %68 : vector<8x16xf32> to vector<8x16xbf16>
    %cst_49 = arith.constant dense<0.000000e+00> : vector<8x128xf32>
    %83 = tpu.matmul %82, %53, %cst_49 {dimension_numbers = #tpu.dot_dimension_numbers<[1], [0], [0], [1], [0, 0, 1, 1], [], []>} : vector<8x16xbf16>, vector<16x128xbf16>, vector<8x128xf32> -> vector<8x128xf32>
    %84 = arith.addf %81, %83 : vector<8x128xf32>
    %c1_50 = arith.constant 1 : index
    %c0_51 = arith.constant 0 : index
    %c0_52 = arith.constant 0 : index
    %85 = vector.load %arg10[%c1_50, %c0_51, %c0_52] : memref<2x8x128xf32, #tpu.memory_space<vmem>>, vector<1x8x128xf32>
    %86 = vector.shape_cast %85 : vector<1x8x128xf32> to vector<8x128xf32>
    %87 = vector.shape_cast %84 : vector<8x128xf32> to vector<1x8x128xf32>
    tpu.vector_store %arg10[%c1_50, %c0_51, %c0_52], %87 {strides = array<i32>} : memref<2x8x128xf32, #tpu.memory_space<vmem>>, vector<1x8x128xf32>,
    %c1_53 = arith.constant 1 : index
    %c0_54 = arith.constant 0 : index
    %c0_55 = arith.constant 0 : index
    %88 = vector.load %arg8[%c1_53, %c0_54, %c0_55] : memref<2x8x1xf32, #tpu.memory_space<vmem>>, vector<1x8x1xf32>
    %89 = vector.shape_cast %88 : vector<1x8x1xf32> to vector<8x1xf32>
    %90 = vector.shape_cast %63 : vector<8x1xf32> to vector<1x8x1xf32>
    tpu.vector_store %arg8[%c1_53, %c0_54, %c0_55], %90 {strides = array<i32>} : memref<2x8x1xf32, #tpu.memory_space<vmem>>, vector<1x8x1xf32>,
    %c0_i32_56 = arith.constant 0 : i32
    %91 = arith.cmpi eq, %arg2, %c0_i32_56 : i32
    %92 = arith.extui %91 : i1 to i32
    %c0_i32_57 = arith.constant 0 : i32
    %93 = arith.cmpi ne, %92, %c0_i32_57 : i32
    scf.if %93 {
      %c0_58 = arith.constant 0 : index
      %c0_59 = arith.constant 0 : index
      %c0_60 = arith.constant 0 : index
      %94 = vector.load %arg10[%c0_58, %c0_59, %c0_60] : memref<2x8x128xf32, #tpu.memory_space<vmem>>, vector<1x8x128xf32>
      %95 = vector.shape_cast %94 : vector<1x8x128xf32> to vector<8x128xf32>
      %c0_61 = arith.constant 0 : index
      %c0_62 = arith.constant 0 : index
      %c0_63 = arith.constant 0 : index
      %96 = vector.load %arg9[%c0_61, %c0_62, %c0_63] : memref<2x8x1xf32, #tpu.memory_space<vmem>>, vector<1x8x1xf32>
      %97 = vector.shape_cast %96 : vector<1x8x1xf32> to vector<8x1xf32>
      %98 = tpu.reciprocal %97 {approx = true} : vector<8x1xf32> -> vector<8x1xf32>
      %99 = vector.broadcast %98 : vector<8x1xf32> to vector<8x128xf32>
      %100 = arith.mulf %95, %99 : vector<8x128xf32>
      %c1_64 = arith.constant 1 : index
      %c0_65 = arith.constant 0 : index
      %c0_66 = arith.constant 0 : index
      %101 = vector.load %arg10[%c1_64, %c0_65, %c0_66] : memref<2x8x128xf32, #tpu.memory_space<vmem>>, vector<1x8x128xf32>
      %102 = vector.shape_cast %101 : vector<1x8x128xf32> to vector<8x128xf32>
      %c1_67 = arith.constant 1 : index
      %c0_68 = arith.constant 0 : index
      %c0_69 = arith.constant 0 : index
      %103 = vector.load %arg9[%c1_67, %c0_68, %c0_69] : memref<2x8x1xf32, #tpu.memory_space<vmem>>, vector<1x8x1xf32>
      %104 = vector.shape_cast %103 : vector<1x8x1xf32> to vector<8x1xf32>
      %105 = tpu.reciprocal %104 {approx = true} : vector<8x1xf32> -> vector<8x1xf32>
      %106 = vector.broadcast %105 : vector<8x1xf32> to vector<8x128xf32>
      %107 = arith.mulf %102, %106 : vector<8x128xf32>
      %108 = tpu.concatenate %100, %107 in 1 : vector<8x128xf32>, vector<8x128xf32> -> vector<8x256xf32>
      %109 = arith.truncf %108 : vector<8x256xf32> to vector<8x256xbf16>
      %c0_70 = arith.constant 0 : index
      %c0_71 = arith.constant 0 : index
      %c0_72 = arith.constant 0 : index
      %110 = vector.load %arg7[%c0_70, %c0_71, %c0_72] : memref<1x8x256xbf16, #tpu.memory_space<vmem>>, vector<1x8x256xbf16>
      %111 = vector.shape_cast %110 : vector<1x8x256xbf16> to vector<8x256xbf16>
      %112 = vector.shape_cast %109 : vector<8x256xbf16> to vector<1x8x256xbf16>
      tpu.vector_store %arg7[%c0_70, %c0_71, %c0_72], %112 {strides = array<i32>} : memref<1x8x256xbf16, #tpu.memory_space<vmem>>, vector<1x8x256xbf16>,
    } else {
    }
    return
  }
  func.func @transform_0(%arg0: i32, %arg1: i32, %arg2: i32) -> (i32, i32, i32) {
    %c0_i32 = arith.constant 0 : i32
    %c0_i32_0 = arith.constant 0 : i32
    return %arg0, %arg1, %c0_i32 : i32, i32, i32
  }
  func.func @transform_1(%arg0: i32, %arg1: i32, %arg2: i32) -> (i32, i32, i32) {
    %c0_i32 = arith.constant 0 : i32
    %c0_i32_0 = arith.constant 0 : i32
    return %arg0, %arg2, %c0_i32 : i32, i32, i32
  }
  func.func @transform_2(%arg0: i32, %arg1: i32, %arg2: i32) -> (i32, i32, i32) {
    %c1_i32 = arith.constant 1 : i32
    %c0_i32 = arith.constant 0 : i32
    return %arg0, %arg2, %c1_i32 : i32, i32, i32
  }
  func.func @transform_3(%arg0: i32, %arg1: i32, %arg2: i32) -> (i32, i32, i32) {
    %c0_i32 = arith.constant 0 : i32
    %c0_i32_0 = arith.constant 0 : i32
    return %arg0, %c0_i32, %arg2 : i32, i32, i32
  }
  func.func @transform_4(%arg0: i32, %arg1: i32, %arg2: i32) -> (i32, i32, i32) {
    %c0_i32 = arith.constant 0 : i32
    %c0_i32_0 = arith.constant 0 : i32
    return %arg0, %arg1, %c0_i32 : i32, i32, i32
  }
}

module attributes {stable_mosaic.version = 11 : i64} {
  func.func @_flash_attn_kernel(%arg0: i32, %arg1: i32, %arg2: i32, %arg3: memref<1x8x256xbf16, #tpu.memory_space<vmem>>, %arg4: memref<1x8x256xbf16, #tpu.memory_space<vmem>>, %arg5: memref<1x8x256xbf16, #tpu.memory_space<vmem>>, %arg6: memref<1x1x8xf32, #tpu.memory_space<vmem>>, %arg7: memref<1x8x256xbf16, #tpu.memory_space<vmem>>, %arg8: memref<2x8x1xf32, #tpu.memory_space<vmem>>, %arg9: memref<2x8x1xf32, #tpu.memory_space<vmem>>, %arg10: memref<2x8x128xf32, #tpu.memory_space<vmem>>) attributes {dimension_semantics = [#tpu.dimension_semantics<parallel>, #tpu.dimension_semantics<parallel>, #tpu.dimension_semantics<arbitrary>], iteration_bounds = array<i64: 2, 1, 1>, scalar_prefetch = 0 : i64, scratch_operands = 3 : i64, tpu.core_type = #tpu.core_type<tc>, window_params = [{transform_indices = @transform_0, window_bounds = array<i64: 1, 8, 256>}, {transform_indices = @transform_1, window_bounds = array<i64: 1, 8, 256>}, {transform_indices = @transform_2, window_bounds = array<i64: 1, 8, 256>}, {transform_indices = @transform_3, window_bounds = array<i64: 1, 1, 8>}, {transform_indices = @transform_4, window_bounds = array<i64: 1, 8, 256>}]} {
    %c0_i32 = arith.constant 0 : i32
    %0 = arith.cmpi eq, %arg2, %c0_i32 : i32
    %1 = arith.extui %0 : i1 to i32
    %c0_i32_0 = arith.constant 0 : i32
    %2 = arith.cmpi ne, %1, %c0_i32_0 : i32
    scf.if %2 {
      %cst_58 = arith.constant 0xFF800000 : f32
      %94 = vector.broadcast %cst_58 : f32 to vector<2x8x1xf32>
      %c0_59 = arith.constant 0 : index
      %c0_60 = arith.constant 0 : index
      %c0_61 = arith.constant 0 : index
      %95 = vector.load %arg8[%c0_59, %c0_60, %c0_61] : memref<2x8x1xf32, #tpu.memory_space<vmem>>, vector<2x8x1xf32>
      tpu.vector_store %arg8[%c0_59, %c0_60, %c0_61], %94 {strides = array<i32>} : memref<2x8x1xf32, #tpu.memory_space<vmem>>, vector<2x8x1xf32>,
      %cst_62 = arith.constant 0.000000e+00 : f32
      %96 = vector.broadcast %cst_62 : f32 to vector<2x8x1xf32>
      %c0_63 = arith.constant 0 : index
      %c0_64 = arith.constant 0 : index
      %c0_65 = arith.constant 0 : index
      %97 = vector.load %arg9[%c0_63, %c0_64, %c0_65] : memref<2x8x1xf32, #tpu.memory_space<vmem>>, vector<2x8x1xf32>
      tpu.vector_store %arg9[%c0_63, %c0_64, %c0_65], %96 {strides = array<i32>} : memref<2x8x1xf32, #tpu.memory_space<vmem>>, vector<2x8x1xf32>,
      %cst_66 = arith.constant 0.000000e+00 : f32
      %98 = vector.broadcast %cst_66 : f32 to vector<2x8x128xf32>
      %c0_67 = arith.constant 0 : index
      %c0_68 = arith.constant 0 : index
      %c0_69 = arith.constant 0 : index
      %99 = vector.load %arg10[%c0_67, %c0_68, %c0_69] : memref<2x8x128xf32, #tpu.memory_space<vmem>>, vector<2x8x128xf32>
      tpu.vector_store %arg10[%c0_67, %c0_68, %c0_69], %98 {strides = array<i32>} : memref<2x8x128xf32, #tpu.memory_space<vmem>>, vector<2x8x128xf32>,
    } else {
    }
    %c0 = arith.constant 0 : index
    %c0_1 = arith.constant 0 : index
    %c0_2 = arith.constant 0 : index
    %3 = vector.load %arg3[%c0, %c0_1, %c0_2] : memref<1x8x256xbf16, #tpu.memory_space<vmem>>, vector<1x8x256xbf16>
    %4 = vector.shape_cast %3 : vector<1x8x256xbf16> to vector<8x256xbf16>
    %c0_3 = arith.constant 0 : index
    %c0_4 = arith.constant 0 : index
    %c0_5 = arith.constant 0 : index
    %5 = vector.load %arg4[%c0_3, %c0_4, %c0_5] : memref<1x8x256xbf16, #tpu.memory_space<vmem>>, vector<1x8x256xbf16>
    %6 = vector.shape_cast %5 : vector<1x8x256xbf16> to vector<8x256xbf16>
    %c0_6 = arith.constant 0 : index
    %c0_7 = arith.constant 0 : index
    %c0_8 = arith.constant 0 : index
    %7 = vector.load %arg5[%c0_6, %c0_7, %c0_8] : memref<1x8x256xbf16, #tpu.memory_space<vmem>>, vector<1x8x256xbf16>
    %8 = vector.shape_cast %7 : vector<1x8x256xbf16> to vector<8x256xbf16>
    %c0_9 = arith.constant 0 : index
    %c0_10 = arith.constant 0 : index
    %c0_11 = arith.constant 0 : index
    %9 = vector.load %arg6[%c0_9, %c0_10, %c0_11] : memref<1x1x8xf32, #tpu.memory_space<vmem>>, vector<1x1x8xf32>
    %10 = vector.shape_cast %9 : vector<1x1x8xf32> to vector<1x8xf32>
    %11 = vector.extract_strided_slice %4 {offsets = [0, 0], sizes = [8, 128], strides = [1, 1]} : vector<8x256xbf16> to vector<8x128xbf16>
    %12 = vector.extract_strided_slice %6 {offsets = [0, 0], sizes = [8, 128], strides = [1, 1]} : vector<8x256xbf16> to vector<8x128xbf16>
    %13 = vector.extract_strided_slice %8 {offsets = [0, 0], sizes = [8, 128], strides = [1, 1]} : vector<8x256xbf16> to vector<8x128xbf16>
    %cst = arith.constant dense<0.000000e+00> : vector<8x8xf32>
    %14 = tpu.matmul %11, %12, %cst {dimension_numbers = #tpu.dot_dimension_numbers<[1], [1], [0], [0], [0, 0, 1, 0], [], []>} : vector<8x128xbf16>, vector<8x128xbf16>, vector<8x8xf32> -> vector<8x8xf32>
    %cst_12 = arith.constant 0.0883883461 : f32
    %15 = vector.broadcast %cst_12 : f32 to vector<8x8xf32>
    %16 = arith.mulf %14, %15 : vector<8x8xf32>
    %17 = vector.broadcast %10 : vector<1x8xf32> to vector<8x8xf32>
    %18 = arith.addf %16, %17 : vector<8x8xf32>
    %c0_13 = arith.constant 0 : index
    %c0_14 = arith.constant 0 : index
    %c0_15 = arith.constant 0 : index
    %19 = vector.load %arg8[%c0_13, %c0_14, %c0_15] : memref<2x8x1xf32, #tpu.memory_space<vmem>>, vector<1x8x1xf32>
    %20 = vector.shape_cast %19 : vector<1x8x1xf32> to vector<8x1xf32>
    %cst_16 = arith.constant dense<0xFF800000> : vector<8xf32>
    %21 = vector.multi_reduction <maximumf>, %18, %cst_16 [1] : vector<8x8xf32> to vector<8xf32>
    %22 = vector.shape_cast %21 : vector<8xf32> to vector<8x1xf32>
    %23 = arith.maximumf %20, %22 : vector<8x1xf32>
    %24 = arith.subf %20, %23 : vector<8x1xf32>
    %25 = math.exp %24 : vector<8x1xf32>
    %26 = vector.broadcast %23 : vector<8x1xf32> to vector<8x8xf32>
    %27 = arith.subf %18, %26 : vector<8x8xf32>
    %28 = math.exp %27 : vector<8x8xf32>
    %c0_17 = arith.constant 0 : index
    %c0_18 = arith.constant 0 : index
    %c0_19 = arith.constant 0 : index
    %29 = vector.load %arg9[%c0_17, %c0_18, %c0_19] : memref<2x8x1xf32, #tpu.memory_space<vmem>>, vector<1x8x1xf32>
    %30 = vector.shape_cast %29 : vector<1x8x1xf32> to vector<8x1xf32>
    %31 = arith.mulf %25, %30 : vector<8x1xf32>
    %cst_20 = arith.constant dense<0.000000e+00> : vector<8xf32>
    %32 = vector.multi_reduction <add>, %28, %cst_20 [1] : vector<8x8xf32> to vector<8xf32>
    %33 = vector.shape_cast %32 : vector<8xf32> to vector<8x1xf32>
    %34 = arith.addf %31, %33 : vector<8x1xf32>
    %c0_21 = arith.constant 0 : index
    %c0_22 = arith.constant 0 : index
    %c0_23 = arith.constant 0 : index
    %35 = vector.load %arg9[%c0_21, %c0_22, %c0_23] : memref<2x8x1xf32, #tpu.memory_space<vmem>>, vector<1x8x1xf32>
    %36 = vector.shape_cast %35 : vector<1x8x1xf32> to vector<8x1xf32>
    %37 = vector.shape_cast %34 : vector<8x1xf32> to vector<1x8x1xf32>
    tpu.vector_store %arg9[%c0_21, %c0_22, %c0_23], %37 {strides = array<i32>} : memref<2x8x1xf32, #tpu.memory_space<vmem>>, vector<1x8x1xf32>,
    %c0_24 = arith.constant 0 : index
    %c0_25 = arith.constant 0 : index
    %c0_26 = arith.constant 0 : index
    %38 = vector.load %arg10[%c0_24, %c0_25, %c0_26] : memref<2x8x128xf32, #tpu.memory_space<vmem>>, vector<1x8x128xf32>
    %39 = vector.shape_cast %38 : vector<1x8x128xf32> to vector<8x128xf32>
    %40 = vector.broadcast %25 : vector<8x1xf32> to vector<8x128xf32>
    %41 = arith.mulf %40, %39 : vector<8x128xf32>
    %42 = arith.truncf %28 : vector<8x8xf32> to vector<8x8xbf16>
    %cst_27 = arith.constant dense<0.000000e+00> : vector<8x128xf32>
    %43 = tpu.matmul %42, %13, %cst_27 {dimension_numbers = #tpu.dot_dimension_numbers<[1], [0], [0], [1], [0, 0, 1, 1], [], []>} : vector<8x8xbf16>, vector<8x128xbf16>, vector<8x128xf32> -> vector<8x128xf32>
    %44 = arith.addf %41, %43 : vector<8x128xf32>
    %c0_28 = arith.constant 0 : index
    %c0_29 = arith.constant 0 : index
    %c0_30 = arith.constant 0 : index
    %45 = vector.load %arg10[%c0_28, %c0_29, %c0_30] : memref<2x8x128xf32, #tpu.memory_space<vmem>>, vector<1x8x128xf32>
    %46 = vector.shape_cast %45 : vector<1x8x128xf32> to vector<8x128xf32>
    %47 = vector.shape_cast %44 : vector<8x128xf32> to vector<1x8x128xf32>
    tpu.vector_store %arg10[%c0_28, %c0_29, %c0_30], %47 {strides = array<i32>} : memref<2x8x128xf32, #tpu.memory_space<vmem>>, vector<1x8x128xf32>,
    %c0_31 = arith.constant 0 : index
    %c0_32 = arith.constant 0 : index
    %c0_33 = arith.constant 0 : index
    %48 = vector.load %arg8[%c0_31, %c0_32, %c0_33] : memref<2x8x1xf32, #tpu.memory_space<vmem>>, vector<1x8x1xf32>
    %49 = vector.shape_cast %48 : vector<1x8x1xf32> to vector<8x1xf32>
    %50 = vector.shape_cast %23 : vector<8x1xf32> to vector<1x8x1xf32>
    tpu.vector_store %arg8[%c0_31, %c0_32, %c0_33], %50 {strides = array<i32>} : memref<2x8x1xf32, #tpu.memory_space<vmem>>, vector<1x8x1xf32>,
    %51 = vector.extract_strided_slice %4 {offsets = [0, 128], sizes = [8, 128], strides = [1, 1]} : vector<8x256xbf16> to vector<8x128xbf16>
    %52 = vector.extract_strided_slice %6 {offsets = [0, 128], sizes = [8, 128], strides = [1, 1]} : vector<8x256xbf16> to vector<8x128xbf16>
    %53 = vector.extract_strided_slice %8 {offsets = [0, 128], sizes = [8, 128], strides = [1, 1]} : vector<8x256xbf16> to vector<8x128xbf16>
    %cst_34 = arith.constant dense<0.000000e+00> : vector<8x8xf32>
    %54 = tpu.matmul %51, %52, %cst_34 {dimension_numbers = #tpu.dot_dimension_numbers<[1], [1], [0], [0], [0, 0, 1, 0], [], []>} : vector<8x128xbf16>, vector<8x128xbf16>, vector<8x8xf32> -> vector<8x8xf32>
    %cst_35 = arith.constant 0.0883883461 : f32
    %55 = vector.broadcast %cst_35 : f32 to vector<8x8xf32>
    %56 = arith.mulf %54, %55 : vector<8x8xf32>
    %57 = vector.broadcast %10 : vector<1x8xf32> to vector<8x8xf32>
    %58 = arith.addf %56, %57 : vector<8x8xf32>
    %c1 = arith.constant 1 : index
    %c0_36 = arith.constant 0 : index
    %c0_37 = arith.constant 0 : index
    %59 = vector.load %arg8[%c1, %c0_36, %c0_37] : memref<2x8x1xf32, #tpu.memory_space<vmem>>, vector<1x8x1xf32>
    %60 = vector.shape_cast %59 : vector<1x8x1xf32> to vector<8x1xf32>
    %cst_38 = arith.constant dense<0xFF800000> : vector<8xf32>
    %61 = vector.multi_reduction <maximumf>, %58, %cst_38 [1] : vector<8x8xf32> to vector<8xf32>
    %62 = vector.shape_cast %61 : vector<8xf32> to vector<8x1xf32>
    %63 = arith.maximumf %60, %62 : vector<8x1xf32>
    %64 = arith.subf %60, %63 : vector<8x1xf32>
    %65 = math.exp %64 : vector<8x1xf32>
    %66 = vector.broadcast %63 : vector<8x1xf32> to vector<8x8xf32>
    %67 = arith.subf %58, %66 : vector<8x8xf32>
    %68 = math.exp %67 : vector<8x8xf32>
    %c1_39 = arith.constant 1 : index
    %c0_40 = arith.constant 0 : index
    %c0_41 = arith.constant 0 : index
    %69 = vector.load %arg9[%c1_39, %c0_40, %c0_41] : memref<2x8x1xf32, #tpu.memory_space<vmem>>, vector<1x8x1xf32>
    %70 = vector.shape_cast %69 : vector<1x8x1xf32> to vector<8x1xf32>
    %71 = arith.mulf %65, %70 : vector<8x1xf32>
    %cst_42 = arith.constant dense<0.000000e+00> : vector<8xf32>
    %72 = vector.multi_reduction <add>, %68, %cst_42 [1] : vector<8x8xf32> to vector<8xf32>
    %73 = vector.shape_cast %72 : vector<8xf32> to vector<8x1xf32>
    %74 = arith.addf %71, %73 : vector<8x1xf32>
    %c1_43 = arith.constant 1 : index
    %c0_44 = arith.constant 0 : index
    %c0_45 = arith.constant 0 : index
    %75 = vector.load %arg9[%c1_43, %c0_44, %c0_45] : memref<2x8x1xf32, #tpu.memory_space<vmem>>, vector<1x8x1xf32>
    %76 = vector.shape_cast %75 : vector<1x8x1xf32> to vector<8x1xf32>
    %77 = vector.shape_cast %74 : vector<8x1xf32> to vector<1x8x1xf32>
    tpu.vector_store %arg9[%c1_43, %c0_44, %c0_45], %77 {strides = array<i32>} : memref<2x8x1xf32, #tpu.memory_space<vmem>>, vector<1x8x1xf32>,
    %c1_46 = arith.constant 1 : index
    %c0_47 = arith.constant 0 : index
    %c0_48 = arith.constant 0 : index
    %78 = vector.load %arg10[%c1_46, %c0_47, %c0_48] : memref<2x8x128xf32, #tpu.memory_space<vmem>>, vector<1x8x128xf32>
    %79 = vector.shape_cast %78 : vector<1x8x128xf32> to vector<8x128xf32>
    %80 = vector.broadcast %65 : vector<8x1xf32> to vector<8x128xf32>
    %81 = arith.mulf %80, %79 : vector<8x128xf32>
    %82 = arith.truncf %68 : vector<8x8xf32> to vector<8x8xbf16>
    %cst_49 = arith.constant dense<0.000000e+00> : vector<8x128xf32>
    %83 = tpu.matmul %82, %53, %cst_49 {dimension_numbers = #tpu.dot_dimension_numbers<[1], [0], [0], [1], [0, 0, 1, 1], [], []>} : vector<8x8xbf16>, vector<8x128xbf16>, vector<8x128xf32> -> vector<8x128xf32>
    %84 = arith.addf %81, %83 : vector<8x128xf32>
    %c1_50 = arith.constant 1 : index
    %c0_51 = arith.constant 0 : index
    %c0_52 = arith.constant 0 : index
    %85 = vector.load %arg10[%c1_50, %c0_51, %c0_52] : memref<2x8x128xf32, #tpu.memory_space<vmem>>, vector<1x8x128xf32>
    %86 = vector.shape_cast %85 : vector<1x8x128xf32> to vector<8x128xf32>
    %87 = vector.shape_cast %84 : vector<8x128xf32> to vector<1x8x128xf32>
    tpu.vector_store %arg10[%c1_50, %c0_51, %c0_52], %87 {strides = array<i32>} : memref<2x8x128xf32, #tpu.memory_space<vmem>>, vector<1x8x128xf32>,
    %c1_53 = arith.constant 1 : index
    %c0_54 = arith.constant 0 : index
    %c0_55 = arith.constant 0 : index
    %88 = vector.load %arg8[%c1_53, %c0_54, %c0_55] : memref<2x8x1xf32, #tpu.memory_space<vmem>>, vector<1x8x1xf32>
    %89 = vector.shape_cast %88 : vector<1x8x1xf32> to vector<8x1xf32>
    %90 = vector.shape_cast %63 : vector<8x1xf32> to vector<1x8x1xf32>
    tpu.vector_store %arg8[%c1_53, %c0_54, %c0_55], %90 {strides = array<i32>} : memref<2x8x1xf32, #tpu.memory_space<vmem>>, vector<1x8x1xf32>,
    %c0_i32_56 = arith.constant 0 : i32
    %91 = arith.cmpi eq, %arg2, %c0_i32_56 : i32
    %92 = arith.extui %91 : i1 to i32
    %c0_i32_57 = arith.constant 0 : i32
    %93 = arith.cmpi ne, %92, %c0_i32_57 : i32
    scf.if %93 {
      %c0_58 = arith.constant 0 : index
      %c0_59 = arith.constant 0 : index
      %c0_60 = arith.constant 0 : index
      %94 = vector.load %arg10[%c0_58, %c0_59, %c0_60] : memref<2x8x128xf32, #tpu.memory_space<vmem>>, vector<1x8x128xf32>
      %95 = vector.shape_cast %94 : vector<1x8x128xf32> to vector<8x128xf32>
      %c0_61 = arith.constant 0 : index
      %c0_62 = arith.constant 0 : index
      %c0_63 = arith.constant 0 : index
      %96 = vector.load %arg9[%c0_61, %c0_62, %c0_63] : memref<2x8x1xf32, #tpu.memory_space<vmem>>, vector<1x8x1xf32>
      %97 = vector.shape_cast %96 : vector<1x8x1xf32> to vector<8x1xf32>
      %98 = tpu.reciprocal %97 {approx = true} : vector<8x1xf32> -> vector<8x1xf32>
      %99 = vector.broadcast %98 : vector<8x1xf32> to vector<8x128xf32>
      %100 = arith.mulf %95, %99 : vector<8x128xf32>
      %c1_64 = arith.constant 1 : index
      %c0_65 = arith.constant 0 : index
      %c0_66 = arith.constant 0 : index
      %101 = vector.load %arg10[%c1_64, %c0_65, %c0_66] : memref<2x8x128xf32, #tpu.memory_space<vmem>>, vector<1x8x128xf32>
      %102 = vector.shape_cast %101 : vector<1x8x128xf32> to vector<8x128xf32>
      %c1_67 = arith.constant 1 : index
      %c0_68 = arith.constant 0 : index
      %c0_69 = arith.constant 0 : index
      %103 = vector.load %arg9[%c1_67, %c0_68, %c0_69] : memref<2x8x1xf32, #tpu.memory_space<vmem>>, vector<1x8x1xf32>
      %104 = vector.shape_cast %103 : vector<1x8x1xf32> to vector<8x1xf32>
      %105 = tpu.reciprocal %104 {approx = true} : vector<8x1xf32> -> vector<8x1xf32>
      %106 = vector.broadcast %105 : vector<8x1xf32> to vector<8x128xf32>
      %107 = arith.mulf %102, %106 : vector<8x128xf32>
      %108 = tpu.concatenate %100, %107 in 1 : vector<8x128xf32>, vector<8x128xf32> -> vector<8x256xf32>
      %109 = arith.truncf %108 : vector<8x256xf32> to vector<8x256xbf16>
      %c0_70 = arith.constant 0 : index
      %c0_71 = arith.constant 0 : index
      %c0_72 = arith.constant 0 : index
      %110 = vector.load %arg7[%c0_70, %c0_71, %c0_72] : memref<1x8x256xbf16, #tpu.memory_space<vmem>>, vector<1x8x256xbf16>
      %111 = vector.shape_cast %110 : vector<1x8x256xbf16> to vector<8x256xbf16>
      %112 = vector.shape_cast %109 : vector<8x256xbf16> to vector<1x8x256xbf16>
      tpu.vector_store %arg7[%c0_70, %c0_71, %c0_72], %112 {strides = array<i32>} : memref<1x8x256xbf16, #tpu.memory_space<vmem>>, vector<1x8x256xbf16>,
    } else {
    }
    return
  }
  func.func @transform_0(%arg0: i32, %arg1: i32, %arg2: i32) -> (i32, i32, i32) {
    %c0_i32 = arith.constant 0 : i32
    %c0_i32_0 = arith.constant 0 : i32
    return %arg0, %arg1, %c0_i32 : i32, i32, i32
  }
  func.func @transform_1(%arg0: i32, %arg1: i32, %arg2: i32) -> (i32, i32, i32) {
    %c0_i32 = arith.constant 0 : i32
    %c0_i32_0 = arith.constant 0 : i32
    return %arg0, %arg2, %c0_i32 : i32, i32, i32
  }
  func.func @transform_2(%arg0: i32, %arg1: i32, %arg2: i32) -> (i32, i32, i32) {
    %c1_i32 = arith.constant 1 : i32
    %c0_i32 = arith.constant 0 : i32
    return %arg0, %arg2, %c1_i32 : i32, i32, i32
  }
  func.func @transform_3(%arg0: i32, %arg1: i32, %arg2: i32) -> (i32, i32, i32) {
    %c0_i32 = arith.constant 0 : i32
    %c0_i32_0 = arith.constant 0 : i32
    return %arg0, %c0_i32, %arg2 : i32, i32, i32
  }
  func.func @transform_4(%arg0: i32, %arg1: i32, %arg2: i32) -> (i32, i32, i32) {
    %c0_i32 = arith.constant 0 : i32
    %c0_i32_0 = arith.constant 0 : i32
    return %arg0, %arg1, %c0_i32 : i32, i32, i32
  }
}

module attributes {stable_mosaic.version = 11 : i64} {
  func.func @_gen_logits_kernel(%arg0: i32, %arg1: i32, %arg2: memref<8x256xbf16, #tpu.memory_space<vmem>>, %arg3: memref<256x512xbf16, #tpu.memory_space<vmem>>, %arg4: memref<1x512xf32, #tpu.memory_space<vmem>>, %arg5: memref<8x512xf32, #tpu.memory_space<vmem>>, %arg6: memref<8x1xf32, #tpu.memory_space<vmem>>, %arg7: memref<8x1xf32, #tpu.memory_space<vmem>>, %arg8: memref<8x1xf32, #tpu.memory_space<vmem>>) attributes {dimension_semantics = [#tpu.dimension_semantics<parallel>, #tpu.dimension_semantics<arbitrary>], iteration_bounds = array<i64: 2, 1>, scalar_prefetch = 0 : i64, scratch_operands = 2 : i64, tpu.core_type = #tpu.core_type<tc>, window_params = [{transform_indices = @transform_0, window_bounds = array<i64: 8, 256>}, {transform_indices = @transform_1, window_bounds = array<i64: 256, 512>}, {transform_indices = @transform_2, window_bounds = array<i64: 1, 512>}, {transform_indices = @transform_3, window_bounds = array<i64: 8, 512>}, {transform_indices = @transform_4, window_bounds = array<i64: 8, 1>}]} {
    %c0_i32 = arith.constant 0 : i32
    %0 = arith.cmpi eq, %arg1, %c0_i32 : i32
    %1 = arith.extui %0 : i1 to i32
    %c0_i32_0 = arith.constant 0 : i32
    %2 = arith.cmpi ne, %1, %c0_i32_0 : i32
    scf.if %2 {
      %cst_22 = arith.constant 0xFF800000 : f32
      %30 = vector.broadcast %cst_22 : f32 to vector<8x1xf32>
      %c0_23 = arith.constant 0 : index
      %c0_24 = arith.constant 0 : index
      %31 = vector.load %arg7[%c0_23, %c0_24] : memref<8x1xf32, #tpu.memory_space<vmem>>, vector<8x1xf32>
      tpu.vector_store %arg7[%c0_23, %c0_24], %30 {strides = array<i32>} : memref<8x1xf32, #tpu.memory_space<vmem>>, vector<8x1xf32>,
      %cst_25 = arith.constant 0.000000e+00 : f32
      %32 = vector.broadcast %cst_25 : f32 to vector<8x1xf32>
      %c0_26 = arith.constant 0 : index
      %c0_27 = arith.constant 0 : index
      %33 = vector.load %arg8[%c0_26, %c0_27] : memref<8x1xf32, #tpu.memory_space<vmem>>, vector<8x1xf32>
      tpu.vector_store %arg8[%c0_26, %c0_27], %32 {strides = array<i32>} : memref<8x1xf32, #tpu.memory_space<vmem>>, vector<8x1xf32>,
    } else {
    }
    %c0 = arith.constant 0 : index
    %c0_1 = arith.constant 0 : index
    %3 = vector.load %arg2[%c0, %c0_1] : memref<8x256xbf16, #tpu.memory_space<vmem>>, vector<8x256xbf16>
    %c0_2 = arith.constant 0 : index
    %c0_3 = arith.constant 0 : index
    %4 = vector.load %arg3[%c0_2, %c0_3] : memref<256x512xbf16, #tpu.memory_space<vmem>>, vector<256x512xbf16>
    %cst = arith.constant dense<0.000000e+00> : vector<8x512xf32>
    %5 = tpu.matmul %3, %4, %cst {dimension_numbers = #tpu.dot_dimension_numbers<[1], [0], [0], [1], [0, 0, 1, 1], [], []>} : vector<8x256xbf16>, vector<256x512xbf16>, vector<8x512xf32> -> vector<8x512xf32>
    %c0_4 = arith.constant 0 : index
    %c0_5 = arith.constant 0 : index
    %6 = vector.load %arg4[%c0_4, %c0_5] : memref<1x512xf32, #tpu.memory_space<vmem>>, vector<1x512xf32>
    %7 = vector.broadcast %6 : vector<1x512xf32> to vector<8x512xf32>
    %8 = arith.addf %5, %7 : vector<8x512xf32>
    %c0_6 = arith.constant 0 : index
    %c0_7 = arith.constant 0 : index
    %9 = vector.load %arg5[%c0_6, %c0_7] : memref<8x512xf32, #tpu.memory_space<vmem>>, vector<8x512xf32>
    tpu.vector_store %arg5[%c0_6, %c0_7], %8 {strides = array<i32>} : memref<8x512xf32, #tpu.memory_space<vmem>>, vector<8x512xf32>,
    %c0_8 = arith.constant 0 : index
    %c0_9 = arith.constant 0 : index
    %10 = vector.load %arg7[%c0_8, %c0_9] : memref<8x1xf32, #tpu.memory_space<vmem>>, vector<8x1xf32>
    %cst_10 = arith.constant dense<0xFF800000> : vector<8xf32>
    %11 = vector.multi_reduction <maximumf>, %8, %cst_10 [1] : vector<8x512xf32> to vector<8xf32>
    %12 = vector.shape_cast %11 : vector<8xf32> to vector<8x1xf32>
    %13 = arith.maximumf %10, %12 : vector<8x1xf32>
    %c0_11 = arith.constant 0 : index
    %c0_12 = arith.constant 0 : index
    %14 = vector.load %arg8[%c0_11, %c0_12] : memref<8x1xf32, #tpu.memory_space<vmem>>, vector<8x1xf32>
    %c0_13 = arith.constant 0 : index
    %c0_14 = arith.constant 0 : index
    %15 = vector.load %arg7[%c0_13, %c0_14] : memref<8x1xf32, #tpu.memory_space<vmem>>, vector<8x1xf32>
    %16 = arith.subf %15, %13 : vector<8x1xf32>
    %17 = math.exp %16 : vector<8x1xf32>
    %18 = arith.mulf %14, %17 : vector<8x1xf32>
    %19 = vector.broadcast %13 : vector<8x1xf32> to vector<8x512xf32>
    %20 = arith.subf %8, %19 : vector<8x512xf32>
    %21 = math.exp %20 : vector<8x512xf32>
    %cst_15 = arith.constant dense<0.000000e+00> : vector<8xf32>
    %22 = vector.multi_reduction <add>, %21, %cst_15 [1] : vector<8x512xf32> to vector<8xf32>
    %23 = vector.shape_cast %22 : vector<8xf32> to vector<8x1xf32>
    %24 = arith.addf %18, %23 : vector<8x1xf32>
    %c0_16 = arith.constant 0 : index
    %c0_17 = arith.constant 0 : index
    %25 = vector.load %arg8[%c0_16, %c0_17] : memref<8x1xf32, #tpu.memory_space<vmem>>, vector<8x1xf32>
    tpu.vector_store %arg8[%c0_16, %c0_17], %24 {strides = array<i32>} : memref<8x1xf32, #tpu.memory_space<vmem>>, vector<8x1xf32>,
    %c0_18 = arith.constant 0 : index
    %c0_19 = arith.constant 0 : index
    %26 = vector.load %arg7[%c0_18, %c0_19] : memref<8x1xf32, #tpu.memory_space<vmem>>, vector<8x1xf32>
    tpu.vector_store %arg7[%c0_18, %c0_19], %13 {strides = array<i32>} : memref<8x1xf32, #tpu.memory_space<vmem>>, vector<8x1xf32>,
    %c0_i32_20 = arith.constant 0 : i32
    %27 = arith.cmpi eq, %arg1, %c0_i32_20 : i32
    %28 = arith.extui %27 : i1 to i32
    %c0_i32_21 = arith.constant 0 : i32
    %29 = arith.cmpi ne, %28, %c0_i32_21 : i32
    scf.if %29 {
      %c0_22 = arith.constant 0 : index
      %c0_23 = arith.constant 0 : index
      %30 = vector.load %arg7[%c0_22, %c0_23] : memref<8x1xf32, #tpu.memory_space<vmem>>, vector<8x1xf32>
      %c0_24 = arith.constant 0 : index
      %c0_25 = arith.constant 0 : index
      %31 = vector.load %arg8[%c0_24, %c0_25] : memref<8x1xf32, #tpu.memory_space<vmem>>, vector<8x1xf32>
      %32 = math.log %31 : vector<8x1xf32>
      %33 = arith.addf %30, %32 : vector<8x1xf32>
      %c0_26 = arith.constant 0 : index
      %c0_27 = arith.constant 0 : index
      %34 = vector.load %arg6[%c0_26, %c0_27] : memref<8x1xf32, #tpu.memory_space<vmem>>, vector<8x1xf32>
      tpu.vector_store %arg6[%c0_26, %c0_27], %33 {strides = array<i32>} : memref<8x1xf32, #tpu.memory_space<vmem>>, vector<8x1xf32>,
    } else {
    }
    return
  }
  func.func @transform_0(%arg0: i32, %arg1: i32) -> (i32, i32) {
    %c0_i32 = arith.constant 0 : i32
    %c0_i32_0 = arith.constant 0 : i32
    return %arg0, %c0_i32 : i32, i32
  }
  func.func @transform_1(%arg0: i32, %arg1: i32) -> (i32, i32) {
    %c0_i32 = arith.constant 0 : i32
    %c0_i32_0 = arith.constant 0 : i32
    return %c0_i32, %arg1 : i32, i32
  }
  func.func @transform_2(%arg0: i32, %arg1: i32) -> (i32, i32) {
    %c0_i32 = arith.constant 0 : i32
    %c0_i32_0 = arith.constant 0 : i32
    return %c0_i32, %arg1 : i32, i32
  }
  func.func @transform_3(%arg0: i32, %arg1: i32) -> (i32, i32) {
    %c0_i32 = arith.constant 0 : i32
    return %arg0, %arg1 : i32, i32
  }
  func.func @transform_4(%arg0: i32, %arg1: i32) -> (i32, i32) {
    %c0_i32 = arith.constant 0 : i32
    %c0_i32_0 = arith.constant 0 : i32
    return %arg0, %c0_i32 : i32, i32
  }
}

module attributes {stable_mosaic.version = 11 : i64} {
  func.func @_sub_lse_kernel(%arg0: i32, %arg1: i32, %arg2: memref<8x512xf32, #tpu.memory_space<vmem>>, %arg3: memref<8x1xf32, #tpu.memory_space<vmem>>, %arg4: memref<8x512xf32, #tpu.memory_space<vmem>>) attributes {dimension_semantics = [#tpu.dimension_semantics<parallel>, #tpu.dimension_semantics<parallel>], iteration_bounds = array<i64: 2, 1>, scalar_prefetch = 0 : i64, scratch_operands = 0 : i64, tpu.core_type = #tpu.core_type<tc>, window_params = [{transform_indices = @transform_0, window_bounds = array<i64: 8, 512>}, {transform_indices = @transform_1, window_bounds = array<i64: 8, 1>}, {transform_indices = @transform_2, window_bounds = array<i64: 8, 512>}]} {
    %c0 = arith.constant 0 : index
    %c0_0 = arith.constant 0 : index
    %0 = vector.load %arg2[%c0, %c0_0] : memref<8x512xf32, #tpu.memory_space<vmem>>, vector<8x512xf32>
    %c0_1 = arith.constant 0 : index
    %c0_2 = arith.constant 0 : index
    %1 = vector.load %arg3[%c0_1, %c0_2] : memref<8x1xf32, #tpu.memory_space<vmem>>, vector<8x1xf32>
    %2 = vector.broadcast %1 : vector<8x1xf32> to vector<8x512xf32>
    %3 = arith.subf %0, %2 : vector<8x512xf32>
    %c0_3 = arith.constant 0 : index
    %c0_4 = arith.constant 0 : index
    %4 = vector.load %arg4[%c0_3, %c0_4] : memref<8x512xf32, #tpu.memory_space<vmem>>, vector<8x512xf32>
    tpu.vector_store %arg4[%c0_3, %c0_4], %3 {strides = array<i32>} : memref<8x512xf32, #tpu.memory_space<vmem>>, vector<8x512xf32>,
    return
  }
  func.func @transform_0(%arg0: i32, %arg1: i32) -> (i32, i32) {
    %c0_i32 = arith.constant 0 : i32
    return %arg0, %arg1 : i32, i32
  }
  func.func @transform_1(%arg0: i32, %arg1: i32) -> (i32, i32) {
    %c0_i32 = arith.constant 0 : i32
    %c0_i32_0 = arith.constant 0 : i32
    return %arg0, %c0_i32 : i32, i32
  }
  func.func @transform_2(%arg0: i32, %arg1: i32) -> (i32, i32) {
    %c0_i32 = arith.constant 0 : i32
    return %arg0, %arg1 : i32, i32
  }
}

</mosaic_0001>

<bundles_post_ra>
// kernel: iia_forward.33
= control target key start
LH: loop header
LB: loop body
LE: loop exit
PB: predicated region body
PF: predicated region fallthrough
CT: control target
= control target key end

     0   :  { %s962_s15 = smov 0   ;;  %s964_s16 = smov 0   ;;  %s1035_s0 = inlined_call_operand.vmem [shape: bf16[2,8,768], index: 0, kind: input, shape index: {}, may-alias: {0,1,2}]   ;;  %s1036_s1 = inlined_call_operand.vmem [shape: bf16[2,8,768], index: 1, kind: input, shape index: {}, may-alias: {0,1,2}]   ;;  %s1037_s2 = inlined_call_operand.vmem [shape: bf16[2,8,768], index: 2, kind: input, shape index: {}, may-alias: {0,1,2}]   ;;  %s1038_s3 = inlined_call_operand.vmem [shape: f32[2,1,8], index: 3, kind: input, shape index: {}]   ;;  %s1039_s4 = inlined_call_operand.vmem [shape: bf16[2,8,256], index: 4, kind: output, shape index: {}]  }
   0x1   :  { %s966_s17 = smov 0  }
   0x2 LB: > { %s33_s18 = sadd.s32 1, %s927_s16  ;;  %p812_p0 = scmp.ge.s32.totalorder %s931_s17, 1  ;;  %s931_s17 = sphi %s966_s17, %s14_s17   ;;  %s927_s16 = sphi %s964_s16, %s1041_s16   ;;  %s923_s15 = sphi %s962_s15, %s1040_s15  }
   0x3   : > { %p35_p1 = scmp.ge.s32.totalorder %s33_s18, 2  ;;  %p236_p2 = scmp.lt.s32.totalorder %s931_s17, 3 }
   0x5   : > { %s1043_s18 = smov (%p35_p1, %s33_s18), 0  ;;  %p237_p3 = pnand %p812_p0, %p236_p2 }
   0x6   : > { %p296_p4 = scmp.lt.s32.totalorder (!%p237_p3), %s923_s15, 1 }
   0x7   : > { %240 = sbr.rel (%p237_p3) target bundleno = 1286 (0x506), region = 36 }
   0xc   : > { %v933_v0 = vmov 0.0   ;;  %vm934_vm0 = vmmov 0   ;;  %s1045_s15 = smov (!%p296_p4, %s923_s15), 1  ;;  %vm345_vm1 = vcmask 7168   ;;  %v935_v3 = vmov -inf  }
   0xd   : > { %839 = vmatprep.subr.bf16.mxu0 %v933_v0  ;;  %841 = vmatprep.mubr.msk.bf16.mxu0 %vm934_vm0, %v933_v0  ;;  %s985_s19 = smul.u32 24, %s1045_s15  ;;  %346 = vst.msk [vmem:[#allocation2] sm:$0xff] %vm345_vm1, %v935_v3  ;;  %347 = vst.msk [vmem:[#allocation2 + $0x8] sm:$0xff] %vm345_vm1, %v935_v3  ;;  %s330_s28 = scalar_lea.vmem %s1038_s3, %s1045_s15  ;;  %vm405_vm2 = vcmask 64512   ;;  %v936_v12 = vmov 0   ;;  %vm440_vm3 = vcmask 1043456  }
   0xe   : > { %845 = vmatprep.subr.bf16.mxu1 %v933_v0  ;;  %847 = vmatprep.mubr.msk.bf16.mxu1 %vm934_vm0, %v933_v0  ;;  %348 = vst.msk [vmem:[#allocation3] sm:$0xff] %vm345_vm1, %v933_v0  ;;  %349 = vst.msk [vmem:[#allocation3 + $0x8] sm:$0xff] %vm345_vm1, %v933_v0  ;;  %v820_v5 = vld [vmem:[%s330_s28] ss:$0 sm:$0xff]  ;;  %s829_s6 = sshll.u32 %s1045_s15, 3 }
   0xf   : > { %s734_s22 = scalar_lea.vmem %s1036_s1, %s985_s19  ;;  %s304_s25 = scalar_lea.vmem %s1035_s0, %s985_s19  ;;  %892 = vset.pattern.permute.xlu0 %v936_v12  ;;  %893 = vset.pattern.permute.xlu1 %v936_v12 }
  0x10   : > { %v818_v1 = vld [vmem:[%s734_s22 + $0x8] sm:$0xff]  ;;  %v352_v2 = vld [vmem:[%s304_s25] sm:$0xff]  ;;  %s740_s5 = scalar_lea.vmem %s1037_s2, %s985_s19  ;;  %s339_s9 = scalar_lea.vmem %s1039_s4, %s829_s6 }
  0x11   : > { %840 = vmatpush3.bf16.xpose.msra.mxu0 %v818_v1  ;;  %v819_v17 = vld [vmem:[%s740_s5 + $0x10] sm:$0xff]  ;;  %v823_v25 = vcombine.high %v818_v1, %v818_v1  ;;  %v822_v27 = vcombine.high %v352_v2, %v352_v2 }
  0x12   : > { %857 = vmatprep.subr.bf16.mxu0 %v933_v0  ;;  %v442_v18 = vsel %vm440_vm3, %v819_v17, 0  ;;  %v824_v19 = vcombine.high %v819_v17, %v819_v17 }
  0x13   : > { %846 = vmatpush3.bf16.msra.mxu1 %v442_v18 }
  0x14   : > { %v404_v13 = vld [vmem:[#allocation2] sm:$0xff]  ;;  %v578_v20 = vsel %vm440_vm3, %v824_v19, 0  ;;  %851 = vmatprep.subr.bf16.mxu1 %v933_v0  ;;  %v538_v39 = vld [vmem:[#allocation2 + $0x8] sm:$0xff] }
  0x15   : > { %v421_v54 = vld [vmem:[#allocation3] sm:$0xff]  ;;  %v555_v60 = vld [vmem:[#allocation3 + $0x8] sm:$0xff] }
  0x18   : > { %842 = vmatmul.mubr.bf16.vlgmr.msra.gmra.mxu0 %v352_v2 }
  0x19   : > { %859 = vmatprep.mubr.msk.bf16.mxu0 %vm934_vm0, %v933_v0  ;;  %858 = vmatpush3.bf16.msra.mxu0 %v578_v20 }
  0xd8   : > { %v390_v4 = vpop.f32.mrf.mxu0 }
  0xd9   : > { %v396_v6 = vmul.f32 0.088388346, %v390_v4 }
  0xda   : > { %v843_v7 = vpop.f32.mrf.mxu0 }
  0xdb   : > { %v403_v8 = vadd.f32 %v820_v5, %v396_v6 }
  0xdc   : > { %v393_v9 = vpop.f32.mrf.mxu0 }
  0xdd   : > { %v406_v10 = vsel %vm405_vm2, %v403_v8, -inf }
  0xde   : > { %407 = vmax.xlane.f32.xlu0 %v406_v10  ;;  %v844_v11 = vpop.f32.mrf.mxu0 }
 0x167   : > { %v408_v14 = vpop.xlane.xlu0 %407 }
 0x168   : > { %v409_v15 = vmax.f32 %v404_v13, %v408_v14 }
 0x16a   : > { %v410_v16 = vsub.f32 %v404_v13, %v409_v15  ;;  %486 = vst.msk [vmem:[#allocation2] sm:$0xff] %vm345_vm1, %v409_v15  ;;  %415 = vperm.xlu0 %892, %v409_v15  }
 0x16c   : > { %v411_v42 = vmul.f32 1.442695, %v410_v16 }
 0x1e5   : > { %v416_v21 = vpop.permute.xlu0 %415 }
 0x1e6   : > { %v418_v22 = vsub.f32 %v403_v8, %v416_v21 }
 0x1e8   : > { %v419_v23 = vmul.f32 1.442695, %v418_v22 }
 0x1ea   : > { %897 = vpow2.f32 %v419_v23 }
 0x1eb   : > { %899 = vpow2.f32 %v411_v42 }
 0x1f7   : > { %v898_v24 = vpop.eup %897 }
 0x1f8   : > { %v436_v26 = vpack.c.bf16 %v898_v24, %v898_v24  ;;  %v423_v44 = vsel %vm405_vm2, %v898_v24, 0.0  ;;  %v900_v46 = vpop.eup %899 }
 0x1f9   : > { %v422_v55 = vmul.f32 %v900_v46, %v421_v54 }
 0x1fa   : > { %848 = vmatmul.mubr.msk.bf16.vlgmr.msra.gmra.mxu1 %vm405_vm2, %v436_v26 }
 0x1fb   : > { %852 = vmatpush3.bf16.xpose.msra.mxu1 %v823_v25  ;;  %853 = vmatprep.mubr.msk.bf16.mxu1 %vm934_vm0, %v933_v0 }
 0x202   : > { %854 = vmatmul.mubr.bf16.vlgmr.msra.gmra.mxu1 %v822_v27 }
 0x2ba   : > { %v1012_v28 = vpop.f32.mrf.mxu1 }
 0x2bc   : > { %v849_v29 = vpop.f32.mrf.mxu1 }
 0x2be   : > { %v481_v30 = vpop.f32.mrf.mxu1 }
 0x2c0   : > { %v850_v31 = vpop.f32.mrf.mxu1 }
 0x2c2   : > { %v529_v32 = vpop.f32.mrf.mxu1 }
 0x2c3   : > { %v535_v33 = vmul.f32 0.088388346, %v529_v32 }
 0x2c4   : > { %v855_v34 = vpop.f32.mrf.mxu1 }
 0x2c5   : > { %v536_v35 = vadd.f32 %v820_v5, %v535_v33 }
 0x2c6   : > { %v532_v36 = vpop.f32.mrf.mxu1 }
 0x2c7   : > { %v539_v37 = vsel %vm405_vm2, %v536_v35, -inf }
 0x2c8   : > { %540 = vmax.xlane.f32.xlu1 %v539_v37  ;;  %v856_v38 = vpop.f32.mrf.mxu1 }
 0x351   : > { %v541_v40 = vpop.xlane.xlu1 %540 }
 0x352   : > { %v542_v41 = vmax.f32 %v538_v39, %v541_v40 }
 0x354   : > { %622 = vst.msk [vmem:[#allocation2 + $0x8] sm:$0xff] %vm345_vm1, %v542_v41  ;;  %548 = vperm.xlu1 %893, %v542_v41   ;;  %v543_v43 = vsub.f32 %v538_v39, %v542_v41 }
 0x356   : > { %v544_v45 = vmul.f32 1.442695, %v543_v43 }
 0x358   : > { %901 = vpow2.f32 %v544_v45 }
 0x365   : > { %v902_v47 = vpop.eup %901 }
 0x366   : > { %v556_v61 = vmul.f32 %v902_v47, %v555_v60 }
 0x378   : > { %424 = vadd.xlane.f32.xlu1 %v423_v44 }
 0x389   : > { %432 = vperm.xlu1 %893, %v900_v46  }
 0x38d   : > { %566 = vperm.xlu1 %893, %v902_v47  }
 0x3cf   : > { %v549_v48 = vpop.permute.xlu1 %548 }
 0x3d0   : > { %v551_v49 = vsub.f32 %v536_v35, %v549_v48 }
 0x3d2   : > { %v552_v50 = vmul.f32 1.442695, %v551_v49 }
 0x3d4   : > { %903 = vpow2.f32 %v552_v50 }
 0x3e1   : > { %v904_v51 = vpop.eup %903 }
 0x3e2   : > { %v557_v52 = vsel %vm405_vm2, %v904_v51, 0.0  ;;  %v570_v53 = vpack.c.bf16 %v904_v51, %v904_v51 }
 0x3e3   : > { %558 = vadd.xlane.f32.xlu0 %v557_v52 }
 0x3e4   : > { %860 = vmatmul.mubr.msk.bf16.vlgmr.msra.gmra.mxu0 %vm405_vm2, %v570_v53 }
 0x401   : > { %v425_v56 = vpop.xlane.xlu1 %424 }
 0x402   : > { %v426_v57 = vadd.f32 %v425_v56, %v422_v55 }
 0x404   : > { %428 = vst.msk [vmem:[#allocation3] sm:$0xff] %vm345_vm1, %v426_v57 }
 0x405   : > { %v433_v6 = vpop.permute.xlu1 %432 }
 0x406   : > { %v435_v8 = vmul.f32 0.0, %v433_v6 }
 0x408   : > { %v484_v11 = vadd.f32 %v1012_v28, %v435_v8 }
 0x409   : > { %v567_v7 = vpop.permute.xlu1 %566 }
 0x40a   : > { %v569_v9 = vmul.f32 0.0, %v567_v7 }
 0x40b   : > { %v627_v58 = vld [vmem:[#allocation3] sm:$0xff] }
 0x40c   : > { %905 = vrcp.f32 %v627_v58 }
 0x419   : > { %v906_v59 = vpop.eup %905 }
 0x41a   : > { %631 = vperm.xlu1 %893, %v906_v59  }
 0x46c   : > { %v559_v62 = vpop.xlane.xlu0 %558 }
 0x46d   : > { %v560_v63 = vadd.f32 %v559_v62, %v556_v61 }
 0x46f   : > { %561 = vst.msk [vmem:[#allocation3 + $0x8] sm:$0xff] %vm345_vm1, %v560_v63 }
 0x476   : > { %v636_v0 = vld [vmem:[#allocation3 + $0x8] sm:$0xff] }
 0x477   : > { %907 = vrcp.f32 %v636_v0 }
 0x484   : > { %v908_v1 = vpop.eup %907 }
 0x485   : > { %640 = vperm.xlu0 %892, %v908_v1  }
 0x495   : > { %v632_v10 = vpop.permute.xlu1 %631 }
 0x496   : > { %v634_v14 = vmul.f32 %v632_v10, %v484_v11 }
 0x4a4   : > { %v614_v2 = vpop.f32.mrf.mxu0 }
 0x4a5   : > { %v620_v12 = vadd.f32 %v614_v2, %v569_v9 }
 0x4a6   : > { %v861_v3 = vpop.f32.mrf.mxu0 }
 0x4a8   : > { %v617_v4 = vpop.f32.mrf.mxu0 }
 0x4aa   : > { %v862_v5 = vpop.f32.mrf.mxu0 }
 0x500   : > { %v641_v13 = vpop.permute.xlu0 %640 }
 0x501   : > { %v643_v15 = vmul.f32 %v641_v13, %v620_v12 }
 0x503   : > { %v830_v16 = vpack.c.bf16 %v643_v15, %v634_v14 }
 0x505   : > { %652 = vst [vmem:[%s339_s9] sm:$0xff] %v830_v16 }
 0x506 PF: > { %s14_s17 = sadd.s32 1, %s931_s17   ;;  %s1040_s15 = smov %s927_s16 }
 0x507   : > { %p11_p5 = scmp.ge.s32.totalorder %s14_s17, 4   ;;  %s1041_s16 = smov %s1043_s18 }
 0x509   :  { %13 = sbr.rel (!%p11_p5) target bundleno = 2 (0x2), region = 86 }

// kernel: iia_forward.34
= control target key start
LH: loop header
LB: loop body
LE: loop exit
PB: predicated region body
PF: predicated region fallthrough
CT: control target
= control target key end

     0   :  { %s806_s21 = smov 0   ;;  %s936_s0 = inlined_call_operand.vmem [shape: bf16[16,256], index: 0, kind: input, shape index: {}]   ;;  %s937_s1 = inlined_call_operand.vmem [shape: bf16[256,256], index: 1, kind: input, shape index: {}]   ;;  %s938_s2 = inlined_call_operand.vmem [shape: f32[1,256], index: 2, kind: input, shape index: {}]   ;;  %s939_s3 = inlined_call_operand.vmem [shape: bf16[16,256], index: 3, kind: input, shape index: {}]   ;;  %s940_s4 = inlined_call_operand.vmem [shape: f32[1,256], index: 4, kind: input, shape index: {}]   ;;  %s941_s5 = inlined_call_operand.vmem [shape: f32[1,256], index: 5, kind: input, shape index: {}]   ;;  %s942_s6 = inlined_call_operand.vmem [shape: bf16[16,256], index: 6, kind: output, shape index: {}]  }
   0x1 LB: > { %s651_s22 = sadd.s32 4294967295, %s769_s21   ;;  %p655_p0 = scmp.ge.s32.totalorder %s769_s21, 1  ;;  %s769_s21 = sphi %s806_s21, %s16_s21  }
   0x2   : > { %p222_p1 = scmp.lt.s32.totalorder %s769_s21, 3 }
   0x4   : > { %p223_p2 = pnand %p655_p0, %p222_p1 }
   0x5   : > { %p257_p3 = scmp.lt.s32.totalorder (!%p223_p2), %s651_s22, 1 }
   0x6   : > { %226 = sbr.rel (%p223_p2) target bundleno = 588 (0x24c), region = 44 }
   0xb   : > { %v711_v0 = vld [vmem:[%s937_s1 + $0x74] ss:$8 sps:$4 sm:$0xff]   ;;  %v713_v1 = vld [vmem:[%s937_s1 + $0x70] ss:$8 sps:$4 sm:$0xff]   ;;  %v714_v2 = vld [vmem:[%s937_s1 + $0x64] ss:$8 sps:$4 sm:$0xff]   ;;  %v307_v35 = vlaneseq }
   0xc   : > { %484 = vmatprep.subr.bf16.mxu0 %v711_v0  ;;  %v716_v3 = vld [vmem:[%s937_s1 + $0x60] ss:$8 sps:$4 sm:$0xff]   ;;  %v717_v4 = vld [vmem:[%s937_s1 + $0x54] ss:$8 sps:$4 sm:$0xff]   ;;  %v719_v5 = vld [vmem:[%s937_s1 + $0x50] ss:$8 sps:$4 sm:$0xff]  }
   0xd   : > { %485 = vmatpush1.bf16.msra.mxu0 %v713_v1  ;;  %v720_v6 = vld [vmem:[%s937_s1 + $0x44] ss:$8 sps:$4 sm:$0xff]   ;;  %v722_v7 = vld [vmem:[%s937_s1 + $0x40] ss:$8 sps:$4 sm:$0xff]   ;;  %s944_s22 = smov (!%p257_p3, %s651_s22), 1  ;;  %v308_v36 = vshrl.u32 %v307_v35, 7 }
   0xe   : > { %486 = vmatprep.subr.bf16.mxu0 %v714_v2  ;;  %v723_v8 = vld [vmem:[%s937_s1 + $0x34] ss:$8 sps:$4 sm:$0xff]   ;;  %v725_v9 = vld [vmem:[%s937_s1 + $0x30] ss:$8 sps:$4 sm:$0xff]   ;;  %s844_s19 = sshll.u32 %s944_s22, 3 }
   0xf   : > { %v726_v10 = vld [vmem:[%s937_s1 + $0x24] ss:$8 sps:$4 sm:$0xff]   ;;  %s261_s26 = scalar_lea.vmem %s936_s0, %s844_s19  ;;  %v728_v11 = vld [vmem:[%s937_s1 + $0x20] ss:$8 sps:$4 sm:$0xff]   ;;  %v729_v12 = vld [vmem:[%s937_s1 + $0x14] ss:$8 sps:$4 sm:$0xff]   ;;  %s266_s29 = scalar_lea.vmem %s939_s3, %s844_s19 }
  0x10   : > { %v272_v13 = vld [vmem:[%s261_s26] sm:$0xff]  ;;  %v731_v15 = vld [vmem:[%s937_s1 + $0x10] ss:$8 sps:$4 sm:$0xff]   ;;  %v735_v18 = vld [vmem:[%s937_s1 + $0xf4] ss:$8 sps:$4 sm:$0xff]   ;;  %v309_v37 = vsub.s32 0, %v308_v36  ;;  %s271_s11 = scalar_lea.vmem %s942_s6, %s844_s19 }
  0x11   : > { %487 = vmatpush1.bf16.msra.mxu0 %v716_v3  ;;  %v663_v14 = vcombine.high %v272_v13, %v272_v13  ;;  %v732_v16 = vld [vmem:[%s937_s1 + $0x4] ss:$8 sps:$4 sm:$0xff]   ;;  %v734_v17 = vld [vmem:[%s937_s1] ss:$8 sps:$4 sm:$0xff]   ;;  %v737_v19 = vld [vmem:[%s937_s1 + $0xf0] ss:$8 sps:$4 sm:$0xff]   ;;  %v662_v34 = vcombine.low %v272_v13, %v272_v13 }
  0x12   : > { %488 = vmatprep.subr.bf16.mxu0 %v717_v4  ;;  %v738_v20 = vld [vmem:[%s937_s1 + $0xe4] ss:$8 sps:$4 sm:$0xff]   ;;  %v740_v21 = vld [vmem:[%s937_s1 + $0xe0] ss:$8 sps:$4 sm:$0xff]   ;;  %v741_v22 = vld [vmem:[%s937_s1 + $0xd4] ss:$8 sps:$4 sm:$0xff]  }
  0x13   : > { %516 = vmatprep.mubr.bf16.mxu0 %v663_v14  ;;  %v743_v23 = vld [vmem:[%s937_s1 + $0xd0] ss:$8 sps:$4 sm:$0xff]   ;;  %v744_v24 = vld [vmem:[%s937_s1 + $0xc4] ss:$8 sps:$4 sm:$0xff]   ;;  %v746_v25 = vld [vmem:[%s937_s1 + $0xc0] ss:$8 sps:$4 sm:$0xff]  }
  0x14   : > { %v747_v26 = vld [vmem:[%s937_s1 + $0xb4] ss:$8 sps:$4 sm:$0xff]   ;;  %v749_v27 = vld [vmem:[%s937_s1 + $0xb0] ss:$8 sps:$4 sm:$0xff]   ;;  %v750_v28 = vld [vmem:[%s937_s1 + $0xa4] ss:$8 sps:$4 sm:$0xff]  }
  0x15   : > { %489 = vmatpush1.bf16.msra.mxu0 %v719_v5  ;;  %v752_v29 = vld [vmem:[%s937_s1 + $0xa0] ss:$8 sps:$4 sm:$0xff]   ;;  %v753_v30 = vld [vmem:[%s937_s1 + $0x94] ss:$8 sps:$4 sm:$0xff]   ;;  %v755_v31 = vld [vmem:[%s937_s1 + $0x90] ss:$8 sps:$4 sm:$0xff]  }
  0x16   : > { %490 = vmatprep.subr.bf16.mxu0 %v720_v6  ;;  %v756_v32 = vld [vmem:[%s937_s1 + $0x84] ss:$8 sps:$4 sm:$0xff]   ;;  %v758_v33 = vld [vmem:[%s937_s1 + $0x80] ss:$8 sps:$4 sm:$0xff]   ;;  %v313_v39 = vsub.s32 1, %v308_v36 }
  0x17   : > { %v305_v38 = vld [vmem:[%s938_s2] sm:$0x3] }
  0x18   : > { %v310_v40 = vrot.slane %v305_v38, %v309_v37  ;;  %v525_v41 = vld [vmem:[%s266_s29] sm:$0xff]  ;;  %v314_v42 = vrot.slane %v305_v38, %v313_v39 }
  0x19   : > { %491 = vmatpush1.bf16.msra.mxu0 %v722_v7  ;;  %v526_v45 = vunpack.c.l.bf16 %v525_v41  ;;  %v527_v46 = vunpack.c.h.bf16 %v525_v41  ;;  %v547_v0 = vld [vmem:[%s940_s4] sm:$0x3] }
  0x1a   : > { %492 = vmatprep.subr.bf16.mxu0 %v723_v8  ;;  %v561_v1 = vld [vmem:[%s941_s5] sm:$0x3]  ;;  %v552_v2 = vrot.slane %v547_v0, %v309_v37  ;;  %v556_v3 = vrot.slane %v547_v0, %v313_v39 }
  0x1b   : > { %v566_v5 = vrot.slane %v561_v1, %v309_v37  ;;  %v570_v6 = vrot.slane %v561_v1, %v313_v39 }
  0x1d   : > { %493 = vmatpush1.bf16.msra.mxu0 %v725_v9 }
  0x1e   : > { %494 = vmatprep.subr.bf16.mxu0 %v726_v10 }
  0x21   : > { %495 = vmatpush1.bf16.msra.mxu0 %v728_v11 }
  0x22   : > { %496 = vmatprep.subr.bf16.mxu0 %v729_v12 }
  0x25   : > { %497 = vmatpush1.bf16.msra.mxu0 %v731_v15 }
  0x26   : > { %498 = vmatprep.subr.bf16.mxu0 %v732_v16 }
  0x29   : > { %499 = vmatpush1.bf16.msra.mxu0 %v734_v17 }
  0x2a   : > { %500 = vmatprep.subr.bf16.mxu0 %v735_v18 }
  0x2d   : > { %501 = vmatpush2.bf16.msra.mxu0 %v737_v19 }
  0x2e   : > { %502 = vmatprep.subr.bf16.mxu0 %v738_v20 }
  0x31   : > { %503 = vmatpush2.bf16.msra.mxu0 %v740_v21 }
  0x32   : > { %504 = vmatprep.subr.bf16.mxu0 %v741_v22 }
  0x35   : > { %505 = vmatpush2.bf16.msra.mxu0 %v743_v23 }
  0x36   : > { %506 = vmatprep.subr.bf16.mxu0 %v744_v24 }
  0x39   : > { %507 = vmatpush2.bf16.msra.mxu0 %v746_v25 }
  0x3a   : > { %508 = vmatprep.subr.bf16.mxu0 %v747_v26 }
  0x3d   : > { %509 = vmatpush2.bf16.msra.mxu0 %v749_v27 }
  0x3e   : > { %510 = vmatprep.subr.bf16.mxu0 %v750_v28 }
  0x41   : > { %511 = vmatpush2.bf16.msra.mxu0 %v752_v29 }
  0x42   : > { %512 = vmatprep.subr.bf16.mxu0 %v753_v30 }
  0x45   : > { %513 = vmatpush2.bf16.msra.mxu0 %v755_v31 }
  0x46   : > { %514 = vmatprep.subr.bf16.mxu0 %v756_v32 }
  0x49   : > { %515 = vmatpush2.bf16.msra.mxu0 %v758_v33 }
  0x4c   : > { %517 = vmatmul.mubr.bf16.vlgmr.msra.gmra.mxu0 %v662_v34 }
 0x10c   : > { %v518_v43 = vpop.f32.mrf.mxu0 }
 0x10d   : > { %v519_v44 = vadd.f32 %v518_v43, %v310_v40 }
 0x10e   : > { %v520_v47 = vpop.f32.mrf.mxu0 }
 0x10f   : > { %v521_v48 = vadd.f32 %v520_v47, %v314_v42  ;;  %v528_v50 = vadd.f32 %v526_v45, %v519_v44 }
 0x110   : > { %v522_v49 = vpop.f32.mrf.mxu0 }
 0x111   : > { %v529_v51 = vadd.f32 %v527_v46, %v521_v48 }
 0x112   : > { %v523_v52 = vpop.f32.mrf.mxu0 }
 0x113   : > { %v530_v53 = vadd.f32 %v529_v51, %v528_v50 }
 0x115   : > { %531 = vadd.xlane.f32.xlu0 %v530_v53 }
 0x19e   : > { %v532_v54 = vpop.xlane.xlu0 %531 }
 0x19f   : > { %v534_v55 = vmul.f32 0.00390625, %v532_v54 }
 0x1a1   : > { %v535_v56 = vsub.f32 %v528_v50, %v534_v55  ;;  %v536_v57 = vsub.f32 %v529_v51, %v534_v55 }
 0x1a3   : > { %v537_v58 = vmul.f32 %v535_v56, %v535_v56  ;;  %v538_v59 = vmul.f32 %v536_v57, %v536_v57 }
 0x1a5   : > { %v539_v60 = vadd.f32 %v538_v59, %v537_v58 }
 0x1a7   : > { %540 = vadd.xlane.f32.xlu0 %v539_v60 }
 0x230   : > { %v541_v61 = vpop.xlane.xlu0 %540 }
 0x231   : > { %v542_v62 = vmul.f32 0.00390625, %v541_v61 }
 0x233   : > { %v543_v63 = vadd.f32 1e-05, %v542_v62 }
 0x235   : > { %761 = vrsqrt.f32 %v543_v63 }
 0x242   : > { %v762_v4 = vpop.eup %761 }
 0x243   : > { %v545_v7 = vmul.f32 %v762_v4, %v535_v56  ;;  %v546_v8 = vmul.f32 %v762_v4, %v536_v57 }
 0x245   : > { %v559_v9 = vmul.f32 %v552_v2, %v545_v7  ;;  %v560_v10 = vmul.f32 %v556_v3, %v546_v8 }
 0x247   : > { %v573_v11 = vadd.f32 %v566_v5, %v559_v9  ;;  %v574_v12 = vadd.f32 %v570_v6, %v560_v10 }
 0x249   : > { %v702_v13 = vpack.c.bf16 %v574_v12, %v573_v11 }
 0x24b   : > { %583 = vst [vmem:[%s271_s11] sm:$0xff] %v702_v13 }
 0x24c PF: > { %s16_s21 = sadd.s32 1, %s769_s21  }
 0x24d   : > { %p13_p4 = scmp.ge.s32.totalorder %s16_s21, 4  }
 0x24f   :  { %15 = sbr.rel (!%p13_p4) target bundleno = 1 (0x1), region = 77 }

// kernel: iia_forward.32
= control target key start
LH: loop header
LB: loop body
LE: loop exit
PB: predicated region body
PF: predicated region fallthrough
CT: control target
= control target key end

     0   :  { %s1290_s12 = smov 0   ;;  %s1618_s0 = inlined_call_operand.vmem [shape: bf16[16,256], index: 0, kind: input, shape index: {}]   ;;  %s1619_s1 = inlined_call_operand.vmem [shape: bf16[256,768], index: 1, kind: input, shape index: {}]   ;;  %s1620_s2 = inlined_call_operand.vmem [shape: f32[1,768], index: 2, kind: input, shape index: {}]   ;;  %s1621_s3 = inlined_call_operand.vmem [shape: bf16[16,768], index: 3, kind: output, shape index: {}]  }
   0x1 LB: > { %s992_s13 = sadd.s32 4294967295, %s1268_s12   ;;  %p996_p0 = scmp.ge.s32.totalorder %s1268_s12, 1  ;;  %s1268_s12 = sphi %s1290_s12, %s13_s12  }
   0x2   : > { %p137_p1 = scmp.lt.s32.totalorder %s1268_s12, 3 }
   0x4   : > { %p138_p2 = pnand %p996_p0, %p137_p1 }
   0x5   : > { %p161_p3 = scmp.lt.s32.totalorder (!%p138_p2), %s992_s13, 1 }
   0x6   : > { %141 = sbr.rel (%p138_p2) target bundleno = 340 (0x154), region = 32 }
   0xb   : > { %v1116_v0 = vld [vmem:[%s1619_s1 + $0x154] ss:$24 sps:$4 sm:$0xff]   ;;  %v1118_v1 = vld [vmem:[%s1619_s1 + $0x150] ss:$24 sps:$4 sm:$0xff]   ;;  %v1119_v2 = vld [vmem:[%s1619_s1 + $0x124] ss:$24 sps:$4 sm:$0xff]  }
   0xc   : > { %787 = vmatprep.subr.bf16.mxu0 %v1116_v0  ;;  %v1121_v3 = vld [vmem:[%s1619_s1 + $0x120] ss:$24 sps:$4 sm:$0xff]   ;;  %v1122_v4 = vld [vmem:[%s1619_s1 + $0xf4] ss:$24 sps:$4 sm:$0xff]   ;;  %v1124_v5 = vld [vmem:[%s1619_s1 + $0xf0] ss:$24 sps:$4 sm:$0xff]  }
   0xd   : > { %788 = vmatpush1.bf16.msra.mxu0 %v1118_v1  ;;  %v1125_v6 = vld [vmem:[%s1619_s1 + $0xc4] ss:$24 sps:$4 sm:$0xff]   ;;  %v1127_v7 = vld [vmem:[%s1619_s1 + $0xc0] ss:$24 sps:$4 sm:$0xff]   ;;  %v1128_v8 = vld [vmem:[%s1619_s1 + $0x94] ss:$24 sps:$4 sm:$0xff]  }
   0xe   : > { %789 = vmatprep.subr.bf16.mxu0 %v1119_v2  ;;  %s1623_s13 = smov (!%p161_p3, %s992_s13), 1  ;;  %v1130_v9 = vld [vmem:[%s1619_s1 + $0x90] ss:$24 sps:$4 sm:$0xff]   ;;  %v1131_v10 = vld [vmem:[%s1619_s1 + $0x64] ss:$24 sps:$4 sm:$0xff]  }
   0xf   : > { %s1103_s9 = sshll.u32 %s1623_s13, 3  ;;  %v1133_v11 = vld [vmem:[%s1619_s1 + $0x60] ss:$24 sps:$4 sm:$0xff]   ;;  %v1134_v12 = vld [vmem:[%s1619_s1 + $0x34] ss:$24 sps:$4 sm:$0xff]   ;;  %s1107_s10 = smul.u32 24, %s1623_s13 }
  0x10   : > { %v1161_v13 = vld [vmem:[%s1619_s1 + $0x15c] ss:$24 sps:$4 sm:$0xff]   ;;  %s165_s20 = scalar_lea.vmem %s1618_s0, %s1103_s9  ;;  %v1163_v14 = vld [vmem:[%s1619_s1 + $0x158] ss:$24 sps:$4 sm:$0xff]   ;;  %v1167_v17 = vld [vmem:[%s1619_s1 + $0x12c] ss:$24 sps:$4 sm:$0xff]  }
  0x11   : > { %790 = vmatpush1.bf16.msra.mxu0 %v1121_v3  ;;  %v1136_v15 = vld [vmem:[%s1619_s1 + $0x30] ss:$24 sps:$4 sm:$0xff]   ;;  %v1137_v16 = vld [vmem:[%s1619_s1 + $0x4] ss:$24 sps:$4 sm:$0xff]   ;;  %828 = vmatprep.subr.bf16.mxu1 %v1161_v13  ;;  %v1139_v21 = vld [vmem:[%s1619_s1] ss:$24 sps:$4 sm:$0xff]   ;;  %s170_s15 = scalar_lea.vmem %s1621_s3, %s1107_s10 }
  0x12   : > { %791 = vmatprep.subr.bf16.mxu0 %v1122_v4  ;;  %829 = vmatpush1.bf16.msra.mxu1 %v1163_v14  ;;  %v1358_v18 = vld [vmem:[%s165_s20] sm:$0xff]  ;;  %v1175_v22 = vld [vmem:[%s1619_s1 + $0xfc] ss:$24 sps:$4 sm:$0xff]   ;;  %v1177_v23 = vld [vmem:[%s1619_s1 + $0xf8] ss:$24 sps:$4 sm:$0xff]  }
  0x13   : > { %v1362_v19 = vcombine.high %v1358_v18, %v1358_v18  ;;  %v1170_v20 = vld [vmem:[%s1619_s1 + $0x128] ss:$24 sps:$4 sm:$0xff]   ;;  %830 = vmatprep.subr.bf16.mxu1 %v1167_v17  ;;  %v1140_v24 = vld [vmem:[%s1619_s1 + $0x2d4] ss:$24 sps:$4 sm:$0xff]   ;;  %v1143_v27 = vld [vmem:[%s1619_s1 + $0x2a4] ss:$24 sps:$4 sm:$0xff]   ;;  %v1482_v58 = vcombine.low %v1358_v18, %v1358_v18 }
  0x14   : > { %v1181_v25 = vld [vmem:[%s1619_s1 + $0xcc] ss:$24 sps:$4 sm:$0xff]   ;;  %v1142_v26 = vld [vmem:[%s1619_s1 + $0x2d0] ss:$24 sps:$4 sm:$0xff]   ;;  %v1187_v29 = vld [vmem:[%s1619_s1 + $0x9c] ss:$24 sps:$4 sm:$0xff]  }
  0x15   : > { %792 = vmatpush1.bf16.msra.mxu0 %v1124_v5  ;;  %819 = vmatprep.mubr.bf16.mxu0 %v1362_v19  ;;  %v1183_v28 = vld [vmem:[%s1619_s1 + $0xc8] ss:$24 sps:$4 sm:$0xff]   ;;  %v1146_v31 = vld [vmem:[%s1619_s1 + $0x274] ss:$24 sps:$4 sm:$0xff]   ;;  %v1189_v32 = vld [vmem:[%s1619_s1 + $0x98] ss:$24 sps:$4 sm:$0xff]  }
  0x16   : > { %793 = vmatprep.subr.bf16.mxu0 %v1125_v6  ;;  %860 = vmatprep.mubr.bf16.mxu1 %v1362_v19  ;;  %v1145_v30 = vld [vmem:[%s1619_s1 + $0x2a0] ss:$24 sps:$4 sm:$0xff]   ;;  %v1193_v33 = vld [vmem:[%s1619_s1 + $0x6c] ss:$24 sps:$4 sm:$0xff]   ;;  %v1148_v34 = vld [vmem:[%s1619_s1 + $0x270] ss:$24 sps:$4 sm:$0xff]  }
  0x17   : > { %831 = vmatpush1.bf16.msra.mxu1 %v1170_v20  ;;  %v1149_v35 = vld [vmem:[%s1619_s1 + $0x244] ss:$24 sps:$4 sm:$0xff]   ;;  %v1195_v36 = vld [vmem:[%s1619_s1 + $0x68] ss:$24 sps:$4 sm:$0xff]   ;;  %v1152_v39 = vld [vmem:[%s1619_s1 + $0x214] ss:$24 sps:$4 sm:$0xff]  }
  0x18   : > { %832 = vmatprep.subr.bf16.mxu1 %v1175_v22  ;;  %v1199_v37 = vld [vmem:[%s1619_s1 + $0x3c] ss:$24 sps:$4 sm:$0xff]   ;;  %v1151_v38 = vld [vmem:[%s1619_s1 + $0x240] ss:$24 sps:$4 sm:$0xff]   ;;  %v1205_v41 = vld [vmem:[%s1619_s1 + $0xc] ss:$24 sps:$4 sm:$0xff]  }
  0x19   : > { %794 = vmatpush1.bf16.msra.mxu0 %v1127_v7  ;;  %v1201_v40 = vld [vmem:[%s1619_s1 + $0x38] ss:$24 sps:$4 sm:$0xff]   ;;  %v1155_v43 = vld [vmem:[%s1619_s1 + $0x1e4] ss:$24 sps:$4 sm:$0xff]   ;;  %v1207_v44 = vld [vmem:[%s1619_s1 + $0x8] ss:$24 sps:$4 sm:$0xff]  }
  0x1a   : > { %795 = vmatprep.subr.bf16.mxu0 %v1128_v8  ;;  %v1154_v42 = vld [vmem:[%s1619_s1 + $0x210] ss:$24 sps:$4 sm:$0xff]   ;;  %v1211_v45 = vld [vmem:[%s1619_s1 + $0x2dc] ss:$24 sps:$4 sm:$0xff]   ;;  %v1157_v46 = vld [vmem:[%s1619_s1 + $0x1e0] ss:$24 sps:$4 sm:$0xff]  }
  0x1b   : > { %833 = vmatpush1.bf16.msra.mxu1 %v1177_v23  ;;  %v1158_v47 = vld [vmem:[%s1619_s1 + $0x1b4] ss:$24 sps:$4 sm:$0xff]   ;;  %v1213_v48 = vld [vmem:[%s1619_s1 + $0x2d8] ss:$24 sps:$4 sm:$0xff]   ;;  %v1164_v51 = vld [vmem:[%s1619_s1 + $0x184] ss:$24 sps:$4 sm:$0xff]  }
  0x1c   : > { %834 = vmatprep.subr.bf16.mxu1 %v1181_v25  ;;  %v1217_v49 = vld [vmem:[%s1619_s1 + $0x2ac] ss:$24 sps:$4 sm:$0xff]   ;;  %v1160_v50 = vld [vmem:[%s1619_s1 + $0x1b0] ss:$24 sps:$4 sm:$0xff]   ;;  %v1223_v53 = vld [vmem:[%s1619_s1 + $0x27c] ss:$24 sps:$4 sm:$0xff]  }
  0x1d   : > { %796 = vmatpush1.bf16.msra.mxu0 %v1130_v9  ;;  %v1219_v52 = vld [vmem:[%s1619_s1 + $0x2a8] ss:$24 sps:$4 sm:$0xff]   ;;  %v1174_v55 = vld [vmem:[%s1619_s1 + $0x164] ss:$24 sps:$4 sm:$0xff]   ;;  %v1225_v56 = vld [vmem:[%s1619_s1 + $0x278] ss:$24 sps:$4 sm:$0xff]  }
  0x1e   : > { %797 = vmatprep.subr.bf16.mxu0 %v1131_v10  ;;  %v1166_v54 = vld [vmem:[%s1619_s1 + $0x180] ss:$24 sps:$4 sm:$0xff]   ;;  %v1229_v57 = vld [vmem:[%s1619_s1 + $0x24c] ss:$24 sps:$4 sm:$0xff]   ;;  %v1235_v62 = vld [vmem:[%s1619_s1 + $0x21c] ss:$24 sps:$4 sm:$0xff]  }
  0x1f   : > { %835 = vmatpush1.bf16.msra.mxu1 %v1183_v28  ;;  %v1172_v59 = vld [vmem:[%s1619_s1 + $0x160] ss:$24 sps:$4 sm:$0xff]   ;;  %v1180_v61 = vld [vmem:[%s1619_s1 + $0x134] ss:$24 sps:$4 sm:$0xff]   ;;  %v1178_v63 = vld [vmem:[%s1619_s1 + $0x130] ss:$24 sps:$4 sm:$0xff]  }
  0x20   : > { %836 = vmatprep.subr.bf16.mxu1 %v1187_v29  ;;  %v1231_v60 = vld [vmem:[%s1619_s1 + $0x248] ss:$24 sps:$4 sm:$0xff]   ;;  %v1237_v0 = vld [vmem:[%s1619_s1 + $0x218] ss:$24 sps:$4 sm:$0xff]   ;;  %v1186_v1 = vld [vmem:[%s1619_s1 + $0x104] ss:$24 sps:$4 sm:$0xff]  }
  0x21   : > { %798 = vmatpush1.bf16.msra.mxu0 %v1133_v11  ;;  %v1241_v2 = vld [vmem:[%s1619_s1 + $0x1ec] ss:$24 sps:$4 sm:$0xff]   ;;  %v1184_v3 = vld [vmem:[%s1619_s1 + $0x100] ss:$24 sps:$4 sm:$0xff]   ;;  %v1247_v6 = vld [vmem:[%s1619_s1 + $0x1bc] ss:$24 sps:$4 sm:$0xff]  }
  0x22   : > { %799 = vmatprep.subr.bf16.mxu0 %v1134_v12  ;;  %v1243_v4 = vld [vmem:[%s1619_s1 + $0x1e8] ss:$24 sps:$4 sm:$0xff]   ;;  %v1192_v5 = vld [vmem:[%s1619_s1 + $0xd4] ss:$24 sps:$4 sm:$0xff]   ;;  %v1249_v8 = vld [vmem:[%s1619_s1 + $0x1b8] ss:$24 sps:$4 sm:$0xff]  }
  0x23   : > { %837 = vmatpush1.bf16.msra.mxu1 %v1189_v32  ;;  %v1190_v7 = vld [vmem:[%s1619_s1 + $0xd0] ss:$24 sps:$4 sm:$0xff]   ;;  %v1198_v9 = vld [vmem:[%s1619_s1 + $0xa4] ss:$24 sps:$4 sm:$0xff]   ;;  %v1196_v11 = vld [vmem:[%s1619_s1 + $0xa0] ss:$24 sps:$4 sm:$0xff]  }
  0x24   : > { %838 = vmatprep.subr.bf16.mxu1 %v1193_v33  ;;  %v1253_v10 = vld [vmem:[%s1619_s1 + $0x18c] ss:$24 sps:$4 sm:$0xff]   ;;  %v1255_v12 = vld [vmem:[%s1619_s1 + $0x188] ss:$24 sps:$4 sm:$0xff]  }
  0x25   : > { %800 = vmatpush1.bf16.msra.mxu0 %v1136_v15  ;;  %v1204_v13 = vld [vmem:[%s1619_s1 + $0x74] ss:$24 sps:$4 sm:$0xff]   ;;  %v1202_v14 = vld [vmem:[%s1619_s1 + $0x70] ss:$24 sps:$4 sm:$0xff]   ;;  %v1210_v15 = vld [vmem:[%s1619_s1 + $0x44] ss:$24 sps:$4 sm:$0xff]  }
  0x26   : > { %801 = vmatprep.subr.bf16.mxu0 %v1137_v16  ;;  %v1208_v16 = vld [vmem:[%s1619_s1 + $0x40] ss:$24 sps:$4 sm:$0xff]   ;;  %v1216_v17 = vld [vmem:[%s1619_s1 + $0x14] ss:$24 sps:$4 sm:$0xff]   ;;  %v1214_v18 = vld [vmem:[%s1619_s1 + $0x10] ss:$24 sps:$4 sm:$0xff]  }
  0x27   : > { %839 = vmatpush1.bf16.msra.mxu1 %v1195_v36  ;;  %v1220_v20 = vld [vmem:[%s1619_s1 + $0x2e0] ss:$24 sps:$4 sm:$0xff]   ;;  %v1226_v22 = vld [vmem:[%s1619_s1 + $0x2b0] ss:$24 sps:$4 sm:$0xff]   ;;  %v1234_v23 = vld [vmem:[%s1619_s1 + $0x284] ss:$24 sps:$4 sm:$0xff]  }
  0x28   : > { %840 = vmatprep.subr.bf16.mxu1 %v1199_v37  ;;  %v1240_v25 = vld [vmem:[%s1619_s1 + $0x254] ss:$24 sps:$4 sm:$0xff]   ;;  %v1244_v28 = vld [vmem:[%s1619_s1 + $0x220] ss:$24 sps:$4 sm:$0xff]  }
  0x29   : > { %802 = vmatpush1.bf16.msra.mxu0 %v1139_v21  ;;  %v1228_v21 = vld [vmem:[%s1619_s1 + $0x2b4] ss:$24 sps:$4 sm:$0xff]   ;;  %v1256_v32 = vld [vmem:[%s1619_s1 + $0x1c0] ss:$24 sps:$4 sm:$0xff]  }
  0x2a   : > { %803 = vmatprep.subr.bf16.mxu0 %v1140_v24  ;;  %v1232_v24 = vld [vmem:[%s1619_s1 + $0x280] ss:$24 sps:$4 sm:$0xff]   ;;  %v1252_v29 = vld [vmem:[%s1619_s1 + $0x1f4] ss:$24 sps:$4 sm:$0xff]  }
  0x2b   : > { %841 = vmatpush1.bf16.msra.mxu1 %v1201_v40  ;;  %v1261_v33 = vld [vmem:[%s1619_s1 + $0x194] ss:$24 sps:$4 sm:$0xff]  }
  0x2c   : > { %842 = vmatprep.subr.bf16.mxu1 %v1205_v41 }
  0x2d   : > { %804 = vmatpush2.bf16.msra.mxu0 %v1142_v26  ;;  %v1238_v26 = vld [vmem:[%s1619_s1 + $0x250] ss:$24 sps:$4 sm:$0xff]  }
  0x2e   : > { %805 = vmatprep.subr.bf16.mxu0 %v1143_v27  ;;  %v1246_v27 = vld [vmem:[%s1619_s1 + $0x224] ss:$24 sps:$4 sm:$0xff]  }
  0x2f   : > { %843 = vmatpush1.bf16.msra.mxu1 %v1207_v44 }
  0x30   : > { %844 = vmatprep.subr.bf16.mxu1 %v1211_v45 }
  0x31   : > { %806 = vmatpush2.bf16.msra.mxu0 %v1145_v30  ;;  %v1250_v30 = vld [vmem:[%s1619_s1 + $0x1f0] ss:$24 sps:$4 sm:$0xff]  }
  0x32   : > { %807 = vmatprep.subr.bf16.mxu0 %v1146_v31  ;;  %v1258_v31 = vld [vmem:[%s1619_s1 + $0x1c4] ss:$24 sps:$4 sm:$0xff]  }
  0x33   : > { %845 = vmatpush2.bf16.msra.mxu1 %v1213_v48 }
  0x34   : > { %846 = vmatprep.subr.bf16.mxu1 %v1217_v49 }
  0x35   : > { %808 = vmatpush2.bf16.msra.mxu0 %v1148_v34  ;;  %v1259_v34 = vld [vmem:[%s1619_s1 + $0x190] ss:$24 sps:$4 sm:$0xff]  }
  0x36   : > { %809 = vmatprep.subr.bf16.mxu0 %v1149_v35  ;;  %v270_v35 = vlaneseq }
  0x37   : > { %847 = vmatpush2.bf16.msra.mxu1 %v1219_v52 }
  0x38   : > { %848 = vmatprep.subr.bf16.mxu1 %v1223_v53  ;;  %v271_v36 = vshrl.u32 %v270_v35, 7 }
  0x39   : > { %810 = vmatpush2.bf16.msra.mxu0 %v1151_v38  ;;  %v268_v38 = vld [vmem:[%s1620_s2] sm:$0x3f] }
  0x3a   : > { %811 = vmatprep.subr.bf16.mxu0 %v1152_v39  ;;  %v288_v37 = vsub.s32 4, %v271_v36  ;;  %v292_v40 = vsub.s32 5, %v271_v36  ;;  %v280_v53 = vsub.s32 2, %v271_v36 }
  0x3b   : > { %849 = vmatpush2.bf16.msra.mxu1 %v1225_v56 }
  0x3c   : > { %850 = vmatprep.subr.bf16.mxu1 %v1229_v57  ;;  %v289_v39 = vrot.slane %v268_v38, %v288_v37  ;;  %v293_v41 = vrot.slane %v268_v38, %v292_v40 }
  0x3d   : > { %812 = vmatpush2.bf16.msra.mxu0 %v1154_v42  ;;  %v272_v42 = vsub.s32 0, %v271_v36 }
  0x3e   : > { %813 = vmatprep.subr.bf16.mxu0 %v1155_v43  ;;  %v276_v43 = vsub.s32 1, %v271_v36 }
  0x3f   : > { %851 = vmatpush2.bf16.msra.mxu1 %v1231_v60  ;;  %v273_v44 = vrot.slane %v268_v38, %v272_v42 }
  0x40   : > { %852 = vmatprep.subr.bf16.mxu1 %v1235_v62  ;;  %v277_v45 = vrot.slane %v268_v38, %v276_v43 }
  0x41   : > { %814 = vmatpush2.bf16.msra.mxu0 %v1157_v46 }
  0x42   : > { %815 = vmatprep.subr.bf16.mxu0 %v1158_v47 }
  0x43   : > { %853 = vmatpush2.bf16.msra.mxu1 %v1237_v0 }
  0x44   : > { %854 = vmatprep.subr.bf16.mxu1 %v1241_v2 }
  0x45   : > { %816 = vmatpush2.bf16.msra.mxu0 %v1160_v50 }
  0x46   : > { %817 = vmatprep.subr.bf16.mxu0 %v1164_v51 }
  0x47   : > { %855 = vmatpush2.bf16.msra.mxu1 %v1243_v4 }
  0x48   : > { %856 = vmatprep.subr.bf16.mxu1 %v1247_v6 }
  0x49   : > { %818 = vmatpush2.bf16.msra.mxu0 %v1166_v54  ;;  %v284_v54 = vsub.s32 3, %v271_v36 }
  0x4a   : > { %869 = vmatprep.subr.bf16.mxu0 %v1174_v55  ;;  %v281_v55 = vrot.slane %v268_v38, %v280_v53 }
  0x4b   : > { %857 = vmatpush2.bf16.msra.mxu1 %v1249_v8  ;;  %v285_v56 = vrot.slane %v268_v38, %v284_v54 }
  0x4c   : > { %820 = vmatmul.mubr.bf16.vlgmr.msra.gmra.mxu0 %v1482_v58  ;;  %858 = vmatprep.subr.bf16.mxu1 %v1253_v10 }
  0x4d   : > { %870 = vmatpush1.bf16.msra.mxu0 %v1172_v59  ;;  %901 = vmatprep.mubr.bf16.mxu0 %v1362_v19  ;;  %v1222_v19 = vld [vmem:[%s1619_s1 + $0x2e4] ss:$24 sps:$4 sm:$0xff]  }
  0x4e   : > { %871 = vmatprep.subr.bf16.mxu0 %v1180_v61 }
  0x4f   : > { %859 = vmatpush2.bf16.msra.mxu1 %v1255_v12 }
  0x51   : > { %872 = vmatpush1.bf16.msra.mxu0 %v1178_v63 }
  0x52   : > { %873 = vmatprep.subr.bf16.mxu0 %v1186_v1  ;;  %861 = vmatmul.mubr.bf16.vlgmr.msra.gmra.mxu1 %v1482_v58 }
  0x55   : > { %874 = vmatpush1.bf16.msra.mxu0 %v1184_v3 }
  0x56   : > { %875 = vmatprep.subr.bf16.mxu0 %v1192_v5 }
  0x59   : > { %876 = vmatpush1.bf16.msra.mxu0 %v1190_v7 }
  0x5a   : > { %877 = vmatprep.subr.bf16.mxu0 %v1198_v9 }
  0x5d   : > { %878 = vmatpush1.bf16.msra.mxu0 %v1196_v11 }
  0x5e   : > { %879 = vmatprep.subr.bf16.mxu0 %v1204_v13 }
  0x61   : > { %880 = vmatpush1.bf16.msra.mxu0 %v1202_v14 }
  0x62   : > { %881 = vmatprep.subr.bf16.mxu0 %v1210_v15 }
  0x65   : > { %882 = vmatpush1.bf16.msra.mxu0 %v1208_v16 }
  0x66   : > { %883 = vmatprep.subr.bf16.mxu0 %v1216_v17 }
  0x69   : > { %884 = vmatpush1.bf16.msra.mxu0 %v1214_v18 }
  0x6a   : > { %885 = vmatprep.subr.bf16.mxu0 %v1222_v19 }
  0x6d   : > { %886 = vmatpush2.bf16.msra.mxu0 %v1220_v20 }
  0x6e   : > { %887 = vmatprep.subr.bf16.mxu0 %v1228_v21 }
  0x71   : > { %888 = vmatpush2.bf16.msra.mxu0 %v1226_v22 }
  0x72   : > { %889 = vmatprep.subr.bf16.mxu0 %v1234_v23 }
  0x75   : > { %890 = vmatpush2.bf16.msra.mxu0 %v1232_v24 }
  0x76   : > { %891 = vmatprep.subr.bf16.mxu0 %v1240_v25 }
  0x79   : > { %892 = vmatpush2.bf16.msra.mxu0 %v1238_v26 }
  0x7a   : > { %893 = vmatprep.subr.bf16.mxu0 %v1246_v27 }
  0x7d   : > { %894 = vmatpush2.bf16.msra.mxu0 %v1244_v28 }
  0x7e   : > { %895 = vmatprep.subr.bf16.mxu0 %v1252_v29 }
  0x81   : > { %896 = vmatpush2.bf16.msra.mxu0 %v1250_v30 }
  0x82   : > { %897 = vmatprep.subr.bf16.mxu0 %v1258_v31 }
  0x85   : > { %898 = vmatpush2.bf16.msra.mxu0 %v1256_v32 }
  0x86   : > { %899 = vmatprep.subr.bf16.mxu0 %v1261_v33 }
  0x89   : > { %900 = vmatpush2.bf16.msra.mxu0 %v1259_v34 }
  0x8c   : > { %902 = vmatmul.mubr.bf16.vlgmr.msra.gmra.mxu0 %v1482_v58 }
 0x10c   : > { %v821_v46 = vpop.f32.mrf.mxu0 }
 0x10d   : > { %v822_v47 = vadd.f32 %v821_v46, %v273_v44 }
 0x10e   : > { %v823_v48 = vpop.f32.mrf.mxu0 }
 0x10f   : > { %v824_v49 = vadd.f32 %v823_v48, %v277_v45 }
 0x110   : > { %v825_v50 = vpop.f32.mrf.mxu0 }
 0x111   : > { %v1104_v51 = vpack.c.bf16 %v824_v49, %v822_v47 }
 0x112   : > { %v826_v52 = vpop.f32.mrf.mxu0  ;;  %v862_v57 = vpop.f32.mrf.mxu1 }
 0x113   : > { %934 = vst [vmem:[%s170_s15] sm:$0xff] %v1104_v51  ;;  %v863_v58 = vadd.f32 %v862_v57, %v281_v55 }
 0x114   : > { %v864_v59 = vpop.f32.mrf.mxu1 }
 0x115   : > { %v865_v60 = vadd.f32 %v864_v59, %v285_v56 }
 0x116   : > { %v866_v61 = vpop.f32.mrf.mxu1 }
 0x117   : > { %v1105_v62 = vpack.c.bf16 %v865_v60, %v863_v58 }
 0x118   : > { %v867_v63 = vpop.f32.mrf.mxu1 }
 0x119   : > { %935 = vst [vmem:[%s170_s15 + $0x8] sm:$0xff] %v1105_v62 }
 0x14c   : > { %v903_v0 = vpop.f32.mrf.mxu0 }
 0x14d   : > { %v904_v2 = vadd.f32 %v903_v0, %v289_v39 }
 0x14e   : > { %v905_v1 = vpop.f32.mrf.mxu0 }
 0x14f   : > { %v906_v3 = vadd.f32 %v905_v1, %v293_v41 }
 0x150   : > { %v907_v4 = vpop.f32.mrf.mxu0 }
 0x151   : > { %v1106_v5 = vpack.c.bf16 %v906_v3, %v904_v2 }
 0x152   : > { %v908_v6 = vpop.f32.mrf.mxu0 }
 0x153   : > { %936 = vst [vmem:[%s170_s15 + $0x10] sm:$0xff] %v1106_v5 }
 0x154 PF: > { %s13_s12 = sadd.s32 1, %s1268_s12  }
 0x155   : > { %p10_p4 = scmp.ge.s32.totalorder %s13_s12, 4  }
 0x157   :  { %12 = sbr.rel (!%p10_p4) target bundleno = 1 (0x1), region = 62 }

// kernel: iia_forward.35
= control target key start
LH: loop header
LB: loop body
LE: loop exit
PB: predicated region body
PF: predicated region fallthrough
CT: control target
= control target key end

     0   :  { %s1955_s24 = smov 0   ;;  %s1957_s25 = smov 0   ;;  %s2415_s0 = inlined_call_operand.vmem [shape: bf16[16,256], index: 0, kind: input, shape index: {}]   ;;  %s2416_s1 = inlined_call_operand.vmem [shape: bf16[256,512], index: 1, kind: input, shape index: {}]   ;;  %s2417_s2 = inlined_call_operand.vmem [shape: f32[1,512], index: 2, kind: input, shape index: {}]   ;;  %s2418_s3 = inlined_call_operand.vmem [shape: bf16[512,256], index: 3, kind: input, shape index: {}]   ;;  %s2419_s4 = inlined_call_operand.vmem [shape: f32[1,256], index: 4, kind: input, shape index: {}]   ;;  %s2420_s5 = inlined_call_operand.vmem [shape: f32[1,256], index: 5, kind: input, shape index: {}]   ;;  %s2421_s6 = inlined_call_operand.vmem [shape: f32[1,256], index: 6, kind: input, shape index: {}]   ;;  %s2422_s7 = inlined_call_operand.vmem [shape: bf16[16,256], index: 7, kind: output, shape index: {}]  }
   0x1   :  { %s1959_s26 = smov 0  }
   0x2 LB: > { %s29_s27 = sadd.s32 1, %s1909_s25  ;;  %p1530_p0 = scmp.ge.s32.totalorder %s1913_s26, 1  ;;  %s1913_s26 = sphi %s1959_s26, %s17_s26   ;;  %s1909_s25 = sphi %s1957_s25, %s2424_s25   ;;  %s1905_s24 = sphi %s1955_s24, %s2423_s24  }
   0x3   : > { %p31_p1 = scmp.ge.s32.totalorder %s29_s27, 2  ;;  %p282_p2 = scmp.lt.s32.totalorder %s1913_s26, 3 }
   0x5   : > { %s2426_s27 = smov (%p31_p1, %s29_s27), 0  ;;  %p283_p3 = pnand %p1530_p0, %p282_p2 }
   0x6   : > { %p329_p4 = scmp.lt.s32.totalorder (!%p283_p3), %s1905_s24, 1 }
   0x7   : > { %286 = sbr.rel (%p283_p3) target bundleno = 793 (0x319), region = 48 }
   0xc   : > { %v1695_v0 = vld [vmem:[%s2416_s1 + $0xe4] ss:$16 sps:$4 sm:$0xff]   ;;  %v1697_v1 = vld [vmem:[%s2416_s1 + $0xec] ss:$16 sps:$4 sm:$0xff]   ;;  %v1699_v2 = vld [vmem:[%s2416_s1 + $0xe0] ss:$16 sps:$4 sm:$0xff]  }
   0xd   : > { %777 = vmatprep.subr.bf16.mxu0 %v1695_v0  ;;  %v1700_v3 = vld [vmem:[%s2416_s1 + $0xe8] ss:$16 sps:$4 sm:$0xff]   ;;  %818 = vmatprep.subr.bf16.mxu1 %v1697_v1  ;;  %v1701_v4 = vld [vmem:[%s2416_s1 + $0xc4] ss:$16 sps:$4 sm:$0xff]   ;;  %v1703_v5 = vld [vmem:[%s2416_s1 + $0xcc] ss:$16 sps:$4 sm:$0xff]  }
   0xe   : > { %778 = vmatpush1.bf16.msra.mxu0 %v1699_v2  ;;  %819 = vmatpush1.bf16.msra.mxu1 %v1700_v3  ;;  %v1705_v6 = vld [vmem:[%s2416_s1 + $0xc0] ss:$16 sps:$4 sm:$0xff]   ;;  %v1706_v7 = vld [vmem:[%s2416_s1 + $0xc8] ss:$16 sps:$4 sm:$0xff]   ;;  %v1707_v8 = vld [vmem:[%s2416_s1 + $0xa4] ss:$16 sps:$4 sm:$0xff]  }
   0xf   : > { %779 = vmatprep.subr.bf16.mxu0 %v1701_v4  ;;  %820 = vmatprep.subr.bf16.mxu1 %v1703_v5  ;;  %v1709_v9 = vld [vmem:[%s2416_s1 + $0xac] ss:$16 sps:$4 sm:$0xff]   ;;  %v1711_v10 = vld [vmem:[%s2416_s1 + $0xa0] ss:$16 sps:$4 sm:$0xff]   ;;  %v1712_v11 = vld [vmem:[%s2416_s1 + $0xa8] ss:$16 sps:$4 sm:$0xff]  }
  0x10   : > { %v1713_v12 = vld [vmem:[%s2416_s1 + $0x84] ss:$16 sps:$4 sm:$0xff]   ;;  %v1715_v13 = vld [vmem:[%s2416_s1 + $0x8c] ss:$16 sps:$4 sm:$0xff]   ;;  %v1717_v14 = vld [vmem:[%s2416_s1 + $0x80] ss:$16 sps:$4 sm:$0xff]  }
  0x11   : > { %v1718_v15 = vld [vmem:[%s2416_s1 + $0x88] ss:$16 sps:$4 sm:$0xff]   ;;  %v1719_v16 = vld [vmem:[%s2416_s1 + $0x64] ss:$16 sps:$4 sm:$0xff]   ;;  %v1721_v17 = vld [vmem:[%s2416_s1 + $0x6c] ss:$16 sps:$4 sm:$0xff]  }
  0x12   : > { %780 = vmatpush1.bf16.msra.mxu0 %v1705_v6  ;;  %821 = vmatpush1.bf16.msra.mxu1 %v1706_v7  ;;  %v1723_v18 = vld [vmem:[%s2416_s1 + $0x60] ss:$16 sps:$4 sm:$0xff]   ;;  %v1724_v19 = vld [vmem:[%s2416_s1 + $0x68] ss:$16 sps:$4 sm:$0xff]   ;;  %v1725_v20 = vld [vmem:[%s2416_s1 + $0x44] ss:$16 sps:$4 sm:$0xff]  }
  0x13   : > { %781 = vmatprep.subr.bf16.mxu0 %v1707_v8  ;;  %822 = vmatprep.subr.bf16.mxu1 %v1709_v9  ;;  %v1727_v21 = vld [vmem:[%s2416_s1 + $0x4c] ss:$16 sps:$4 sm:$0xff]   ;;  %v1729_v22 = vld [vmem:[%s2416_s1 + $0x40] ss:$16 sps:$4 sm:$0xff]   ;;  %v1730_v23 = vld [vmem:[%s2416_s1 + $0x48] ss:$16 sps:$4 sm:$0xff]  }
  0x14   : > { %v1731_v24 = vld [vmem:[%s2416_s1 + $0x24] ss:$16 sps:$4 sm:$0xff]   ;;  %v1733_v25 = vld [vmem:[%s2416_s1 + $0x2c] ss:$16 sps:$4 sm:$0xff]   ;;  %v1735_v26 = vld [vmem:[%s2416_s1 + $0x20] ss:$16 sps:$4 sm:$0xff]  }
  0x15   : > { %v1736_v27 = vld [vmem:[%s2416_s1 + $0x28] ss:$16 sps:$4 sm:$0xff]   ;;  %v1737_v28 = vld [vmem:[%s2416_s1 + $0x4] ss:$16 sps:$4 sm:$0xff]   ;;  %v1739_v29 = vld [vmem:[%s2416_s1 + $0xc] ss:$16 sps:$4 sm:$0xff]  }
  0x16   : > { %782 = vmatpush1.bf16.msra.mxu0 %v1711_v10  ;;  %823 = vmatpush1.bf16.msra.mxu1 %v1712_v11  ;;  %v1741_v30 = vld [vmem:[%s2416_s1] ss:$16 sps:$4 sm:$0xff]   ;;  %v1742_v31 = vld [vmem:[%s2416_s1 + $0x8] ss:$16 sps:$4 sm:$0xff]   ;;  %v1743_v32 = vld [vmem:[%s2416_s1 + $0x1e4] ss:$16 sps:$4 sm:$0xff]  }
  0x17   : > { %783 = vmatprep.subr.bf16.mxu0 %v1713_v12  ;;  %824 = vmatprep.subr.bf16.mxu1 %v1715_v13  ;;  %v1745_v33 = vld [vmem:[%s2416_s1 + $0x1ec] ss:$16 sps:$4 sm:$0xff]   ;;  %v1747_v34 = vld [vmem:[%s2416_s1 + $0x1e0] ss:$16 sps:$4 sm:$0xff]   ;;  %v1748_v35 = vld [vmem:[%s2416_s1 + $0x1e8] ss:$16 sps:$4 sm:$0xff]  }
  0x18   : > { %v1749_v36 = vld [vmem:[%s2416_s1 + $0x1c4] ss:$16 sps:$4 sm:$0xff]   ;;  %s2428_s24 = smov (!%p329_p4, %s1905_s24), 1  ;;  %v1751_v37 = vld [vmem:[%s2416_s1 + $0x1cc] ss:$16 sps:$4 sm:$0xff]  }
  0x19   : > { %v1753_v38 = vld [vmem:[%s2416_s1 + $0x1c0] ss:$16 sps:$4 sm:$0xff]   ;;  %v1754_v39 = vld [vmem:[%s2416_s1 + $0x1c8] ss:$16 sps:$4 sm:$0xff]   ;;  %v1755_v40 = vld [vmem:[%s2416_s1 + $0x1a4] ss:$16 sps:$4 sm:$0xff]  }
  0x1a   : > { %784 = vmatpush1.bf16.msra.mxu0 %v1717_v14  ;;  %825 = vmatpush1.bf16.msra.mxu1 %v1718_v15  ;;  %s1668_s11 = sshll.u32 %s2428_s24, 3  ;;  %v1757_v41 = vld [vmem:[%s2416_s1 + $0x1ac] ss:$16 sps:$4 sm:$0xff]   ;;  %v1759_v42 = vld [vmem:[%s2416_s1 + $0x1a0] ss:$16 sps:$4 sm:$0xff]  }
  0x1b   : > { %785 = vmatprep.subr.bf16.mxu0 %v1719_v16  ;;  %826 = vmatprep.subr.bf16.mxu1 %v1721_v17  ;;  %v1760_v43 = vld [vmem:[%s2416_s1 + $0x1a8] ss:$16 sps:$4 sm:$0xff]   ;;  %s333_s20 = scalar_lea.vmem %s2415_s0, %s1668_s11  ;;  %v1761_v44 = vld [vmem:[%s2416_s1 + $0x184] ss:$16 sps:$4 sm:$0xff]   ;;  %v1763_v45 = vld [vmem:[%s2416_s1 + $0x18c] ss:$16 sps:$4 sm:$0xff]   ;;  %s356_s19 = scalar_lea.vmem %s2422_s7, %s1668_s11 }
  0x1c   : > { %v2123_v46 = vld [vmem:[%s333_s20] sm:$0xff]  ;;  %v1766_v49 = vld [vmem:[%s2416_s1 + $0x188] ss:$16 sps:$4 sm:$0xff]   ;;  %v1769_v51 = vld [vmem:[%s2416_s1 + $0x16c] ss:$16 sps:$4 sm:$0xff]  }
  0x1d   : > { %v1765_v47 = vld [vmem:[%s2416_s1 + $0x180] ss:$16 sps:$4 sm:$0xff]   ;;  %v1536_v48 = vcombine.high %v2123_v46, %v2123_v46  ;;  %v1767_v50 = vld [vmem:[%s2416_s1 + $0x164] ss:$16 sps:$4 sm:$0xff]   ;;  %v1772_v53 = vld [vmem:[%s2416_s1 + $0x168] ss:$16 sps:$4 sm:$0xff]   ;;  %v1535_v4 = vcombine.low %v2123_v46, %v2123_v46 }
  0x1e   : > { %786 = vmatpush1.bf16.msra.mxu0 %v1723_v18  ;;  %827 = vmatpush1.bf16.msra.mxu1 %v1724_v19  ;;  %v1771_v52 = vld [vmem:[%s2416_s1 + $0x160] ss:$16 sps:$4 sm:$0xff]   ;;  %v1773_v54 = vld [vmem:[%s2416_s1 + $0x144] ss:$16 sps:$4 sm:$0xff]   ;;  %v1775_v55 = vld [vmem:[%s2416_s1 + $0x14c] ss:$16 sps:$4 sm:$0xff]  }
  0x1f   : > { %787 = vmatprep.subr.bf16.mxu0 %v1725_v20  ;;  %828 = vmatprep.subr.bf16.mxu1 %v1727_v21  ;;  %v1777_v56 = vld [vmem:[%s2416_s1 + $0x140] ss:$16 sps:$4 sm:$0xff]   ;;  %v1778_v57 = vld [vmem:[%s2416_s1 + $0x148] ss:$16 sps:$4 sm:$0xff]   ;;  %v1779_v58 = vld [vmem:[%s2416_s1 + $0x124] ss:$16 sps:$4 sm:$0xff]  }
  0x20   : > { %809 = vmatprep.mubr.bf16.mxu0 %v1536_v48  ;;  %850 = vmatprep.mubr.bf16.mxu1 %v1536_v48  ;;  %v1781_v59 = vld [vmem:[%s2416_s1 + $0x12c] ss:$16 sps:$4 sm:$0xff]   ;;  %v1783_v60 = vld [vmem:[%s2416_s1 + $0x120] ss:$16 sps:$4 sm:$0xff]   ;;  %v1784_v61 = vld [vmem:[%s2416_s1 + $0x128] ss:$16 sps:$4 sm:$0xff]  }
  0x21   : > { %v1785_v62 = vld [vmem:[%s2416_s1 + $0x104] ss:$16 sps:$4 sm:$0xff]   ;;  %v1787_v63 = vld [vmem:[%s2416_s1 + $0x10c] ss:$16 sps:$4 sm:$0xff]   ;;  %v1789_v0 = vld [vmem:[%s2416_s1 + $0x100] ss:$16 sps:$4 sm:$0xff]  }
  0x22   : > { %788 = vmatpush1.bf16.msra.mxu0 %v1729_v22  ;;  %829 = vmatpush1.bf16.msra.mxu1 %v1730_v23  ;;  %v1790_v1 = vld [vmem:[%s2416_s1 + $0x108] ss:$16 sps:$4 sm:$0xff]   ;;  %v1795_v2 = vld [vmem:[%s2418_s3 + $0x74] ss:$8 sps:$4 sm:$0xff]   ;;  %v1801_v7 = vld [vmem:[%s2418_s3 + $0x64] ss:$8 sps:$4 sm:$0xff]  }
  0x23   : > { %789 = vmatprep.subr.bf16.mxu0 %v1731_v24  ;;  %830 = vmatprep.subr.bf16.mxu1 %v1733_v25  ;;  %v1798_v3 = vld [vmem:[%s2418_s3 + $0x174] ss:$8 sps:$4 sm:$0xff]   ;;  %v1793_v5 = vld [vmem:[%s2418_s3 + $0x70] ss:$8 sps:$4 sm:$0xff]   ;;  %v1804_v8 = vld [vmem:[%s2418_s3 + $0x164] ss:$8 sps:$4 sm:$0xff]  }
  0x24   : > { %v1796_v6 = vld [vmem:[%s2418_s3 + $0x170] ss:$8 sps:$4 sm:$0xff]   ;;  %v1799_v9 = vld [vmem:[%s2418_s3 + $0x60] ss:$8 sps:$4 sm:$0xff]   ;;  %v1807_v11 = vld [vmem:[%s2418_s3 + $0x54] ss:$8 sps:$4 sm:$0xff]  }
  0x25   : > { %v1802_v10 = vld [vmem:[%s2418_s3 + $0x160] ss:$8 sps:$4 sm:$0xff]   ;;  %v1810_v12 = vld [vmem:[%s2418_s3 + $0x154] ss:$8 sps:$4 sm:$0xff]   ;;  %v1805_v13 = vld [vmem:[%s2418_s3 + $0x50] ss:$8 sps:$4 sm:$0xff]  }
  0x26   : > { %790 = vmatpush1.bf16.msra.mxu0 %v1735_v26  ;;  %831 = vmatpush1.bf16.msra.mxu1 %v1736_v27  ;;  %v1808_v14 = vld [vmem:[%s2418_s3 + $0x150] ss:$8 sps:$4 sm:$0xff]   ;;  %v1813_v15 = vld [vmem:[%s2418_s3 + $0x44] ss:$8 sps:$4 sm:$0xff]   ;;  %v1811_v17 = vld [vmem:[%s2418_s3 + $0x40] ss:$8 sps:$4 sm:$0xff]  }
  0x27   : > { %791 = vmatprep.subr.bf16.mxu0 %v1737_v28  ;;  %832 = vmatprep.subr.bf16.mxu1 %v1739_v29  ;;  %v1816_v16 = vld [vmem:[%s2418_s3 + $0x144] ss:$8 sps:$4 sm:$0xff]   ;;  %v1814_v18 = vld [vmem:[%s2418_s3 + $0x140] ss:$8 sps:$4 sm:$0xff]   ;;  %v1819_v19 = vld [vmem:[%s2418_s3 + $0x34] ss:$8 sps:$4 sm:$0xff]  }
  0x28   : > { %v1822_v20 = vld [vmem:[%s2418_s3 + $0x134] ss:$8 sps:$4 sm:$0xff]   ;;  %v1817_v21 = vld [vmem:[%s2418_s3 + $0x30] ss:$8 sps:$4 sm:$0xff]   ;;  %v1825_v23 = vld [vmem:[%s2418_s3 + $0x24] ss:$8 sps:$4 sm:$0xff]  }
  0x29   : > { %v1820_v22 = vld [vmem:[%s2418_s3 + $0x130] ss:$8 sps:$4 sm:$0xff]   ;;  %v1828_v24 = vld [vmem:[%s2418_s3 + $0x124] ss:$8 sps:$4 sm:$0xff]   ;;  %v1823_v25 = vld [vmem:[%s2418_s3 + $0x20] ss:$8 sps:$4 sm:$0xff]  }
  0x2a   : > { %792 = vmatpush1.bf16.msra.mxu0 %v1741_v30  ;;  %833 = vmatpush1.bf16.msra.mxu1 %v1742_v31  ;;  %v1826_v26 = vld [vmem:[%s2418_s3 + $0x120] ss:$8 sps:$4 sm:$0xff]   ;;  %v1831_v27 = vld [vmem:[%s2418_s3 + $0x14] ss:$8 sps:$4 sm:$0xff]   ;;  %v1829_v29 = vld [vmem:[%s2418_s3 + $0x10] ss:$8 sps:$4 sm:$0xff]  }
  0x2b   : > { %793 = vmatprep.subr.bf16.mxu0 %v1743_v32  ;;  %834 = vmatprep.subr.bf16.mxu1 %v1745_v33  ;;  %v1834_v28 = vld [vmem:[%s2418_s3 + $0x114] ss:$8 sps:$4 sm:$0xff]   ;;  %v1832_v30 = vld [vmem:[%s2418_s3 + $0x110] ss:$8 sps:$4 sm:$0xff]   ;;  %v1837_v31 = vld [vmem:[%s2418_s3 + $0x4] ss:$8 sps:$4 sm:$0xff]  }
  0x2c   : > { %v1840_v32 = vld [vmem:[%s2418_s3 + $0x104] ss:$8 sps:$4 sm:$0xff]   ;;  %v1835_v33 = vld [vmem:[%s2418_s3] ss:$8 sps:$4 sm:$0xff]  }
  0x2d   : > { %v1861_v48 = vld [vmem:[%s2418_s3 + $0xc4] ss:$8 sps:$4 sm:$0xff]  }
  0x2e   : > { %794 = vmatpush2.bf16.msra.mxu0 %v1747_v34  ;;  %835 = vmatpush2.bf16.msra.mxu1 %v1748_v35  ;;  %v1838_v34 = vld [vmem:[%s2418_s3 + $0x100] ss:$8 sps:$4 sm:$0xff]   ;;  %v1843_v35 = vld [vmem:[%s2418_s3 + $0xf4] ss:$8 sps:$4 sm:$0xff]  }
  0x2f   : > { %795 = vmatprep.subr.bf16.mxu0 %v1749_v36  ;;  %836 = vmatprep.subr.bf16.mxu1 %v1751_v37  ;;  %v1846_v36 = vld [vmem:[%s2418_s3 + $0x1f4] ss:$8 sps:$4 sm:$0xff]   ;;  %v1841_v37 = vld [vmem:[%s2418_s3 + $0xf0] ss:$8 sps:$4 sm:$0xff]  }
  0x32   : > { %796 = vmatpush2.bf16.msra.mxu0 %v1753_v38  ;;  %837 = vmatpush2.bf16.msra.mxu1 %v1754_v39  ;;  %v1844_v38 = vld [vmem:[%s2418_s3 + $0x1f0] ss:$8 sps:$4 sm:$0xff]   ;;  %v1849_v39 = vld [vmem:[%s2418_s3 + $0xe4] ss:$8 sps:$4 sm:$0xff]  }
  0x33   : > { %797 = vmatprep.subr.bf16.mxu0 %v1755_v40  ;;  %838 = vmatprep.subr.bf16.mxu1 %v1757_v41  ;;  %v1852_v40 = vld [vmem:[%s2418_s3 + $0x1e4] ss:$8 sps:$4 sm:$0xff]   ;;  %v1847_v41 = vld [vmem:[%s2418_s3 + $0xe0] ss:$8 sps:$4 sm:$0xff]  }
  0x36   : > { %798 = vmatpush2.bf16.msra.mxu0 %v1759_v42  ;;  %839 = vmatpush2.bf16.msra.mxu1 %v1760_v43  ;;  %v1850_v42 = vld [vmem:[%s2418_s3 + $0x1e0] ss:$8 sps:$4 sm:$0xff]   ;;  %v1855_v43 = vld [vmem:[%s2418_s3 + $0xd4] ss:$8 sps:$4 sm:$0xff]  }
  0x37   : > { %799 = vmatprep.subr.bf16.mxu0 %v1761_v44  ;;  %840 = vmatprep.subr.bf16.mxu1 %v1763_v45  ;;  %v1858_v44 = vld [vmem:[%s2418_s3 + $0x1d4] ss:$8 sps:$4 sm:$0xff]   ;;  %v1853_v45 = vld [vmem:[%s2418_s3 + $0xd0] ss:$8 sps:$4 sm:$0xff]  }
  0x3a   : > { %800 = vmatpush2.bf16.msra.mxu0 %v1765_v47  ;;  %841 = vmatpush2.bf16.msra.mxu1 %v1766_v49  ;;  %v1856_v47 = vld [vmem:[%s2418_s3 + $0x1d0] ss:$8 sps:$4 sm:$0xff]   ;;  %v1864_v49 = vld [vmem:[%s2418_s3 + $0x1c4] ss:$8 sps:$4 sm:$0xff]  }
  0x3b   : > { %801 = vmatprep.subr.bf16.mxu0 %v1767_v50  ;;  %842 = vmatprep.subr.bf16.mxu1 %v1769_v51  ;;  %v1859_v50 = vld [vmem:[%s2418_s3 + $0xc0] ss:$8 sps:$4 sm:$0xff]  }
  0x3c   : > { %v1862_v51 = vld [vmem:[%s2418_s3 + $0x1c0] ss:$8 sps:$4 sm:$0xff]  }
  0x3e   : > { %802 = vmatpush2.bf16.msra.mxu0 %v1771_v52  ;;  %843 = vmatpush2.bf16.msra.mxu1 %v1772_v53  ;;  %v1867_v52 = vld [vmem:[%s2418_s3 + $0xb4] ss:$8 sps:$4 sm:$0xff]  }
  0x3f   : > { %803 = vmatprep.subr.bf16.mxu0 %v1773_v54  ;;  %844 = vmatprep.subr.bf16.mxu1 %v1775_v55  ;;  %v1870_v53 = vld [vmem:[%s2418_s3 + $0x1b4] ss:$8 sps:$4 sm:$0xff]   ;;  %v1865_v54 = vld [vmem:[%s2418_s3 + $0xb0] ss:$8 sps:$4 sm:$0xff]  }
  0x40   : > { %v1868_v55 = vld [vmem:[%s2418_s3 + $0x1b0] ss:$8 sps:$4 sm:$0xff]  }
  0x42   : > { %804 = vmatpush2.bf16.msra.mxu0 %v1777_v56  ;;  %845 = vmatpush2.bf16.msra.mxu1 %v1778_v57  ;;  %v1873_v56 = vld [vmem:[%s2418_s3 + $0xa4] ss:$8 sps:$4 sm:$0xff]  }
  0x43   : > { %805 = vmatprep.subr.bf16.mxu0 %v1779_v58  ;;  %846 = vmatprep.subr.bf16.mxu1 %v1781_v59  ;;  %v1876_v57 = vld [vmem:[%s2418_s3 + $0x1a4] ss:$8 sps:$4 sm:$0xff]   ;;  %v1871_v58 = vld [vmem:[%s2418_s3 + $0xa0] ss:$8 sps:$4 sm:$0xff]  }
  0x44   : > { %v1874_v59 = vld [vmem:[%s2418_s3 + $0x1a0] ss:$8 sps:$4 sm:$0xff]  }
  0x46   : > { %806 = vmatpush2.bf16.msra.mxu0 %v1783_v60  ;;  %847 = vmatpush2.bf16.msra.mxu1 %v1784_v61  ;;  %v1879_v60 = vld [vmem:[%s2418_s3 + $0x94] ss:$8 sps:$4 sm:$0xff]  }
  0x47   : > { %807 = vmatprep.subr.bf16.mxu0 %v1785_v62  ;;  %848 = vmatprep.subr.bf16.mxu1 %v1787_v63  ;;  %v1882_v61 = vld [vmem:[%s2418_s3 + $0x194] ss:$8 sps:$4 sm:$0xff]   ;;  %v1877_v62 = vld [vmem:[%s2418_s3 + $0x90] ss:$8 sps:$4 sm:$0xff]  }
  0x48   : > { %v1880_v63 = vld [vmem:[%s2418_s3 + $0x190] ss:$8 sps:$4 sm:$0xff]  }
  0x4a   : > { %808 = vmatpush2.bf16.msra.mxu0 %v1789_v0  ;;  %849 = vmatpush2.bf16.msra.mxu1 %v1790_v1  ;;  %v1885_v0 = vld [vmem:[%s2418_s3 + $0x84] ss:$8 sps:$4 sm:$0xff]  }
  0x4b   : > { %1253 = vmatprep.subr.bf16.mxu0 %v1795_v2  ;;  %1294 = vmatprep.subr.bf16.mxu1 %v1798_v3  ;;  %v1888_v1 = vld [vmem:[%s2418_s3 + $0x184] ss:$8 sps:$4 sm:$0xff]   ;;  %v1883_v2 = vld [vmem:[%s2418_s3 + $0x80] ss:$8 sps:$4 sm:$0xff]  }
  0x4c   : > { %v1886_v3 = vld [vmem:[%s2418_s3 + $0x180] ss:$8 sps:$4 sm:$0xff]  }
  0x4d   : > { %810 = vmatmul.mubr.bf16.vlgmr.msra.gmra.mxu0 %v1535_v4  ;;  %851 = vmatmul.mubr.bf16.vlgmr.msra.gmra.mxu1 %v1535_v4  ;;  %v430_v4 = vlaneseq }
  0x4e   : > { %1254 = vmatpush1.bf16.msra.mxu0 %v1793_v5  ;;  %1295 = vmatpush1.bf16.msra.mxu1 %v1796_v6 }
  0x4f   : > { %1255 = vmatprep.subr.bf16.mxu0 %v1801_v7  ;;  %1296 = vmatprep.subr.bf16.mxu1 %v1804_v8  ;;  %v431_v5 = vshrl.u32 %v430_v4, 7  ;;  %v428_v8 = vld [vmem:[%s2417_s2] sm:$0xf] }
  0x51   : > { %v2375_v6 = vsub.s32 0, %v431_v5  ;;  %v440_v7 = vsub.s32 2, %v431_v5 }
  0x52   : > { %1256 = vmatpush1.bf16.msra.mxu0 %v1799_v9  ;;  %1297 = vmatpush1.bf16.msra.mxu1 %v1802_v10  ;;  %v2380_v9 = vsub.s32 1, %v431_v5  ;;  %v444_v10 = vsub.s32 3, %v431_v5 }
  0x53   : > { %1257 = vmatprep.subr.bf16.mxu0 %v1807_v11  ;;  %1298 = vmatprep.subr.bf16.mxu1 %v1810_v12  ;;  %v433_v11 = vrot.slane %v428_v8, %v2375_v6  ;;  %v441_v12 = vrot.slane %v428_v8, %v440_v7 }
  0x56   : > { %1258 = vmatpush1.bf16.msra.mxu0 %v1805_v13  ;;  %1299 = vmatpush1.bf16.msra.mxu1 %v1808_v14  ;;  %v437_v13 = vrot.slane %v428_v8, %v2380_v9  ;;  %v445_v14 = vrot.slane %v428_v8, %v444_v10 }
  0x57   : > { %1259 = vmatprep.subr.bf16.mxu0 %v1813_v15  ;;  %1300 = vmatprep.subr.bf16.mxu1 %v1816_v16 }
  0x5a   : > { %1260 = vmatpush1.bf16.msra.mxu0 %v1811_v17  ;;  %1301 = vmatpush1.bf16.msra.mxu1 %v1814_v18 }
  0x5b   : > { %1261 = vmatprep.subr.bf16.mxu0 %v1819_v19  ;;  %1302 = vmatprep.subr.bf16.mxu1 %v1822_v20 }
  0x5e   : > { %1262 = vmatpush1.bf16.msra.mxu0 %v1817_v21  ;;  %1303 = vmatpush1.bf16.msra.mxu1 %v1820_v22 }
  0x5f   : > { %1263 = vmatprep.subr.bf16.mxu0 %v1825_v23  ;;  %1304 = vmatprep.subr.bf16.mxu1 %v1828_v24 }
  0x62   : > { %1264 = vmatpush1.bf16.msra.mxu0 %v1823_v25  ;;  %1305 = vmatpush1.bf16.msra.mxu1 %v1826_v26 }
  0x63   : > { %1265 = vmatprep.subr.bf16.mxu0 %v1831_v27  ;;  %1306 = vmatprep.subr.bf16.mxu1 %v1834_v28 }
  0x66   : > { %1266 = vmatpush1.bf16.msra.mxu0 %v1829_v29  ;;  %1307 = vmatpush1.bf16.msra.mxu1 %v1832_v30 }
  0x67   : > { %1267 = vmatprep.subr.bf16.mxu0 %v1837_v31  ;;  %1308 = vmatprep.subr.bf16.mxu1 %v1840_v32 }
  0x6a   : > { %1268 = vmatpush1.bf16.msra.mxu0 %v1835_v33  ;;  %1309 = vmatpush1.bf16.msra.mxu1 %v1838_v34 }
  0x6b   : > { %1269 = vmatprep.subr.bf16.mxu0 %v1843_v35  ;;  %1310 = vmatprep.subr.bf16.mxu1 %v1846_v36  ;;  %v1344_v35 = vld [vmem:[%s2419_s4] sm:$0x3] }
  0x6c   : > { %v1349_v36 = vrot.slane %v1344_v35, %v2375_v6 }
  0x6e   : > { %1270 = vmatpush2.bf16.msra.mxu0 %v1841_v37  ;;  %1311 = vmatpush2.bf16.msra.mxu1 %v1844_v38 }
  0x6f   : > { %1271 = vmatprep.subr.bf16.mxu0 %v1849_v39  ;;  %1312 = vmatprep.subr.bf16.mxu1 %v1852_v40  ;;  %v1353_v40 = vrot.slane %v1344_v35, %v2380_v9 }
  0x72   : > { %1272 = vmatpush2.bf16.msra.mxu0 %v1847_v41  ;;  %1313 = vmatpush2.bf16.msra.mxu1 %v1850_v42 }
  0x73   : > { %1273 = vmatprep.subr.bf16.mxu0 %v1855_v43  ;;  %1314 = vmatprep.subr.bf16.mxu1 %v1858_v44 }
  0x76   : > { %1274 = vmatpush2.bf16.msra.mxu0 %v1853_v45  ;;  %1315 = vmatpush2.bf16.msra.mxu1 %v1856_v47  ;;  %v1359_v45 = vunpack.c.l.bf16 %v2123_v46  ;;  %v1360_v47 = vunpack.c.h.bf16 %v2123_v46 }
  0x77   : > { %1275 = vmatprep.subr.bf16.mxu0 %v1861_v48  ;;  %1316 = vmatprep.subr.bf16.mxu1 %v1864_v49 }
  0x7a   : > { %1276 = vmatpush2.bf16.msra.mxu0 %v1859_v50  ;;  %1317 = vmatpush2.bf16.msra.mxu1 %v1862_v51 }
  0x7b   : > { %1277 = vmatprep.subr.bf16.mxu0 %v1867_v52  ;;  %1318 = vmatprep.subr.bf16.mxu1 %v1870_v53 }
  0x7e   : > { %1278 = vmatpush2.bf16.msra.mxu0 %v1865_v54  ;;  %1319 = vmatpush2.bf16.msra.mxu1 %v1868_v55 }
  0x7f   : > { %1279 = vmatprep.subr.bf16.mxu0 %v1873_v56  ;;  %1320 = vmatprep.subr.bf16.mxu1 %v1876_v57 }
  0x82   : > { %1280 = vmatpush2.bf16.msra.mxu0 %v1871_v58  ;;  %1321 = vmatpush2.bf16.msra.mxu1 %v1874_v59 }
  0x83   : > { %1281 = vmatprep.subr.bf16.mxu0 %v1879_v60  ;;  %1322 = vmatprep.subr.bf16.mxu1 %v1882_v61 }
  0x86   : > { %1282 = vmatpush2.bf16.msra.mxu0 %v1877_v62  ;;  %1323 = vmatpush2.bf16.msra.mxu1 %v1880_v63 }
  0x87   : > { %1283 = vmatprep.subr.bf16.mxu0 %v1885_v0  ;;  %1324 = vmatprep.subr.bf16.mxu1 %v1888_v1  ;;  %v1380_v1 = vld [vmem:[%s2420_s5] sm:$0x3] }
  0x88   : > { %v1389_v4 = vrot.slane %v1380_v1, %v2380_v9 }
  0x8a   : > { %1284 = vmatpush2.bf16.msra.mxu0 %v1883_v2  ;;  %1325 = vmatpush2.bf16.msra.mxu1 %v1886_v3  ;;  %v1394_v2 = vld [vmem:[%s2421_s6] sm:$0x3]  ;;  %v1385_v3 = vrot.slane %v1380_v1, %v2375_v6 }
  0x8b   : > { %v1399_v7 = vrot.slane %v1394_v2, %v2375_v6  ;;  %v1403_v8 = vrot.slane %v1394_v2, %v2380_v9 }
 0x10d   : > { %v811_v15 = vpop.f32.mrf.mxu0  ;;  %v852_v16 = vpop.f32.mrf.mxu1 }
 0x10e   : > { %v812_v17 = vadd.f32 %v811_v15, %v433_v11  ;;  %v853_v18 = vadd.f32 %v852_v16, %v441_v12 }
 0x10f   : > { %v813_v19 = vpop.f32.mrf.mxu0  ;;  %v854_v20 = vpop.f32.mrf.mxu1 }
 0x110   : > { %v814_v21 = vadd.f32 %v813_v19, %v437_v13  ;;  %v855_v22 = vadd.f32 %v854_v20, %v445_v14  ;;  %v859_v23 = vmax.f32 %v812_v17, 0.0  ;;  %v861_v24 = vmax.f32 %v853_v18, 0.0 }
 0x111   : > { %v815_v25 = vpop.f32.mrf.mxu0  ;;  %v856_v26 = vpop.f32.mrf.mxu1 }
 0x112   : > { %v860_v27 = vmax.f32 %v814_v21, 0.0  ;;  %v862_v28 = vmax.f32 %v855_v22, 0.0  ;;  %v865_v33 = vpack.c.bf16 %v859_v23, %v859_v23  ;;  %v867_v34 = vpack.c.bf16 %v861_v24, %v861_v24 }
 0x113   : > { %v816_v29 = vpop.f32.mrf.mxu0  ;;  %v857_v30 = vpop.f32.mrf.mxu1 }
 0x114   : > { %v866_v31 = vpack.c.bf16 %v860_v27, %v860_v27  ;;  %v868_v32 = vpack.c.bf16 %v862_v28, %v862_v28 }
 0x116   : > { %1285 = vmatprep.mubr.bf16.mxu0 %v866_v31  ;;  %1326 = vmatprep.mubr.bf16.mxu1 %v868_v32 }
 0x117   : > { %1286 = vmatmul.mubr.bf16.vlgmr.msra.gmra.mxu0 %v865_v33  ;;  %1327 = vmatmul.mubr.bf16.vlgmr.msra.gmra.mxu1 %v867_v34 }
 0x1d7   : > { %v1287_v37 = vpop.f32.mrf.mxu0  ;;  %v1328_v38 = vpop.f32.mrf.mxu1 }
 0x1d8   : > { %v1329_v39 = vadd.f32 %v1328_v38, %v1287_v37 }
 0x1d9   : > { %v1289_v41 = vpop.f32.mrf.mxu0  ;;  %v1330_v42 = vpop.f32.mrf.mxu1 }
 0x1da   : > { %v1356_v43 = vadd.f32 %v1349_v36, %v1329_v39  ;;  %v1331_v44 = vadd.f32 %v1330_v42, %v1289_v41 }
 0x1db   : > { %v1291_v48 = vpop.f32.mrf.mxu0  ;;  %v1332_v49 = vpop.f32.mrf.mxu1 }
 0x1dc   : > { %v1357_v50 = vadd.f32 %v1353_v40, %v1331_v44  ;;  %v1361_v53 = vadd.f32 %v1359_v45, %v1356_v43 }
 0x1dd   : > { %v1292_v51 = vpop.f32.mrf.mxu0  ;;  %v1333_v52 = vpop.f32.mrf.mxu1 }
 0x1de   : > { %v1362_v54 = vadd.f32 %v1360_v47, %v1357_v50 }
 0x1e0   : > { %v1363_v55 = vadd.f32 %v1362_v54, %v1361_v53 }
 0x1e2   : > { %1364 = vadd.xlane.f32.xlu0 %v1363_v55 }
 0x26b   : > { %v1365_v56 = vpop.xlane.xlu0 %1364 }
 0x26c   : > { %v1367_v57 = vmul.f32 0.00390625, %v1365_v56 }
 0x26e   : > { %v1368_v58 = vsub.f32 %v1361_v53, %v1367_v57  ;;  %v1369_v59 = vsub.f32 %v1362_v54, %v1367_v57 }
 0x270   : > { %v1370_v60 = vmul.f32 %v1368_v58, %v1368_v58  ;;  %v1371_v61 = vmul.f32 %v1369_v59, %v1369_v59 }
 0x272   : > { %v1372_v62 = vadd.f32 %v1371_v61, %v1370_v60 }
 0x274   : > { %1373 = vadd.xlane.f32.xlu0 %v1372_v62 }
 0x2fd   : > { %v1374_v63 = vpop.xlane.xlu0 %1373 }
 0x2fe   : > { %v1375_v0 = vmul.f32 0.00390625, %v1374_v63 }
 0x300   : > { %v1376_v46 = vadd.f32 1e-05, %v1375_v0 }
 0x302   : > { %1889 = vrsqrt.f32 %v1376_v46 }
 0x30f   : > { %v1890_v5 = vpop.eup %1889 }
 0x310   : > { %v1378_v10 = vmul.f32 %v1890_v5, %v1368_v58  ;;  %v1379_v11 = vmul.f32 %v1890_v5, %v1369_v59 }
 0x312   : > { %v1392_v12 = vmul.f32 %v1385_v3, %v1378_v10  ;;  %v1393_v13 = vmul.f32 %v1389_v4, %v1379_v11 }
 0x314   : > { %v1406_v14 = vadd.f32 %v1399_v7, %v1392_v12  ;;  %v1407_v15 = vadd.f32 %v1403_v8, %v1393_v13 }
 0x316   : > { %v1670_v16 = vpack.c.bf16 %v1407_v15, %v1406_v14 }
 0x318   : > { %1416 = vst [vmem:[%s356_s19] sm:$0xff] %v1670_v16 }
 0x319 PF: > { %s17_s26 = sadd.s32 1, %s1913_s26   ;;  %s2423_s24 = smov %s1909_s25 }
 0x31a   : > { %p14_p5 = scmp.ge.s32.totalorder %s17_s26, 4   ;;  %s2424_s25 = smov %s2426_s27 }
 0x31c   :  { %16 = sbr.rel (!%p14_p5) target bundleno = 2 (0x2), region = 95 }

// kernel: iia_forward.40
= control target key start
LH: loop header
LB: loop body
LE: loop exit
PB: predicated region body
PF: predicated region fallthrough
CT: control target
= control target key end

     0   :  { %s957_s12 = smov 0   ;;  %s1177_s0 = inlined_call_operand.vmem [shape: bf16[16,256], index: 0, kind: input, shape index: {}]   ;;  %s1178_s1 = inlined_call_operand.vmem [shape: bf16[256,512], index: 1, kind: input, shape index: {}]   ;;  %s1179_s2 = inlined_call_operand.vmem [shape: f32[1,512], index: 2, kind: input, shape index: {}]   ;;  %s1180_s3 = inlined_call_operand.vmem [shape: bf16[16,512], index: 3, kind: output, shape index: {}]  }
   0x1 LB: > { %s740_s13 = sadd.s32 4294967295, %s935_s12   ;;  %p744_p0 = scmp.ge.s32.totalorder %s935_s12, 1  ;;  %s935_s12 = sphi %s957_s12, %s13_s12  }
   0x2   : > { %p137_p1 = scmp.lt.s32.totalorder %s935_s12, 3 }
   0x4   : > { %p138_p2 = pnand %p744_p0, %p137_p1 }
   0x5   : > { %p161_p3 = scmp.lt.s32.totalorder (!%p138_p2), %s740_s13, 1 }
   0x6   : > { %141 = sbr.rel (%p138_p2) target bundleno = 276 (0x114), region = 32 }
   0xb   : > { %v831_v0 = vld [vmem:[%s1178_s1 + $0xe4] ss:$16 sps:$4 sm:$0xff]   ;;  %v833_v1 = vld [vmem:[%s1178_s1 + $0xec] ss:$16 sps:$4 sm:$0xff]   ;;  %v835_v2 = vld [vmem:[%s1178_s1 + $0xe0] ss:$16 sps:$4 sm:$0xff]  }
   0xc   : > { %585 = vmatprep.subr.bf16.mxu0 %v831_v0  ;;  %v836_v3 = vld [vmem:[%s1178_s1 + $0xe8] ss:$16 sps:$4 sm:$0xff]   ;;  %626 = vmatprep.subr.bf16.mxu1 %v833_v1  ;;  %v837_v4 = vld [vmem:[%s1178_s1 + $0xc4] ss:$16 sps:$4 sm:$0xff]   ;;  %v839_v5 = vld [vmem:[%s1178_s1 + $0xcc] ss:$16 sps:$4 sm:$0xff]  }
   0xd   : > { %586 = vmatpush1.bf16.msra.mxu0 %v835_v2  ;;  %627 = vmatpush1.bf16.msra.mxu1 %v836_v3  ;;  %v841_v6 = vld [vmem:[%s1178_s1 + $0xc0] ss:$16 sps:$4 sm:$0xff]   ;;  %v842_v7 = vld [vmem:[%s1178_s1 + $0xc8] ss:$16 sps:$4 sm:$0xff]   ;;  %v843_v8 = vld [vmem:[%s1178_s1 + $0xa4] ss:$16 sps:$4 sm:$0xff]   ;;  %v238_v3 = vlaneseq }
   0xe   : > { %587 = vmatprep.subr.bf16.mxu0 %v837_v4  ;;  %628 = vmatprep.subr.bf16.mxu1 %v839_v5  ;;  %v845_v9 = vld [vmem:[%s1178_s1 + $0xac] ss:$16 sps:$4 sm:$0xff]   ;;  %v847_v10 = vld [vmem:[%s1178_s1 + $0xa0] ss:$16 sps:$4 sm:$0xff]   ;;  %v848_v11 = vld [vmem:[%s1178_s1 + $0xa8] ss:$16 sps:$4 sm:$0xff]  }
   0xf   : > { %v849_v12 = vld [vmem:[%s1178_s1 + $0x84] ss:$16 sps:$4 sm:$0xff]   ;;  %v851_v13 = vld [vmem:[%s1178_s1 + $0x8c] ss:$16 sps:$4 sm:$0xff]   ;;  %v853_v14 = vld [vmem:[%s1178_s1 + $0x80] ss:$16 sps:$4 sm:$0xff]  }
  0x10   : > { %v854_v15 = vld [vmem:[%s1178_s1 + $0x88] ss:$16 sps:$4 sm:$0xff]   ;;  %v855_v16 = vld [vmem:[%s1178_s1 + $0x64] ss:$16 sps:$4 sm:$0xff]   ;;  %v857_v17 = vld [vmem:[%s1178_s1 + $0x6c] ss:$16 sps:$4 sm:$0xff]  }
  0x11   : > { %588 = vmatpush1.bf16.msra.mxu0 %v841_v6  ;;  %629 = vmatpush1.bf16.msra.mxu1 %v842_v7  ;;  %v859_v18 = vld [vmem:[%s1178_s1 + $0x60] ss:$16 sps:$4 sm:$0xff]   ;;  %v860_v19 = vld [vmem:[%s1178_s1 + $0x68] ss:$16 sps:$4 sm:$0xff]   ;;  %v861_v20 = vld [vmem:[%s1178_s1 + $0x44] ss:$16 sps:$4 sm:$0xff]  }
  0x12   : > { %589 = vmatprep.subr.bf16.mxu0 %v843_v8  ;;  %630 = vmatprep.subr.bf16.mxu1 %v845_v9  ;;  %v863_v21 = vld [vmem:[%s1178_s1 + $0x4c] ss:$16 sps:$4 sm:$0xff]   ;;  %v865_v22 = vld [vmem:[%s1178_s1 + $0x40] ss:$16 sps:$4 sm:$0xff]   ;;  %v866_v23 = vld [vmem:[%s1178_s1 + $0x48] ss:$16 sps:$4 sm:$0xff]  }
  0x13   : > { %v867_v24 = vld [vmem:[%s1178_s1 + $0x24] ss:$16 sps:$4 sm:$0xff]   ;;  %v869_v25 = vld [vmem:[%s1178_s1 + $0x2c] ss:$16 sps:$4 sm:$0xff]   ;;  %v871_v26 = vld [vmem:[%s1178_s1 + $0x20] ss:$16 sps:$4 sm:$0xff]  }
  0x14   : > { %v872_v27 = vld [vmem:[%s1178_s1 + $0x28] ss:$16 sps:$4 sm:$0xff]   ;;  %v873_v28 = vld [vmem:[%s1178_s1 + $0x4] ss:$16 sps:$4 sm:$0xff]   ;;  %v875_v29 = vld [vmem:[%s1178_s1 + $0xc] ss:$16 sps:$4 sm:$0xff]  }
  0x15   : > { %590 = vmatpush1.bf16.msra.mxu0 %v847_v10  ;;  %631 = vmatpush1.bf16.msra.mxu1 %v848_v11  ;;  %v877_v30 = vld [vmem:[%s1178_s1] ss:$16 sps:$4 sm:$0xff]   ;;  %v878_v31 = vld [vmem:[%s1178_s1 + $0x8] ss:$16 sps:$4 sm:$0xff]   ;;  %v879_v32 = vld [vmem:[%s1178_s1 + $0x1e4] ss:$16 sps:$4 sm:$0xff]  }
  0x16   : > { %591 = vmatprep.subr.bf16.mxu0 %v849_v12  ;;  %632 = vmatprep.subr.bf16.mxu1 %v851_v13  ;;  %v881_v33 = vld [vmem:[%s1178_s1 + $0x1ec] ss:$16 sps:$4 sm:$0xff]   ;;  %v883_v34 = vld [vmem:[%s1178_s1 + $0x1e0] ss:$16 sps:$4 sm:$0xff]   ;;  %v884_v35 = vld [vmem:[%s1178_s1 + $0x1e8] ss:$16 sps:$4 sm:$0xff]  }
  0x17   : > { %v885_v36 = vld [vmem:[%s1178_s1 + $0x1c4] ss:$16 sps:$4 sm:$0xff]   ;;  %s1182_s13 = smov (!%p161_p3, %s740_s13), 1  ;;  %v887_v37 = vld [vmem:[%s1178_s1 + $0x1cc] ss:$16 sps:$4 sm:$0xff]   ;;  %v239_v4 = vshrl.u32 %v238_v3, 7 }
  0x18   : > { %v889_v38 = vld [vmem:[%s1178_s1 + $0x1c0] ss:$16 sps:$4 sm:$0xff]   ;;  %v890_v39 = vld [vmem:[%s1178_s1 + $0x1c8] ss:$16 sps:$4 sm:$0xff]   ;;  %v891_v40 = vld [vmem:[%s1178_s1 + $0x1a4] ss:$16 sps:$4 sm:$0xff]  }
  0x19   : > { %592 = vmatpush1.bf16.msra.mxu0 %v853_v14  ;;  %633 = vmatpush1.bf16.msra.mxu1 %v854_v15  ;;  %s819_s21 = sshll.u32 %s1182_s13, 3  ;;  %v893_v41 = vld [vmem:[%s1178_s1 + $0x1ac] ss:$16 sps:$4 sm:$0xff]   ;;  %v895_v42 = vld [vmem:[%s1178_s1 + $0x1a0] ss:$16 sps:$4 sm:$0xff]   ;;  %v240_v5 = vsub.s32 0, %v239_v4 }
  0x1a   : > { %593 = vmatprep.subr.bf16.mxu0 %v855_v16  ;;  %634 = vmatprep.subr.bf16.mxu1 %v857_v17  ;;  %v896_v43 = vld [vmem:[%s1178_s1 + $0x1a8] ss:$16 sps:$4 sm:$0xff]   ;;  %s165_s30 = scalar_lea.vmem %s1177_s0, %s819_s21  ;;  %v897_v44 = vld [vmem:[%s1178_s1 + $0x184] ss:$16 sps:$4 sm:$0xff]   ;;  %v899_v45 = vld [vmem:[%s1178_s1 + $0x18c] ss:$16 sps:$4 sm:$0xff]  }
  0x1b   : > { %v171_v46 = vld [vmem:[%s165_s30] sm:$0xff]  ;;  %v902_v49 = vld [vmem:[%s1178_s1 + $0x188] ss:$16 sps:$4 sm:$0xff]   ;;  %v905_v51 = vld [vmem:[%s1178_s1 + $0x16c] ss:$16 sps:$4 sm:$0xff]   ;;  %v248_v6 = vsub.s32 2, %v239_v4 }
  0x1c   : > { %v750_v47 = vcombine.high %v171_v46, %v171_v46  ;;  %v901_v48 = vld [vmem:[%s1178_s1 + $0x180] ss:$16 sps:$4 sm:$0xff]   ;;  %v903_v50 = vld [vmem:[%s1178_s1 + $0x164] ss:$16 sps:$4 sm:$0xff]   ;;  %v908_v53 = vld [vmem:[%s1178_s1 + $0x168] ss:$16 sps:$4 sm:$0xff]   ;;  %v749_v2 = vcombine.low %v171_v46, %v171_v46 }
  0x1d   : > { %594 = vmatpush1.bf16.msra.mxu0 %v859_v18  ;;  %635 = vmatpush1.bf16.msra.mxu1 %v860_v19  ;;  %v907_v52 = vld [vmem:[%s1178_s1 + $0x160] ss:$16 sps:$4 sm:$0xff]   ;;  %v909_v54 = vld [vmem:[%s1178_s1 + $0x144] ss:$16 sps:$4 sm:$0xff]   ;;  %v911_v55 = vld [vmem:[%s1178_s1 + $0x14c] ss:$16 sps:$4 sm:$0xff]  }
  0x1e   : > { %595 = vmatprep.subr.bf16.mxu0 %v861_v20  ;;  %636 = vmatprep.subr.bf16.mxu1 %v863_v21  ;;  %v913_v56 = vld [vmem:[%s1178_s1 + $0x140] ss:$16 sps:$4 sm:$0xff]   ;;  %v914_v57 = vld [vmem:[%s1178_s1 + $0x148] ss:$16 sps:$4 sm:$0xff]   ;;  %v915_v58 = vld [vmem:[%s1178_s1 + $0x124] ss:$16 sps:$4 sm:$0xff]  }
  0x1f   : > { %617 = vmatprep.mubr.bf16.mxu0 %v750_v47  ;;  %658 = vmatprep.mubr.bf16.mxu1 %v750_v47  ;;  %v917_v59 = vld [vmem:[%s1178_s1 + $0x12c] ss:$16 sps:$4 sm:$0xff]   ;;  %v919_v60 = vld [vmem:[%s1178_s1 + $0x120] ss:$16 sps:$4 sm:$0xff]   ;;  %v920_v61 = vld [vmem:[%s1178_s1 + $0x128] ss:$16 sps:$4 sm:$0xff]  }
  0x20   : > { %v921_v62 = vld [vmem:[%s1178_s1 + $0x104] ss:$16 sps:$4 sm:$0xff]   ;;  %v923_v63 = vld [vmem:[%s1178_s1 + $0x10c] ss:$16 sps:$4 sm:$0xff]   ;;  %v925_v0 = vld [vmem:[%s1178_s1 + $0x100] ss:$16 sps:$4 sm:$0xff]  }
  0x21   : > { %596 = vmatpush1.bf16.msra.mxu0 %v865_v22  ;;  %637 = vmatpush1.bf16.msra.mxu1 %v866_v23  ;;  %v926_v1 = vld [vmem:[%s1178_s1 + $0x108] ss:$16 sps:$4 sm:$0xff]   ;;  %v244_v7 = vsub.s32 1, %v239_v4  ;;  %v252_v8 = vsub.s32 3, %v239_v4  ;;  %v236_v9 = vld [vmem:[%s1179_s2] sm:$0xf] }
  0x22   : > { %597 = vmatprep.subr.bf16.mxu0 %v867_v24  ;;  %638 = vmatprep.subr.bf16.mxu1 %v869_v25  ;;  %v241_v10 = vrot.slane %v236_v9, %v240_v5  ;;  %v249_v11 = vrot.slane %v236_v9, %v248_v6  ;;  %s820_s23 = sshll.u32 %s1182_s13, 4 }
  0x23   : > { %v245_v12 = vrot.slane %v236_v9, %v244_v7  ;;  %v253_v13 = vrot.slane %v236_v9, %v252_v8  ;;  %s170_s26 = scalar_lea.vmem %s1180_s3, %s820_s23 }
  0x25   : > { %598 = vmatpush1.bf16.msra.mxu0 %v871_v26  ;;  %639 = vmatpush1.bf16.msra.mxu1 %v872_v27 }
  0x26   : > { %599 = vmatprep.subr.bf16.mxu0 %v873_v28  ;;  %640 = vmatprep.subr.bf16.mxu1 %v875_v29 }
  0x29   : > { %600 = vmatpush1.bf16.msra.mxu0 %v877_v30  ;;  %641 = vmatpush1.bf16.msra.mxu1 %v878_v31 }
  0x2a   : > { %601 = vmatprep.subr.bf16.mxu0 %v879_v32  ;;  %642 = vmatprep.subr.bf16.mxu1 %v881_v33 }
  0x2d   : > { %602 = vmatpush2.bf16.msra.mxu0 %v883_v34  ;;  %643 = vmatpush2.bf16.msra.mxu1 %v884_v35 }
  0x2e   : > { %603 = vmatprep.subr.bf16.mxu0 %v885_v36  ;;  %644 = vmatprep.subr.bf16.mxu1 %v887_v37 }
  0x31   : > { %604 = vmatpush2.bf16.msra.mxu0 %v889_v38  ;;  %645 = vmatpush2.bf16.msra.mxu1 %v890_v39 }
  0x32   : > { %605 = vmatprep.subr.bf16.mxu0 %v891_v40  ;;  %646 = vmatprep.subr.bf16.mxu1 %v893_v41 }
  0x35   : > { %606 = vmatpush2.bf16.msra.mxu0 %v895_v42  ;;  %647 = vmatpush2.bf16.msra.mxu1 %v896_v43 }
  0x36   : > { %607 = vmatprep.subr.bf16.mxu0 %v897_v44  ;;  %648 = vmatprep.subr.bf16.mxu1 %v899_v45 }
  0x39   : > { %608 = vmatpush2.bf16.msra.mxu0 %v901_v48  ;;  %649 = vmatpush2.bf16.msra.mxu1 %v902_v49 }
  0x3a   : > { %609 = vmatprep.subr.bf16.mxu0 %v903_v50  ;;  %650 = vmatprep.subr.bf16.mxu1 %v905_v51 }
  0x3d   : > { %610 = vmatpush2.bf16.msra.mxu0 %v907_v52  ;;  %651 = vmatpush2.bf16.msra.mxu1 %v908_v53 }
  0x3e   : > { %611 = vmatprep.subr.bf16.mxu0 %v909_v54  ;;  %652 = vmatprep.subr.bf16.mxu1 %v911_v55 }
  0x41   : > { %612 = vmatpush2.bf16.msra.mxu0 %v913_v56  ;;  %653 = vmatpush2.bf16.msra.mxu1 %v914_v57 }
  0x42   : > { %613 = vmatprep.subr.bf16.mxu0 %v915_v58  ;;  %654 = vmatprep.subr.bf16.mxu1 %v917_v59 }
  0x45   : > { %614 = vmatpush2.bf16.msra.mxu0 %v919_v60  ;;  %655 = vmatpush2.bf16.msra.mxu1 %v920_v61 }
  0x46   : > { %615 = vmatprep.subr.bf16.mxu0 %v921_v62  ;;  %656 = vmatprep.subr.bf16.mxu1 %v923_v63 }
  0x49   : > { %616 = vmatpush2.bf16.msra.mxu0 %v925_v0  ;;  %657 = vmatpush2.bf16.msra.mxu1 %v926_v1 }
  0x4c   : > { %618 = vmatmul.mubr.bf16.vlgmr.msra.gmra.mxu0 %v749_v2  ;;  %659 = vmatmul.mubr.bf16.vlgmr.msra.gmra.mxu1 %v749_v2 }
 0x10c   : > { %v619_v14 = vpop.f32.mrf.mxu0  ;;  %v660_v15 = vpop.f32.mrf.mxu1 }
 0x10d   : > { %v620_v18 = vadd.f32 %v619_v14, %v241_v10  ;;  %v661_v19 = vadd.f32 %v660_v15, %v249_v11 }
 0x10e   : > { %v621_v16 = vpop.f32.mrf.mxu0  ;;  %v662_v17 = vpop.f32.mrf.mxu1 }
 0x10f   : > { %v622_v20 = vadd.f32 %v621_v16, %v245_v12  ;;  %v663_v21 = vadd.f32 %v662_v17, %v253_v13 }
 0x110   : > { %v623_v22 = vpop.f32.mrf.mxu0  ;;  %v664_v23 = vpop.f32.mrf.mxu1 }
 0x111   : > { %v821_v24 = vpack.c.bf16 %v622_v20, %v620_v18  ;;  %v822_v25 = vpack.c.bf16 %v663_v21, %v661_v19 }
 0x112   : > { %v624_v26 = vpop.f32.mrf.mxu0  ;;  %v665_v27 = vpop.f32.mrf.mxu1 }
 0x113   : > { %683 = vst [vmem:[%s170_s26] sm:$0xff] %v821_v24  ;;  %684 = vst [vmem:[%s170_s26 + $0x8] sm:$0xff] %v822_v25 }
 0x114 PF: > { %s13_s12 = sadd.s32 1, %s935_s12  }
 0x115   : > { %p10_p4 = scmp.ge.s32.totalorder %s13_s12, 4  }
 0x117   :  { %12 = sbr.rel (!%p10_p4) target bundleno = 1 (0x1), region = 62 }

// kernel: iia_forward.50
= control target key start
LH: loop header
LB: loop body
LE: loop exit
PB: predicated region body
PF: predicated region fallthrough
CT: control target
= control target key end

     0   :  { %s993_s12 = smov 0   ;;  %s1215_s0 = inlined_call_operand.vmem [shape: bf16[32,256], index: 0, kind: input, shape index: {}]   ;;  %s1216_s1 = inlined_call_operand.vmem [shape: bf16[256,512], index: 1, kind: input, shape index: {}]   ;;  %s1217_s2 = inlined_call_operand.vmem [shape: f32[1,512], index: 2, kind: input, shape index: {}]   ;;  %s1218_s3 = inlined_call_operand.vmem [shape: bf16[32,512], index: 3, kind: output, shape index: {}]  }
   0x1 LB: > { %s769_s13 = sadd.s32 4294967295, %s971_s12   ;;  %p773_p0 = scmp.ge.s32.totalorder %s971_s12, 1  ;;  %s971_s12 = sphi %s993_s12, %s13_s12  }
   0x2   : > { %p139_p1 = scmp.lt.s32.totalorder %s971_s12, 3 }
   0x4   : > { %p140_p2 = pnand %p773_p0, %p139_p1 }
   0x5   : > { %s774_s24 = sshll.u32 (!%p140_p2), %s769_s13, 1 }
   0x6   : > { %143 = sbr.rel (%p140_p2) target bundleno = 280 (0x118), region = 32  ;;  %p166_p3 = scmp.lt.s32.totalorder (!%p140_p2), %s774_s24, 3 }
   0xb   : > { %v866_v0 = vld [vmem:[%s1216_s1 + $0xe4] ss:$16 sps:$4 sm:$0xff]   ;;  %v868_v1 = vld [vmem:[%s1216_s1 + $0xec] ss:$16 sps:$4 sm:$0xff]   ;;  %v870_v2 = vld [vmem:[%s1216_s1 + $0xe0] ss:$16 sps:$4 sm:$0xff]  }
   0xc   : > { %597 = vmatprep.subr.bf16.mxu0 %v866_v0  ;;  %v871_v3 = vld [vmem:[%s1216_s1 + $0xe8] ss:$16 sps:$4 sm:$0xff]   ;;  %640 = vmatprep.subr.bf16.mxu1 %v868_v1  ;;  %v872_v4 = vld [vmem:[%s1216_s1 + $0xc4] ss:$16 sps:$4 sm:$0xff]   ;;  %v874_v5 = vld [vmem:[%s1216_s1 + $0xcc] ss:$16 sps:$4 sm:$0xff]  }
   0xd   : > { %598 = vmatpush1.bf16.msra.mxu0 %v870_v2  ;;  %641 = vmatpush1.bf16.msra.mxu1 %v871_v3  ;;  %v876_v6 = vld [vmem:[%s1216_s1 + $0xc0] ss:$16 sps:$4 sm:$0xff]   ;;  %v877_v7 = vld [vmem:[%s1216_s1 + $0xc8] ss:$16 sps:$4 sm:$0xff]   ;;  %v878_v8 = vld [vmem:[%s1216_s1 + $0xa4] ss:$16 sps:$4 sm:$0xff]   ;;  %v247_v2 = vlaneseq }
   0xe   : > { %599 = vmatprep.subr.bf16.mxu0 %v872_v4  ;;  %642 = vmatprep.subr.bf16.mxu1 %v874_v5  ;;  %v880_v9 = vld [vmem:[%s1216_s1 + $0xac] ss:$16 sps:$4 sm:$0xff]   ;;  %v882_v10 = vld [vmem:[%s1216_s1 + $0xa0] ss:$16 sps:$4 sm:$0xff]   ;;  %v883_v11 = vld [vmem:[%s1216_s1 + $0xa8] ss:$16 sps:$4 sm:$0xff]  }
   0xf   : > { %v884_v12 = vld [vmem:[%s1216_s1 + $0x84] ss:$16 sps:$4 sm:$0xff]   ;;  %v886_v13 = vld [vmem:[%s1216_s1 + $0x8c] ss:$16 sps:$4 sm:$0xff]   ;;  %v888_v14 = vld [vmem:[%s1216_s1 + $0x80] ss:$16 sps:$4 sm:$0xff]  }
  0x10   : > { %v889_v15 = vld [vmem:[%s1216_s1 + $0x88] ss:$16 sps:$4 sm:$0xff]   ;;  %v890_v16 = vld [vmem:[%s1216_s1 + $0x64] ss:$16 sps:$4 sm:$0xff]   ;;  %v892_v17 = vld [vmem:[%s1216_s1 + $0x6c] ss:$16 sps:$4 sm:$0xff]  }
  0x11   : > { %600 = vmatpush1.bf16.msra.mxu0 %v876_v6  ;;  %643 = vmatpush1.bf16.msra.mxu1 %v877_v7  ;;  %v894_v18 = vld [vmem:[%s1216_s1 + $0x60] ss:$16 sps:$4 sm:$0xff]   ;;  %v895_v19 = vld [vmem:[%s1216_s1 + $0x68] ss:$16 sps:$4 sm:$0xff]   ;;  %v896_v20 = vld [vmem:[%s1216_s1 + $0x44] ss:$16 sps:$4 sm:$0xff]  }
  0x12   : > { %601 = vmatprep.subr.bf16.mxu0 %v878_v8  ;;  %644 = vmatprep.subr.bf16.mxu1 %v880_v9  ;;  %v898_v21 = vld [vmem:[%s1216_s1 + $0x4c] ss:$16 sps:$4 sm:$0xff]   ;;  %v900_v22 = vld [vmem:[%s1216_s1 + $0x40] ss:$16 sps:$4 sm:$0xff]   ;;  %v901_v23 = vld [vmem:[%s1216_s1 + $0x48] ss:$16 sps:$4 sm:$0xff]  }
  0x13   : > { %v902_v24 = vld [vmem:[%s1216_s1 + $0x24] ss:$16 sps:$4 sm:$0xff]   ;;  %v904_v25 = vld [vmem:[%s1216_s1 + $0x2c] ss:$16 sps:$4 sm:$0xff]   ;;  %v906_v26 = vld [vmem:[%s1216_s1 + $0x20] ss:$16 sps:$4 sm:$0xff]  }
  0x14   : > { %v907_v27 = vld [vmem:[%s1216_s1 + $0x28] ss:$16 sps:$4 sm:$0xff]   ;;  %v908_v28 = vld [vmem:[%s1216_s1 + $0x4] ss:$16 sps:$4 sm:$0xff]   ;;  %v910_v29 = vld [vmem:[%s1216_s1 + $0xc] ss:$16 sps:$4 sm:$0xff]  }
  0x15   : > { %602 = vmatpush1.bf16.msra.mxu0 %v882_v10  ;;  %645 = vmatpush1.bf16.msra.mxu1 %v883_v11  ;;  %v912_v30 = vld [vmem:[%s1216_s1] ss:$16 sps:$4 sm:$0xff]   ;;  %v913_v31 = vld [vmem:[%s1216_s1 + $0x8] ss:$16 sps:$4 sm:$0xff]   ;;  %v914_v32 = vld [vmem:[%s1216_s1 + $0x1e4] ss:$16 sps:$4 sm:$0xff]  }
  0x16   : > { %603 = vmatprep.subr.bf16.mxu0 %v884_v12  ;;  %646 = vmatprep.subr.bf16.mxu1 %v886_v13  ;;  %v916_v33 = vld [vmem:[%s1216_s1 + $0x1ec] ss:$16 sps:$4 sm:$0xff]   ;;  %v918_v34 = vld [vmem:[%s1216_s1 + $0x1e0] ss:$16 sps:$4 sm:$0xff]   ;;  %v919_v35 = vld [vmem:[%s1216_s1 + $0x1e8] ss:$16 sps:$4 sm:$0xff]  }
  0x17   : > { %v920_v36 = vld [vmem:[%s1216_s1 + $0x1c4] ss:$16 sps:$4 sm:$0xff]   ;;  %v922_v37 = vld [vmem:[%s1216_s1 + $0x1cc] ss:$16 sps:$4 sm:$0xff]   ;;  %s1220_s24 = smov (!%p166_p3, %s774_s24), 3  ;;  %v248_v3 = vshrl.u32 %v247_v2, 7 }
  0x18   : > { %v924_v38 = vld [vmem:[%s1216_s1 + $0x1c0] ss:$16 sps:$4 sm:$0xff]   ;;  %v925_v39 = vld [vmem:[%s1216_s1 + $0x1c8] ss:$16 sps:$4 sm:$0xff]   ;;  %v926_v40 = vld [vmem:[%s1216_s1 + $0x1a4] ss:$16 sps:$4 sm:$0xff]  }
  0x19   : > { %604 = vmatpush1.bf16.msra.mxu0 %v888_v14  ;;  %647 = vmatpush1.bf16.msra.mxu1 %v889_v15  ;;  %v928_v41 = vld [vmem:[%s1216_s1 + $0x1ac] ss:$16 sps:$4 sm:$0xff]   ;;  %s852_s23 = sshll.u32 %s1220_s24, 3  ;;  %v930_v42 = vld [vmem:[%s1216_s1 + $0x1a0] ss:$16 sps:$4 sm:$0xff]   ;;  %v249_v4 = vsub.s32 0, %v248_v3 }
  0x1a   : > { %605 = vmatprep.subr.bf16.mxu0 %v890_v16  ;;  %648 = vmatprep.subr.bf16.mxu1 %v892_v17  ;;  %v931_v43 = vld [vmem:[%s1216_s1 + $0x1a8] ss:$16 sps:$4 sm:$0xff]   ;;  %v932_v44 = vld [vmem:[%s1216_s1 + $0x184] ss:$16 sps:$4 sm:$0xff]   ;;  %s1144_s13 = scalar_lea.vmem %s1215_s0, %s852_s23  ;;  %v934_v45 = vld [vmem:[%s1216_s1 + $0x18c] ss:$16 sps:$4 sm:$0xff]  }
  0x1b   : > { %v964_v46 = vld [vmem:[%s1144_s13 + $0x4] ss:$8 sps:$4 sm:$0xff]   ;;  %v936_v47 = vld [vmem:[%s1216_s1 + $0x180] ss:$16 sps:$4 sm:$0xff]   ;;  %v937_v48 = vld [vmem:[%s1216_s1 + $0x188] ss:$16 sps:$4 sm:$0xff]  }
  0x1c   : > { %v938_v49 = vld [vmem:[%s1216_s1 + $0x164] ss:$16 sps:$4 sm:$0xff]   ;;  %v940_v50 = vld [vmem:[%s1216_s1 + $0x16c] ss:$16 sps:$4 sm:$0xff]   ;;  %629 = vmatprep.mubr.bf16.mxu0 %v964_v46  ;;  %672 = vmatprep.mubr.bf16.mxu1 %v964_v46  ;;  %v942_v51 = vld [vmem:[%s1216_s1 + $0x160] ss:$16 sps:$4 sm:$0xff]  }
  0x1d   : > { %606 = vmatpush1.bf16.msra.mxu0 %v894_v18  ;;  %649 = vmatpush1.bf16.msra.mxu1 %v895_v19  ;;  %v943_v52 = vld [vmem:[%s1216_s1 + $0x168] ss:$16 sps:$4 sm:$0xff]   ;;  %v944_v53 = vld [vmem:[%s1216_s1 + $0x144] ss:$16 sps:$4 sm:$0xff]   ;;  %v946_v54 = vld [vmem:[%s1216_s1 + $0x14c] ss:$16 sps:$4 sm:$0xff]  }
  0x1e   : > { %607 = vmatprep.subr.bf16.mxu0 %v896_v20  ;;  %650 = vmatprep.subr.bf16.mxu1 %v898_v21  ;;  %v948_v55 = vld [vmem:[%s1216_s1 + $0x140] ss:$16 sps:$4 sm:$0xff]   ;;  %v949_v56 = vld [vmem:[%s1216_s1 + $0x148] ss:$16 sps:$4 sm:$0xff]   ;;  %v950_v57 = vld [vmem:[%s1216_s1 + $0x124] ss:$16 sps:$4 sm:$0xff]  }
  0x1f   : > { %v952_v58 = vld [vmem:[%s1216_s1 + $0x12c] ss:$16 sps:$4 sm:$0xff]   ;;  %v954_v59 = vld [vmem:[%s1216_s1 + $0x120] ss:$16 sps:$4 sm:$0xff]   ;;  %v955_v60 = vld [vmem:[%s1216_s1 + $0x128] ss:$16 sps:$4 sm:$0xff]  }
  0x20   : > { %v956_v61 = vld [vmem:[%s1216_s1 + $0x104] ss:$16 sps:$4 sm:$0xff]   ;;  %v958_v62 = vld [vmem:[%s1216_s1 + $0x10c] ss:$16 sps:$4 sm:$0xff]   ;;  %v960_v63 = vld [vmem:[%s1216_s1 + $0x100] ss:$16 sps:$4 sm:$0xff]  }
  0x21   : > { %608 = vmatpush1.bf16.msra.mxu0 %v900_v22  ;;  %651 = vmatpush1.bf16.msra.mxu1 %v901_v23  ;;  %v961_v0 = vld [vmem:[%s1216_s1 + $0x108] ss:$16 sps:$4 sm:$0xff]   ;;  %v257_v5 = vsub.s32 2, %v248_v3  ;;  %v253_v6 = vsub.s32 1, %v248_v3  ;;  %v261_v7 = vsub.s32 3, %v248_v3 }
  0x22   : > { %609 = vmatprep.subr.bf16.mxu0 %v902_v24  ;;  %652 = vmatprep.subr.bf16.mxu1 %v904_v25  ;;  %v962_v1 = vld [vmem:[%s1144_s13] ss:$8 sps:$4 sm:$0xff]   ;;  %s853_s13 = sshll.u32 %s1220_s24, 4 }
  0x23   : > { %v245_v8 = vld [vmem:[%s1217_s2] sm:$0xf]  ;;  %s177_s27 = scalar_lea.vmem %s1218_s3, %s853_s13 }
  0x24   : > { %v250_v9 = vrot.slane %v245_v8, %v249_v4  ;;  %v258_v10 = vrot.slane %v245_v8, %v257_v5  ;;  %v254_v11 = vrot.slane %v245_v8, %v253_v6  ;;  %v262_v12 = vrot.slane %v245_v8, %v261_v7 }
  0x25   : > { %610 = vmatpush1.bf16.msra.mxu0 %v906_v26  ;;  %653 = vmatpush1.bf16.msra.mxu1 %v907_v27 }
  0x26   : > { %611 = vmatprep.subr.bf16.mxu0 %v908_v28  ;;  %654 = vmatprep.subr.bf16.mxu1 %v910_v29 }
  0x29   : > { %612 = vmatpush1.bf16.msra.mxu0 %v912_v30  ;;  %655 = vmatpush1.bf16.msra.mxu1 %v913_v31 }
  0x2a   : > { %613 = vmatprep.subr.bf16.mxu0 %v914_v32  ;;  %656 = vmatprep.subr.bf16.mxu1 %v916_v33 }
  0x2d   : > { %614 = vmatpush2.bf16.msra.mxu0 %v918_v34  ;;  %657 = vmatpush2.bf16.msra.mxu1 %v919_v35 }
  0x2e   : > { %615 = vmatprep.subr.bf16.mxu0 %v920_v36  ;;  %658 = vmatprep.subr.bf16.mxu1 %v922_v37 }
  0x31   : > { %616 = vmatpush2.bf16.msra.mxu0 %v924_v38  ;;  %659 = vmatpush2.bf16.msra.mxu1 %v925_v39 }
  0x32   : > { %617 = vmatprep.subr.bf16.mxu0 %v926_v40  ;;  %660 = vmatprep.subr.bf16.mxu1 %v928_v41 }
  0x35   : > { %618 = vmatpush2.bf16.msra.mxu0 %v930_v42  ;;  %661 = vmatpush2.bf16.msra.mxu1 %v931_v43 }
  0x36   : > { %619 = vmatprep.subr.bf16.mxu0 %v932_v44  ;;  %662 = vmatprep.subr.bf16.mxu1 %v934_v45 }
  0x39   : > { %620 = vmatpush2.bf16.msra.mxu0 %v936_v47  ;;  %663 = vmatpush2.bf16.msra.mxu1 %v937_v48 }
  0x3a   : > { %621 = vmatprep.subr.bf16.mxu0 %v938_v49  ;;  %664 = vmatprep.subr.bf16.mxu1 %v940_v50 }
  0x3d   : > { %622 = vmatpush2.bf16.msra.mxu0 %v942_v51  ;;  %665 = vmatpush2.bf16.msra.mxu1 %v943_v52 }
  0x3e   : > { %623 = vmatprep.subr.bf16.mxu0 %v944_v53  ;;  %666 = vmatprep.subr.bf16.mxu1 %v946_v54 }
  0x41   : > { %624 = vmatpush2.bf16.msra.mxu0 %v948_v55  ;;  %667 = vmatpush2.bf16.msra.mxu1 %v949_v56 }
  0x42   : > { %625 = vmatprep.subr.bf16.mxu0 %v950_v57  ;;  %668 = vmatprep.subr.bf16.mxu1 %v952_v58 }
  0x45   : > { %626 = vmatpush2.bf16.msra.mxu0 %v954_v59  ;;  %669 = vmatpush2.bf16.msra.mxu1 %v955_v60 }
  0x46   : > { %627 = vmatprep.subr.bf16.mxu0 %v956_v61  ;;  %670 = vmatprep.subr.bf16.mxu1 %v958_v62 }
  0x49   : > { %628 = vmatpush2.bf16.msra.mxu0 %v960_v63  ;;  %671 = vmatpush2.bf16.msra.mxu1 %v961_v0 }
  0x4c   : > { %630 = vmatmul.mubr.bf16.vlgmr.msra.gmra.mxu0 %v962_v1  ;;  %673 = vmatmul.mubr.bf16.vlgmr.msra.gmra.mxu1 %v962_v1 }
 0x10c   : > { %v631_v13 = vpop.f32.mrf.mxu0  ;;  %v674_v14 = vpop.f32.mrf.mxu1 }
 0x10d   : > { %v632_v17 = vadd.f32 %v631_v13, %v250_v9  ;;  %v675_v18 = vadd.f32 %v674_v14, %v258_v10 }
 0x10e   : > { %v633_v15 = vpop.f32.mrf.mxu0  ;;  %v676_v16 = vpop.f32.mrf.mxu1 }
 0x10f   : > { %v634_v19 = vadd.f32 %v633_v15, %v254_v11  ;;  %v677_v20 = vadd.f32 %v676_v16, %v262_v12 }
 0x110   : > { %v635_v21 = vpop.f32.mrf.mxu0  ;;  %v678_v22 = vpop.f32.mrf.mxu1 }
 0x111   : > { %v854_v23 = vpack.c.bf16 %v634_v19, %v632_v17  ;;  %v855_v24 = vpack.c.bf16 %v677_v20, %v675_v18  ;;  %v636_v27 = vadd.f32 %v635_v21, %v250_v9  ;;  %v679_v28 = vadd.f32 %v678_v22, %v258_v10 }
 0x112   : > { %v637_v25 = vpop.f32.mrf.mxu0  ;;  %v680_v26 = vpop.f32.mrf.mxu1 }
 0x113   : > { %707 = vst [vmem:[%s177_s27] sm:$0xff] %v854_v23  ;;  %708 = vst [vmem:[%s177_s27 + $0x8] sm:$0xff] %v855_v24  ;;  %v638_v29 = vadd.f32 %v637_v25, %v254_v11  ;;  %v681_v30 = vadd.f32 %v680_v26, %v262_v12 }
 0x115   : > { %v856_v31 = vpack.c.bf16 %v638_v29, %v636_v27  ;;  %v857_v32 = vpack.c.bf16 %v681_v30, %v679_v28 }
 0x117   : > { %709 = vst [vmem:[%s177_s27 + $0x10] sm:$0xff] %v856_v31  ;;  %710 = vst [vmem:[%s177_s27 + $0x18] sm:$0xff] %v857_v32 }
 0x118 PF: > { %s13_s12 = sadd.s32 1, %s971_s12  }
 0x119   : > { %p10_p4 = scmp.ge.s32.totalorder %s13_s12, 4  }
 0x11b   :  { %12 = sbr.rel (!%p10_p4) target bundleno = 1 (0x1), region = 62 }

// kernel: iia_forward.47
= control target key start
LH: loop header
LB: loop body
LE: loop exit
PB: predicated region body
PF: predicated region fallthrough
CT: control target
= control target key end

     0   :  { %s975_s15 = smov 0   ;;  %s977_s16 = smov 0   ;;  %s1059_s0 = inlined_call_operand.vmem [shape: bf16[2,8,768], index: 0, kind: input, shape index: {}, may-alias: {0,1,2}]   ;;  %s1060_s1 = inlined_call_operand.vmem [shape: bf16[2,8,768], index: 1, kind: input, shape index: {}, may-alias: {0,1,2}]   ;;  %s1061_s2 = inlined_call_operand.vmem [shape: bf16[2,8,768], index: 2, kind: input, shape index: {}, may-alias: {0,1,2}]   ;;  %s1062_s3 = inlined_call_operand.vmem [shape: f32[2,1,8], index: 3, kind: input, shape index: {}]   ;;  %s1063_s4 = inlined_call_operand.vmem [shape: bf16[2,8,256], index: 4, kind: output, shape index: {}]  }
   0x1   :  { %s979_s17 = smov 0  }
   0x2 LB: > { %s33_s18 = sadd.s32 1, %s940_s16  ;;  %p825_p0 = scmp.ge.s32.totalorder %s944_s17, 1  ;;  %s944_s17 = sphi %s979_s17, %s14_s17   ;;  %s940_s16 = sphi %s977_s16, %s1065_s16   ;;  %s936_s15 = sphi %s975_s15, %s1064_s15  }
   0x3   : > { %p35_p1 = scmp.ge.s32.totalorder %s33_s18, 2  ;;  %p236_p2 = scmp.lt.s32.totalorder %s944_s17, 3 }
   0x5   : > { %s1067_s18 = smov (%p35_p1, %s33_s18), 0  ;;  %p237_p3 = pnand %p825_p0, %p236_p2 }
   0x6   : > { %p296_p4 = scmp.lt.s32.totalorder (!%p237_p3), %s936_s15, 1 }
   0x7   : > { %240 = sbr.rel (%p237_p3) target bundleno = 1286 (0x506), region = 36 }
   0xc   : > { %v946_v0 = vmov 0.0   ;;  %vm947_vm0 = vmmov 0   ;;  %s1069_s15 = smov (!%p296_p4, %s936_s15), 1  ;;  %vm345_vm1 = vcmask 7168   ;;  %v948_v3 = vmov -inf  }
   0xd   : > { %852 = vmatprep.subr.bf16.mxu0 %v946_v0  ;;  %854 = vmatprep.mubr.msk.bf16.mxu0 %vm947_vm0, %v946_v0  ;;  %s1002_s19 = smul.u32 24, %s1069_s15  ;;  %346 = vst.msk [vmem:[#allocation2] sm:$0xff] %vm345_vm1, %v948_v3  ;;  %347 = vst.msk [vmem:[#allocation2 + $0x8] sm:$0xff] %vm345_vm1, %v948_v3  ;;  %v357_v4 = vlaneseq  ;;  %s330_s28 = scalar_lea.vmem %s1062_s3, %s1069_s15  ;;  %vm418_vm3 = vcmask 64512   ;;  %v949_v17 = vmov 0   ;;  %vm453_vm4 = vcmask 1043456  }
   0xe   : > { %858 = vmatprep.subr.bf16.mxu1 %v946_v0  ;;  %860 = vmatprep.mubr.msk.bf16.mxu1 %vm947_vm0, %v946_v0  ;;  %348 = vst.msk [vmem:[#allocation3] sm:$0xff] %vm345_vm1, %v946_v0  ;;  %349 = vst.msk [vmem:[#allocation3 + $0x8] sm:$0xff] %vm345_vm1, %v946_v0  ;;  %v833_v7 = vld [vmem:[%s330_s28] ss:$0 sm:$0xff]  ;;  %s842_s6 = sshll.u32 %s1069_s15, 3 }
   0xf   : > { %s747_s22 = scalar_lea.vmem %s1060_s1, %s1002_s19  ;;  %s304_s25 = scalar_lea.vmem %s1059_s0, %s1002_s19  ;;  %v358_v5 = vshrl.u32 %v357_v4, 7  ;;  %v363_v6 = vand.u32 127, %v357_v4  ;;  %905 = vset.pattern.permute.xlu0 %v949_v17  ;;  %906 = vset.pattern.permute.xlu1 %v949_v17 }
  0x10   : > { %v831_v1 = vld [vmem:[%s747_s22 + $0x8] sm:$0xff]  ;;  %v352_v2 = vld [vmem:[%s304_s25] sm:$0xff]  ;;  %s753_s5 = scalar_lea.vmem %s1061_s2, %s1002_s19  ;;  %s339_s9 = scalar_lea.vmem %s1063_s4, %s842_s6 }
  0x11   : > { %853 = vmatpush3.bf16.xpose.msra.mxu0 %v831_v1  ;;  %vm366_vm2 = vcmp.gt.s32.totalorder %v363_v6, %v358_v5  ;;  %v832_v22 = vld [vmem:[%s753_s5 + $0x10] sm:$0xff]  ;;  %v836_v30 = vcombine.high %v831_v1, %v831_v1  ;;  %v835_v32 = vcombine.high %v352_v2, %v352_v2 }
  0x12   : > { %870 = vmatprep.subr.bf16.mxu0 %v946_v0  ;;  %v367_v8 = vsel %vm366_vm2, -1e+09, %v946_v0  ;;  %v455_v23 = vsel %vm453_vm4, %v832_v22, 0  ;;  %v837_v24 = vcombine.high %v832_v22, %v832_v22 }
  0x13   : > { %v374_v9 = vadd.f32 %v833_v7, %v367_v8  ;;  %859 = vmatpush3.bf16.msra.mxu1 %v455_v23 }
  0x14   : > { %v417_v18 = vld [vmem:[#allocation2] sm:$0xff]  ;;  %v591_v25 = vsel %vm453_vm4, %v837_v24, 0  ;;  %864 = vmatprep.subr.bf16.mxu1 %v946_v0  ;;  %v551_v44 = vld [vmem:[#allocation2 + $0x8] sm:$0xff] }
  0x15   : > { %v434_v59 = vld [vmem:[#allocation3] sm:$0xff]  ;;  %v568_v1 = vld [vmem:[#allocation3 + $0x8] sm:$0xff] }
  0x18   : > { %855 = vmatmul.mubr.bf16.vlgmr.msra.gmra.mxu0 %v352_v2 }
  0x19   : > { %872 = vmatprep.mubr.msk.bf16.mxu0 %vm947_vm0, %v946_v0  ;;  %871 = vmatpush3.bf16.msra.mxu0 %v591_v25 }
  0xd8   : > { %v409_v10 = vpop.f32.mrf.mxu0 }
  0xd9   : > { %v415_v11 = vmul.f32 0.088388346, %v409_v10 }
  0xda   : > { %v856_v12 = vpop.f32.mrf.mxu0 }
  0xdb   : > { %v416_v13 = vadd.f32 %v415_v11, %v374_v9 }
  0xdc   : > { %v412_v14 = vpop.f32.mrf.mxu0 }
  0xdd   : > { %v419_v15 = vsel %vm418_vm3, %v416_v13, -inf }
  0xde   : > { %420 = vmax.xlane.f32.xlu0 %v419_v15  ;;  %v857_v16 = vpop.f32.mrf.mxu0 }
 0x167   : > { %v421_v19 = vpop.xlane.xlu0 %420 }
 0x168   : > { %v422_v20 = vmax.f32 %v417_v18, %v421_v19 }
 0x16a   : > { %v423_v21 = vsub.f32 %v417_v18, %v422_v20  ;;  %499 = vst.msk [vmem:[#allocation2] sm:$0xff] %vm345_vm1, %v422_v20  ;;  %428 = vperm.xlu0 %905, %v422_v20  }
 0x16c   : > { %v424_v47 = vmul.f32 1.442695, %v423_v21 }
 0x1e5   : > { %v429_v26 = vpop.permute.xlu0 %428 }
 0x1e6   : > { %v431_v27 = vsub.f32 %v416_v13, %v429_v26 }
 0x1e8   : > { %v432_v28 = vmul.f32 1.442695, %v431_v27 }
 0x1ea   : > { %910 = vpow2.f32 %v432_v28 }
 0x1eb   : > { %912 = vpow2.f32 %v424_v47 }
 0x1f7   : > { %v911_v29 = vpop.eup %910 }
 0x1f8   : > { %v449_v31 = vpack.c.bf16 %v911_v29, %v911_v29  ;;  %v436_v49 = vsel %vm418_vm3, %v911_v29, 0.0  ;;  %v913_v51 = vpop.eup %912 }
 0x1f9   : > { %v435_v60 = vmul.f32 %v913_v51, %v434_v59 }
 0x1fa   : > { %861 = vmatmul.mubr.msk.bf16.vlgmr.msra.gmra.mxu1 %vm418_vm3, %v449_v31 }
 0x1fb   : > { %865 = vmatpush3.bf16.xpose.msra.mxu1 %v836_v30  ;;  %866 = vmatprep.mubr.msk.bf16.mxu1 %vm947_vm0, %v946_v0 }
 0x202   : > { %867 = vmatmul.mubr.bf16.vlgmr.msra.gmra.mxu1 %v835_v32 }
 0x2ba   : > { %v1036_v33 = vpop.f32.mrf.mxu1 }
 0x2bc   : > { %v862_v34 = vpop.f32.mrf.mxu1 }
 0x2be   : > { %v494_v35 = vpop.f32.mrf.mxu1 }
 0x2c0   : > { %v863_v36 = vpop.f32.mrf.mxu1 }
 0x2c2   : > { %v542_v37 = vpop.f32.mrf.mxu1 }
 0x2c3   : > { %v548_v38 = vmul.f32 0.088388346, %v542_v37 }
 0x2c4   : > { %v868_v39 = vpop.f32.mrf.mxu1 }
 0x2c5   : > { %v549_v40 = vadd.f32 %v548_v38, %v374_v9 }
 0x2c6   : > { %v545_v41 = vpop.f32.mrf.mxu1 }
 0x2c7   : > { %v552_v42 = vsel %vm418_vm3, %v549_v40, -inf }
 0x2c8   : > { %553 = vmax.xlane.f32.xlu1 %v552_v42  ;;  %v869_v43 = vpop.f32.mrf.mxu1 }
 0x351   : > { %v554_v45 = vpop.xlane.xlu1 %553 }
 0x352   : > { %v555_v46 = vmax.f32 %v551_v44, %v554_v45 }
 0x354   : > { %635 = vst.msk [vmem:[#allocation2 + $0x8] sm:$0xff] %vm345_vm1, %v555_v46  ;;  %561 = vperm.xlu1 %906, %v555_v46   ;;  %v556_v48 = vsub.f32 %v551_v44, %v555_v46 }
 0x356   : > { %v557_v50 = vmul.f32 1.442695, %v556_v48 }
 0x358   : > { %914 = vpow2.f32 %v557_v50 }
 0x365   : > { %v915_v52 = vpop.eup %914 }
 0x366   : > { %v569_v2 = vmul.f32 %v915_v52, %v568_v1 }
 0x378   : > { %437 = vadd.xlane.f32.xlu1 %v436_v49 }
 0x389   : > { %445 = vperm.xlu1 %906, %v913_v51  }
 0x38d   : > { %579 = vperm.xlu1 %906, %v915_v52  }
 0x3cf   : > { %v562_v53 = vpop.permute.xlu1 %561 }
 0x3d0   : > { %v564_v54 = vsub.f32 %v549_v40, %v562_v53 }
 0x3d2   : > { %v565_v55 = vmul.f32 1.442695, %v564_v54 }
 0x3d4   : > { %916 = vpow2.f32 %v565_v55 }
 0x3e1   : > { %v917_v56 = vpop.eup %916 }
 0x3e2   : > { %v570_v57 = vsel %vm418_vm3, %v917_v56, 0.0  ;;  %v583_v58 = vpack.c.bf16 %v917_v56, %v917_v56 }
 0x3e3   : > { %571 = vadd.xlane.f32.xlu0 %v570_v57 }
 0x3e4   : > { %873 = vmatmul.mubr.msk.bf16.vlgmr.msra.gmra.mxu0 %vm418_vm3, %v583_v58 }
 0x401   : > { %v438_v61 = vpop.xlane.xlu1 %437 }
 0x402   : > { %v439_v62 = vadd.f32 %v438_v61, %v435_v60 }
 0x404   : > { %441 = vst.msk [vmem:[#allocation3] sm:$0xff] %vm345_vm1, %v439_v62 }
 0x405   : > { %v446_v11 = vpop.permute.xlu1 %445 }
 0x406   : > { %v448_v13 = vmul.f32 0.0, %v446_v11 }
 0x408   : > { %v497_v16 = vadd.f32 %v1036_v33, %v448_v13 }
 0x409   : > { %v580_v12 = vpop.permute.xlu1 %579 }
 0x40a   : > { %v582_v14 = vmul.f32 0.0, %v580_v12 }
 0x40b   : > { %v640_v63 = vld [vmem:[#allocation3] sm:$0xff] }
 0x40c   : > { %918 = vrcp.f32 %v640_v63 }
 0x419   : > { %v919_v0 = vpop.eup %918 }
 0x41a   : > { %644 = vperm.xlu1 %906, %v919_v0  }
 0x46c   : > { %v572_v3 = vpop.xlane.xlu0 %571 }
 0x46d   : > { %v573_v4 = vadd.f32 %v572_v3, %v569_v2 }
 0x46f   : > { %574 = vst.msk [vmem:[#allocation3 + $0x8] sm:$0xff] %vm345_vm1, %v573_v4 }
 0x476   : > { %v649_v5 = vld [vmem:[#allocation3 + $0x8] sm:$0xff] }
 0x477   : > { %920 = vrcp.f32 %v649_v5 }
 0x484   : > { %v921_v6 = vpop.eup %920 }
 0x485   : > { %653 = vperm.xlu0 %905, %v921_v6  }
 0x495   : > { %v645_v15 = vpop.permute.xlu1 %644 }
 0x496   : > { %v647_v19 = vmul.f32 %v645_v15, %v497_v16 }
 0x4a4   : > { %v627_v7 = vpop.f32.mrf.mxu0 }
 0x4a5   : > { %v633_v17 = vadd.f32 %v627_v7, %v582_v14 }
 0x4a6   : > { %v874_v8 = vpop.f32.mrf.mxu0 }
 0x4a8   : > { %v630_v9 = vpop.f32.mrf.mxu0 }
 0x4aa   : > { %v875_v10 = vpop.f32.mrf.mxu0 }
 0x500   : > { %v654_v18 = vpop.permute.xlu0 %653 }
 0x501   : > { %v656_v20 = vmul.f32 %v654_v18, %v633_v17 }
 0x503   : > { %v843_v21 = vpack.c.bf16 %v656_v20, %v647_v19 }
 0x505   : > { %665 = vst [vmem:[%s339_s9] sm:$0xff] %v843_v21 }
 0x506 PF: > { %s14_s17 = sadd.s32 1, %s944_s17   ;;  %s1064_s15 = smov %s940_s16 }
 0x507   : > { %p11_p5 = scmp.ge.s32.totalorder %s14_s17, 4   ;;  %s1065_s16 = smov %s1067_s18 }
 0x509   :  { %13 = sbr.rel (!%p11_p5) target bundleno = 2 (0x2), region = 86 }

// kernel: iia_forward.49
= control target key start
LH: loop header
LB: loop body
LE: loop exit
PB: predicated region body
PF: predicated region fallthrough
CT: control target
= control target key end

     0   :  { %s623_s12 = smov 0   ;;  %s746_s0 = inlined_call_operand.vmem [shape: bf16[16,256], index: 0, kind: input, shape index: {}]   ;;  %s747_s1 = inlined_call_operand.vmem [shape: bf16[256,256], index: 1, kind: input, shape index: {}]   ;;  %s748_s2 = inlined_call_operand.vmem [shape: f32[1,256], index: 2, kind: input, shape index: {}]   ;;  %s749_s3 = inlined_call_operand.vmem [shape: bf16[16,256], index: 3, kind: output, shape index: {}]  }
   0x1 LB: > { %s488_s13 = sadd.s32 4294967295, %s601_s12   ;;  %p492_p0 = scmp.ge.s32.totalorder %s601_s12, 1  ;;  %s601_s12 = sphi %s623_s12, %s13_s12  }
   0x2   : > { %p137_p1 = scmp.lt.s32.totalorder %s601_s12, 3 }
   0x4   : > { %p138_p2 = pnand %p492_p0, %p137_p1 }
   0x5   : > { %p161_p3 = scmp.lt.s32.totalorder (!%p138_p2), %s488_s13, 1 }
   0x6   : > { %141 = sbr.rel (%p138_p2) target bundleno = 276 (0x114), region = 32 }
   0xb   : > { %v545_v0 = vld [vmem:[%s747_s1 + $0x74] ss:$8 sps:$4 sm:$0xff]   ;;  %v547_v1 = vld [vmem:[%s747_s1 + $0x70] ss:$8 sps:$4 sm:$0xff]   ;;  %v548_v2 = vld [vmem:[%s747_s1 + $0x64] ss:$8 sps:$4 sm:$0xff]   ;;  %v206_v35 = vlaneseq }
   0xc   : > { %383 = vmatprep.subr.bf16.mxu0 %v545_v0  ;;  %v550_v3 = vld [vmem:[%s747_s1 + $0x60] ss:$8 sps:$4 sm:$0xff]   ;;  %v551_v4 = vld [vmem:[%s747_s1 + $0x54] ss:$8 sps:$4 sm:$0xff]   ;;  %v553_v5 = vld [vmem:[%s747_s1 + $0x50] ss:$8 sps:$4 sm:$0xff]  }
   0xd   : > { %384 = vmatpush1.bf16.msra.mxu0 %v547_v1  ;;  %v554_v6 = vld [vmem:[%s747_s1 + $0x44] ss:$8 sps:$4 sm:$0xff]   ;;  %v556_v7 = vld [vmem:[%s747_s1 + $0x40] ss:$8 sps:$4 sm:$0xff]   ;;  %s751_s13 = smov (!%p161_p3, %s488_s13), 1  ;;  %v207_v36 = vshrl.u32 %v206_v35, 7 }
   0xe   : > { %385 = vmatprep.subr.bf16.mxu0 %v548_v2  ;;  %v557_v8 = vld [vmem:[%s747_s1 + $0x34] ss:$8 sps:$4 sm:$0xff]   ;;  %v559_v9 = vld [vmem:[%s747_s1 + $0x30] ss:$8 sps:$4 sm:$0xff]   ;;  %s534_s7 = sshll.u32 %s751_s13, 3 }
   0xf   : > { %v560_v10 = vld [vmem:[%s747_s1 + $0x24] ss:$8 sps:$4 sm:$0xff]   ;;  %s165_s14 = scalar_lea.vmem %s746_s0, %s534_s7  ;;  %v562_v11 = vld [vmem:[%s747_s1 + $0x20] ss:$8 sps:$4 sm:$0xff]   ;;  %v563_v12 = vld [vmem:[%s747_s1 + $0x14] ss:$8 sps:$4 sm:$0xff]   ;;  %s170_s11 = scalar_lea.vmem %s749_s3, %s534_s7 }
  0x10   : > { %v171_v13 = vld [vmem:[%s165_s14] sm:$0xff]  ;;  %v565_v15 = vld [vmem:[%s747_s1 + $0x10] ss:$8 sps:$4 sm:$0xff]   ;;  %v569_v18 = vld [vmem:[%s747_s1 + $0xf4] ss:$8 sps:$4 sm:$0xff]   ;;  %v208_v37 = vsub.s32 0, %v207_v36 }
  0x11   : > { %386 = vmatpush1.bf16.msra.mxu0 %v550_v3  ;;  %v498_v14 = vcombine.high %v171_v13, %v171_v13  ;;  %v566_v16 = vld [vmem:[%s747_s1 + $0x4] ss:$8 sps:$4 sm:$0xff]   ;;  %v568_v17 = vld [vmem:[%s747_s1] ss:$8 sps:$4 sm:$0xff]   ;;  %v571_v19 = vld [vmem:[%s747_s1 + $0xf0] ss:$8 sps:$4 sm:$0xff]   ;;  %v497_v34 = vcombine.low %v171_v13, %v171_v13 }
  0x12   : > { %387 = vmatprep.subr.bf16.mxu0 %v551_v4  ;;  %v572_v20 = vld [vmem:[%s747_s1 + $0xe4] ss:$8 sps:$4 sm:$0xff]   ;;  %v574_v21 = vld [vmem:[%s747_s1 + $0xe0] ss:$8 sps:$4 sm:$0xff]   ;;  %v575_v22 = vld [vmem:[%s747_s1 + $0xd4] ss:$8 sps:$4 sm:$0xff]  }
  0x13   : > { %415 = vmatprep.mubr.bf16.mxu0 %v498_v14  ;;  %v577_v23 = vld [vmem:[%s747_s1 + $0xd0] ss:$8 sps:$4 sm:$0xff]   ;;  %v578_v24 = vld [vmem:[%s747_s1 + $0xc4] ss:$8 sps:$4 sm:$0xff]   ;;  %v580_v25 = vld [vmem:[%s747_s1 + $0xc0] ss:$8 sps:$4 sm:$0xff]  }
  0x14   : > { %v581_v26 = vld [vmem:[%s747_s1 + $0xb4] ss:$8 sps:$4 sm:$0xff]   ;;  %v583_v27 = vld [vmem:[%s747_s1 + $0xb0] ss:$8 sps:$4 sm:$0xff]   ;;  %v584_v28 = vld [vmem:[%s747_s1 + $0xa4] ss:$8 sps:$4 sm:$0xff]  }
  0x15   : > { %388 = vmatpush1.bf16.msra.mxu0 %v553_v5  ;;  %v586_v29 = vld [vmem:[%s747_s1 + $0xa0] ss:$8 sps:$4 sm:$0xff]   ;;  %v587_v30 = vld [vmem:[%s747_s1 + $0x94] ss:$8 sps:$4 sm:$0xff]   ;;  %v589_v31 = vld [vmem:[%s747_s1 + $0x90] ss:$8 sps:$4 sm:$0xff]  }
  0x16   : > { %389 = vmatprep.subr.bf16.mxu0 %v554_v6  ;;  %v590_v32 = vld [vmem:[%s747_s1 + $0x84] ss:$8 sps:$4 sm:$0xff]   ;;  %v592_v33 = vld [vmem:[%s747_s1 + $0x80] ss:$8 sps:$4 sm:$0xff]   ;;  %v212_v38 = vsub.s32 1, %v207_v36 }
  0x17   : > { %v204_v39 = vld [vmem:[%s748_s2] sm:$0x3] }
  0x18   : > { %v209_v40 = vrot.slane %v204_v39, %v208_v37  ;;  %v213_v41 = vrot.slane %v204_v39, %v212_v38 }
  0x19   : > { %390 = vmatpush1.bf16.msra.mxu0 %v556_v7 }
  0x1a   : > { %391 = vmatprep.subr.bf16.mxu0 %v557_v8 }
  0x1d   : > { %392 = vmatpush1.bf16.msra.mxu0 %v559_v9 }
  0x1e   : > { %393 = vmatprep.subr.bf16.mxu0 %v560_v10 }
  0x21   : > { %394 = vmatpush1.bf16.msra.mxu0 %v562_v11 }
  0x22   : > { %395 = vmatprep.subr.bf16.mxu0 %v563_v12 }
  0x25   : > { %396 = vmatpush1.bf16.msra.mxu0 %v565_v15 }
  0x26   : > { %397 = vmatprep.subr.bf16.mxu0 %v566_v16 }
  0x29   : > { %398 = vmatpush1.bf16.msra.mxu0 %v568_v17 }
  0x2a   : > { %399 = vmatprep.subr.bf16.mxu0 %v569_v18 }
  0x2d   : > { %400 = vmatpush2.bf16.msra.mxu0 %v571_v19 }
  0x2e   : > { %401 = vmatprep.subr.bf16.mxu0 %v572_v20 }
  0x31   : > { %402 = vmatpush2.bf16.msra.mxu0 %v574_v21 }
  0x32   : > { %403 = vmatprep.subr.bf16.mxu0 %v575_v22 }
  0x35   : > { %404 = vmatpush2.bf16.msra.mxu0 %v577_v23 }
  0x36   : > { %405 = vmatprep.subr.bf16.mxu0 %v578_v24 }
  0x39   : > { %406 = vmatpush2.bf16.msra.mxu0 %v580_v25 }
  0x3a   : > { %407 = vmatprep.subr.bf16.mxu0 %v581_v26 }
  0x3d   : > { %408 = vmatpush2.bf16.msra.mxu0 %v583_v27 }
  0x3e   : > { %409 = vmatprep.subr.bf16.mxu0 %v584_v28 }
  0x41   : > { %410 = vmatpush2.bf16.msra.mxu0 %v586_v29 }
  0x42   : > { %411 = vmatprep.subr.bf16.mxu0 %v587_v30 }
  0x45   : > { %412 = vmatpush2.bf16.msra.mxu0 %v589_v31 }
  0x46   : > { %413 = vmatprep.subr.bf16.mxu0 %v590_v32 }
  0x49   : > { %414 = vmatpush2.bf16.msra.mxu0 %v592_v33 }
  0x4c   : > { %416 = vmatmul.mubr.bf16.vlgmr.msra.gmra.mxu0 %v497_v34 }
 0x10c   : > { %v417_v42 = vpop.f32.mrf.mxu0 }
 0x10d   : > { %v418_v44 = vadd.f32 %v417_v42, %v209_v40 }
 0x10e   : > { %v419_v43 = vpop.f32.mrf.mxu0 }
 0x10f   : > { %v420_v45 = vadd.f32 %v419_v43, %v213_v41 }
 0x110   : > { %v421_v46 = vpop.f32.mrf.mxu0 }
 0x111   : > { %v536_v47 = vpack.c.bf16 %v420_v45, %v418_v44 }
 0x112   : > { %v422_v48 = vpop.f32.mrf.mxu0 }
 0x113   : > { %432 = vst [vmem:[%s170_s11] sm:$0xff] %v536_v47 }
 0x114 PF: > { %s13_s12 = sadd.s32 1, %s601_s12  }
 0x115   : > { %p10_p4 = scmp.ge.s32.totalorder %s13_s12, 4  }
 0x117   :  { %12 = sbr.rel (!%p10_p4) target bundleno = 1 (0x1), region = 62 }

// kernel: iia_forward.41
= control target key start
LH: loop header
LB: loop body
LE: loop exit
PB: predicated region body
PF: predicated region fallthrough
CT: control target
= control target key end

     0   :  { %s960_s15 = smov 0   ;;  %s962_s16 = smov 0   ;;  %s1036_s0 = inlined_call_operand.vmem [shape: bf16[2,8,256], index: 0, kind: input, shape index: {}]   ;;  %s1037_s1 = inlined_call_operand.vmem [shape: bf16[2,8,512], index: 1, kind: input, shape index: {}, may-alias: {1,2}]   ;;  %s1038_s2 = inlined_call_operand.vmem [shape: bf16[2,8,512], index: 2, kind: input, shape index: {}, may-alias: {1,2}]   ;;  %s1039_s3 = inlined_call_operand.vmem [shape: f32[2,1,8], index: 3, kind: input, shape index: {}]   ;;  %s1040_s4 = inlined_call_operand.vmem [shape: bf16[2,8,256], index: 4, kind: output, shape index: {}]  }
   0x1   :  { %s964_s17 = smov 0  }
   0x2 LB: > { %s33_s18 = sadd.s32 1, %s925_s16  ;;  %p806_p0 = scmp.ge.s32.totalorder %s929_s17, 1  ;;  %s929_s17 = sphi %s964_s17, %s14_s17   ;;  %s925_s16 = sphi %s962_s16, %s1042_s16   ;;  %s921_s15 = sphi %s960_s15, %s1041_s15  }
   0x3   : > { %p35_p1 = scmp.ge.s32.totalorder %s33_s18, 2  ;;  %p235_p2 = scmp.lt.s32.totalorder %s929_s17, 3 }
   0x5   : > { %s1044_s18 = smov (%p35_p1, %s33_s18), 0  ;;  %p236_p3 = pnand %p806_p0, %p235_p2 }
   0x6   : > { %p294_p4 = scmp.lt.s32.totalorder (!%p236_p3), %s921_s15, 1 }
   0x7   : > { %239 = sbr.rel (%p236_p3) target bundleno = 1285 (0x505), region = 36 }
   0xc   : > { %v931_v0 = vmov 0.0   ;;  %vm932_vm0 = vmmov 0   ;;  %s1046_s15 = smov (!%p294_p4, %s921_s15), 1  ;;  %vm342_vm1 = vcmask 7168   ;;  %v933_v3 = vmov -inf  }
   0xd   : > { %838 = vmatprep.subr.bf16.mxu0 %v931_v0  ;;  %840 = vmatprep.mubr.msk.bf16.mxu0 %vm932_vm0, %v931_v0  ;;  %s826_s19 = sshll.u32 %s1046_s15, 4  ;;  %s825_s23 = sshll.u32 %s1046_s15, 3  ;;  %343 = vst.msk [vmem:[#allocation2] sm:$0xff] %vm342_vm1, %v933_v3  ;;  %344 = vst.msk [vmem:[#allocation2 + $0x8] sm:$0xff] %vm342_vm1, %v933_v3  ;;  %vm402_vm2 = vcmask 64512   ;;  %v934_v12 = vmov 0  }
   0xe   : > { %844 = vmatprep.subr.bf16.mxu1 %v931_v0  ;;  %846 = vmatprep.mubr.msk.bf16.mxu1 %vm932_vm0, %v931_v0  ;;  %s311_s22 = scalar_lea.vmem %s1037_s1, %s826_s19  ;;  %s302_s26 = scalar_lea.vmem %s1036_s0, %s825_s23  ;;  %345 = vst.msk [vmem:[#allocation3] sm:$0xff] %vm342_vm1, %v931_v0  ;;  %346 = vst.msk [vmem:[#allocation3 + $0x8] sm:$0xff] %vm342_vm1, %v931_v0  ;;  %vm437_vm3 = vcmask 1043456  }
   0xf   : > { %v350_v1 = vld [vmem:[%s311_s22] sm:$0xff]  ;;  %s327_s29 = scalar_lea.vmem %s1039_s3, %s1046_s15  ;;  %890 = vset.pattern.permute.xlu0 %v934_v12  ;;  %891 = vset.pattern.permute.xlu1 %v934_v12  ;;  %s734_s6 = scalar_lea.vmem %s1038_s2, %s826_s19 }
  0x10   : > { %839 = vmatpush3.bf16.xpose.msra.mxu0 %v350_v1  ;;  %v349_v2 = vld [vmem:[%s302_s26] sm:$0xff]  ;;  %v815_v17 = vld [vmem:[%s734_s6 + $0x8] sm:$0xff]  ;;  %v819_v25 = vcombine.high %v350_v1, %v350_v1  ;;  %s336_s9 = scalar_lea.vmem %s1040_s4, %s825_s23 }
  0x11   : > { %856 = vmatprep.subr.bf16.mxu0 %v931_v0  ;;  %v816_v5 = vld [vmem:[%s327_s29] ss:$0 sm:$0xff]  ;;  %v439_v18 = vsel %vm437_vm3, %v815_v17, 0  ;;  %v820_v19 = vcombine.high %v815_v17, %v815_v17  ;;  %v818_v27 = vcombine.high %v349_v2, %v349_v2 }
  0x12   : > { %845 = vmatpush3.bf16.msra.mxu1 %v439_v18 }
  0x13   : > { %v575_v20 = vsel %vm437_vm3, %v820_v19, 0  ;;  %850 = vmatprep.subr.bf16.mxu1 %v931_v0 }
  0x14   : > { %v401_v13 = vld [vmem:[#allocation2] sm:$0xff]  ;;  %v535_v39 = vld [vmem:[#allocation2 + $0x8] sm:$0xff] }
  0x15   : > { %v418_v54 = vld [vmem:[#allocation3] sm:$0xff]  ;;  %v552_v60 = vld [vmem:[#allocation3 + $0x8] sm:$0xff] }
  0x17   : > { %841 = vmatmul.mubr.bf16.vlgmr.msra.gmra.mxu0 %v349_v2 }
  0x18   : > { %858 = vmatprep.mubr.msk.bf16.mxu0 %vm932_vm0, %v931_v0  ;;  %857 = vmatpush3.bf16.msra.mxu0 %v575_v20 }
  0xd7   : > { %v387_v4 = vpop.f32.mrf.mxu0 }
  0xd8   : > { %v393_v6 = vmul.f32 0.088388346, %v387_v4 }
  0xd9   : > { %v842_v7 = vpop.f32.mrf.mxu0 }
  0xda   : > { %v400_v8 = vadd.f32 %v816_v5, %v393_v6 }
  0xdb   : > { %v390_v9 = vpop.f32.mrf.mxu0 }
  0xdc   : > { %v403_v10 = vsel %vm402_vm2, %v400_v8, -inf }
  0xdd   : > { %404 = vmax.xlane.f32.xlu0 %v403_v10  ;;  %v843_v11 = vpop.f32.mrf.mxu0 }
 0x166   : > { %v405_v14 = vpop.xlane.xlu0 %404 }
 0x167   : > { %v406_v15 = vmax.f32 %v401_v13, %v405_v14 }
 0x169   : > { %v407_v16 = vsub.f32 %v401_v13, %v406_v15  ;;  %483 = vst.msk [vmem:[#allocation2] sm:$0xff] %vm342_vm1, %v406_v15  ;;  %412 = vperm.xlu0 %890, %v406_v15  }
 0x16b   : > { %v408_v42 = vmul.f32 1.442695, %v407_v16 }
 0x1e4   : > { %v413_v21 = vpop.permute.xlu0 %412 }
 0x1e5   : > { %v415_v22 = vsub.f32 %v400_v8, %v413_v21 }
 0x1e7   : > { %v416_v23 = vmul.f32 1.442695, %v415_v22 }
 0x1e9   : > { %895 = vpow2.f32 %v416_v23 }
 0x1ea   : > { %897 = vpow2.f32 %v408_v42 }
 0x1f6   : > { %v896_v24 = vpop.eup %895 }
 0x1f7   : > { %v433_v26 = vpack.c.bf16 %v896_v24, %v896_v24  ;;  %v420_v44 = vsel %vm402_vm2, %v896_v24, 0.0  ;;  %v898_v46 = vpop.eup %897 }
 0x1f8   : > { %v419_v55 = vmul.f32 %v898_v46, %v418_v54 }
 0x1f9   : > { %847 = vmatmul.mubr.msk.bf16.vlgmr.msra.gmra.mxu1 %vm402_vm2, %v433_v26 }
 0x1fa   : > { %851 = vmatpush3.bf16.xpose.msra.mxu1 %v819_v25  ;;  %852 = vmatprep.mubr.msk.bf16.mxu1 %vm932_vm0, %v931_v0 }
 0x201   : > { %853 = vmatmul.mubr.bf16.vlgmr.msra.gmra.mxu1 %v818_v27 }
 0x2b9   : > { %v1012_v28 = vpop.f32.mrf.mxu1 }
 0x2bb   : > { %v848_v29 = vpop.f32.mrf.mxu1 }
 0x2bd   : > { %v478_v30 = vpop.f32.mrf.mxu1 }
 0x2bf   : > { %v849_v31 = vpop.f32.mrf.mxu1 }
 0x2c1   : > { %v526_v32 = vpop.f32.mrf.mxu1 }
 0x2c2   : > { %v532_v33 = vmul.f32 0.088388346, %v526_v32 }
 0x2c3   : > { %v854_v34 = vpop.f32.mrf.mxu1 }
 0x2c4   : > { %v533_v35 = vadd.f32 %v816_v5, %v532_v33 }
 0x2c5   : > { %v529_v36 = vpop.f32.mrf.mxu1 }
 0x2c6   : > { %v536_v37 = vsel %vm402_vm2, %v533_v35, -inf }
 0x2c7   : > { %537 = vmax.xlane.f32.xlu1 %v536_v37  ;;  %v855_v38 = vpop.f32.mrf.mxu1 }
 0x350   : > { %v538_v40 = vpop.xlane.xlu1 %537 }
 0x351   : > { %v539_v41 = vmax.f32 %v535_v39, %v538_v40 }
 0x353   : > { %619 = vst.msk [vmem:[#allocation2 + $0x8] sm:$0xff] %vm342_vm1, %v539_v41  ;;  %545 = vperm.xlu1 %891, %v539_v41   ;;  %v540_v43 = vsub.f32 %v535_v39, %v539_v41 }
 0x355   : > { %v541_v45 = vmul.f32 1.442695, %v540_v43 }
 0x357   : > { %899 = vpow2.f32 %v541_v45 }
 0x364   : > { %v900_v47 = vpop.eup %899 }
 0x365   : > { %v553_v61 = vmul.f32 %v900_v47, %v552_v60 }
 0x377   : > { %421 = vadd.xlane.f32.xlu1 %v420_v44 }
 0x388   : > { %429 = vperm.xlu1 %891, %v898_v46  }
 0x38c   : > { %563 = vperm.xlu1 %891, %v900_v47  }
 0x3ce   : > { %v546_v48 = vpop.permute.xlu1 %545 }
 0x3cf   : > { %v548_v49 = vsub.f32 %v533_v35, %v546_v48 }
 0x3d1   : > { %v549_v50 = vmul.f32 1.442695, %v548_v49 }
 0x3d3   : > { %901 = vpow2.f32 %v549_v50 }
 0x3e0   : > { %v902_v51 = vpop.eup %901 }
 0x3e1   : > { %v554_v52 = vsel %vm402_vm2, %v902_v51, 0.0  ;;  %v567_v53 = vpack.c.bf16 %v902_v51, %v902_v51 }
 0x3e2   : > { %555 = vadd.xlane.f32.xlu0 %v554_v52 }
 0x3e3   : > { %859 = vmatmul.mubr.msk.bf16.vlgmr.msra.gmra.mxu0 %vm402_vm2, %v567_v53 }
 0x400   : > { %v422_v56 = vpop.xlane.xlu1 %421 }
 0x401   : > { %v423_v57 = vadd.f32 %v422_v56, %v419_v55 }
 0x403   : > { %425 = vst.msk [vmem:[#allocation3] sm:$0xff] %vm342_vm1, %v423_v57 }
 0x404   : > { %v430_v6 = vpop.permute.xlu1 %429 }
 0x405   : > { %v432_v8 = vmul.f32 0.0, %v430_v6 }
 0x407   : > { %v481_v11 = vadd.f32 %v1012_v28, %v432_v8 }
 0x408   : > { %v564_v7 = vpop.permute.xlu1 %563 }
 0x409   : > { %v566_v9 = vmul.f32 0.0, %v564_v7 }
 0x40a   : > { %v624_v58 = vld [vmem:[#allocation3] sm:$0xff] }
 0x40b   : > { %903 = vrcp.f32 %v624_v58 }
 0x418   : > { %v904_v59 = vpop.eup %903 }
 0x419   : > { %628 = vperm.xlu1 %891, %v904_v59  }
 0x46b   : > { %v556_v62 = vpop.xlane.xlu0 %555 }
 0x46c   : > { %v557_v63 = vadd.f32 %v556_v62, %v553_v61 }
 0x46e   : > { %558 = vst.msk [vmem:[#allocation3 + $0x8] sm:$0xff] %vm342_vm1, %v557_v63 }
 0x475   : > { %v633_v0 = vld [vmem:[#allocation3 + $0x8] sm:$0xff] }
 0x476   : > { %905 = vrcp.f32 %v633_v0 }
 0x483   : > { %v906_v1 = vpop.eup %905 }
 0x484   : > { %637 = vperm.xlu0 %890, %v906_v1  }
 0x494   : > { %v629_v10 = vpop.permute.xlu1 %628 }
 0x495   : > { %v631_v14 = vmul.f32 %v629_v10, %v481_v11 }
 0x4a3   : > { %v611_v2 = vpop.f32.mrf.mxu0 }
 0x4a4   : > { %v617_v12 = vadd.f32 %v611_v2, %v566_v9 }
 0x4a5   : > { %v860_v3 = vpop.f32.mrf.mxu0 }
 0x4a7   : > { %v614_v4 = vpop.f32.mrf.mxu0 }
 0x4a9   : > { %v861_v5 = vpop.f32.mrf.mxu0 }
 0x4ff   : > { %v638_v13 = vpop.permute.xlu0 %637 }
 0x500   : > { %v640_v15 = vmul.f32 %v638_v13, %v617_v12 }
 0x502   : > { %v829_v16 = vpack.c.bf16 %v640_v15, %v631_v14 }
 0x504   : > { %649 = vst [vmem:[%s336_s9] sm:$0xff] %v829_v16 }
 0x505 PF: > { %s14_s17 = sadd.s32 1, %s929_s17   ;;  %s1041_s15 = smov %s925_s16 }
 0x506   : > { %p11_p5 = scmp.ge.s32.totalorder %s14_s17, 4   ;;  %s1042_s16 = smov %s1044_s18 }
 0x508   :  { %13 = sbr.rel (!%p11_p5) target bundleno = 2 (0x2), region = 86 }

// kernel: iia_forward.51
= control target key start
LH: loop header
LB: loop body
LE: loop exit
PB: predicated region body
PF: predicated region fallthrough
CT: control target
= control target key end

     0   :  { %s1071_s15 = smov 0   ;;  %s1073_s16 = smov 0   ;;  %s1193_s0 = inlined_call_operand.vmem [shape: bf16[2,8,256], index: 0, kind: input, shape index: {}]   ;;  %s1194_s1 = inlined_call_operand.vmem [shape: bf16[2,16,512], index: 1, kind: input, shape index: {}, may-alias: {1,2}]   ;;  %s1195_s2 = inlined_call_operand.vmem [shape: bf16[2,16,512], index: 2, kind: input, shape index: {}, may-alias: {1,2}]   ;;  %s1196_s3 = inlined_call_operand.vmem [shape: f32[2,1,16], index: 3, kind: input, shape index: {}]   ;;  %s1197_s4 = inlined_call_operand.vmem [shape: bf16[2,8,256], index: 4, kind: output, shape index: {}]  }
   0x1   :  { %s1075_s17 = smov 0   ;;  %s1077_s18 = smov 0  }
   0x2   :  { %s1079_s19 = smov 0  }
   0x3 LB: > { %s33_s20 = sadd.s32 1, %s1036_s18  ;;  %p77_p1 = scmp.ne.s32.totalorder %s1028_s16, %s1024_s15  ;;  %s1040_s19 = sphi %s1079_s19, %s14_s19   ;;  %s1036_s18 = sphi %s1077_s18, %s1202_s18   ;;  %s1032_s17 = sphi %s1075_s17, %s1201_s17   ;;  %s1028_s16 = sphi %s1073_s16, %s1200_s16   ;;  %s1024_s15 = sphi %s1071_s15, %s1199_s15  }
   0x4   : > { %p35_p0 = scmp.ge.s32.totalorder %s33_s20, 2  ;;  %p78_p2 = scmp.eq.s32.totalorder %s1040_s19, 0 }
   0x5   : > { %s70_s23 = sadd.s32 1, %s1028_s16  ;;  %p873_p5 = scmp.ge.s32.totalorder %s1040_s19, 2 }
   0x6   : > { %s1204_s20 = smov (%p35_p0, %s33_s20), 0  ;;  %p1102_p3 = por %p78_p2, %p77_p1 }
   0x7   : > { %s65_s22 = ssub.s32 %s1036_s18, %s1204_s20  ;;  %187 = sbr.rel (%p873_p5) target bundleno = 22 (0x16), region = 16 }
   0x8   : > { %p68_p4 = scmp.eq.s32.totalorder %s65_s22, 0 }
   0xa   : > { %s1110_s24 = scalar_select %p68_p4, %s1028_s16, %s70_s23  }
   0xc   : > { %202 = sbr.rel (!%p1102_p3) target bundleno = 17 (0x11), region = 24  ;;  %s204_s25 = sand.u32 (%p1102_p3), 1, %s1028_s16  }
   0xd   : > { %s900_s26 = sshll.u32 (%p1102_p3), %s1036_s18, 5  ;;  %s874_s27 = sshll.u32 (%p1102_p3), %s204_s25, 4 }
   0xe   : > { %s212_s30 = scalar_lea.vmem (%p1102_p3), %s1194_s1, %s900_s26  ;;  %s206_s5 = scalar_lea.vmem (%p1102_p3), [#allocation5], %s874_s27 }
   0xf   : > { %v243_v0 = vld [vmem:[%s212_s30] sm:$0xff] (%p1102_p3)  ;;  %v245_v1 = vld [vmem:[%s212_s30 + $0x10] sm:$0xff] (%p1102_p3) }
  0x10   : > { %244 = vst [vmem:[%s206_s5] sm:$0xff] (%p1102_p3), %v243_v0  ;;  %246 = vst [vmem:[%s206_s5 + $0x8] sm:$0xff] (%p1102_p3), %v245_v1 }
  0x11 PF: > { %252 = sbr.rel (!%p1102_p3) target bundleno = 22 (0x16), region = 62  ;;  %s254_s6 = sand.u32 (%p1102_p3), 1, %s1028_s16  }
  0x12   : > { %s901_s7 = sshll.u32 (%p1102_p3), %s1036_s18, 5  ;;  %s877_s8 = sshll.u32 (%p1102_p3), %s254_s6, 4 }
  0x13   : > { %s767_s11 = scalar_lea.vmem (%p1102_p3), %s1195_s2, %s901_s7  ;;  %s256_s12 = scalar_lea.vmem (%p1102_p3), [#allocation6], %s877_s8 }
  0x14   : > { %v880_v2 = vld [vmem:[%s767_s11 + $0x8] sm:$0xff] (%p1102_p3)  ;;  %v881_v3 = vld [vmem:[%s767_s11 + $0x18] sm:$0xff] (%p1102_p3) }
  0x15   : > { %295 = vst [vmem:[%s256_s12] sm:$0xff] (%p1102_p3), %v880_v2  ;;  %297 = vst [vmem:[%s256_s12 + $0x8] sm:$0xff] (%p1102_p3), %v881_v3 }
  0x16 PF: > { %p882_p6 = scmp.ge.s32.totalorder %s1040_s19, 1  ;;  %p311_p7 = scmp.lt.s32.totalorder %s1040_s19, 3 }
  0x18   : > { %p312_p8 = pnand %p882_p6, %p311_p7 }
  0x19   : > { %s318_s13 = sand.u32 (!%p312_p8), 1, %s1024_s15   ;;  %p373_p9 = scmp.lt.s32.totalorder (!%p312_p8), %s1032_s17, 1 }
  0x1a   : > { %315 = sbr.rel (%p312_p8) target bundleno = 1303 (0x517), region = 104  ;;  %s1131_s14 = sshll.u32 (!%p312_p8), %s318_s13, 4 }
  0x1b   : > { %s320_s21 = scalar_lea.vmem (!%p312_p8), [#allocation5], %s1131_s14  ;;  %s327_s29 = scalar_lea.vmem (!%p312_p8), [#allocation6], %s1131_s14 }
  0x1f   : > { %v1042_v4 = vmov 0.0   ;;  %vm1043_vm0 = vmmov 0   ;;  %v983_v5 = vld [vmem:[%s320_s21] ss:$8 sps:$4 sm:$0xff]   ;;  %s1206_s17 = smov (!%p373_p9, %s1032_s17), 1  ;;  %vm404_vm1 = vcmask 7168  }
  0x20   : > { %913 = vmatprep.subr.bf16.mxu0 %v1042_v4  ;;  %915 = vmatprep.mubr.msk.bf16.mxu0 %vm1043_vm0, %v1042_v4  ;;  %s902_s15 = sshll.u32 %s1206_s17, 3  ;;  %v1044_v7 = vmov -inf   ;;  %407 = vst.msk [vmem:[#allocation3] sm:$0xff] %vm404_vm1, %v1042_v4  ;;  %408 = vst.msk [vmem:[#allocation3 + $0x8] sm:$0xff] %vm404_vm1, %v1042_v4  ;;  %s389_s28 = scalar_lea.vmem %s1196_s3, %s1206_s17  ;;  %vm472_vm2 = vcmask 130048   ;;  %v1045_v16 = vmov 0  }
  0x21   : > { %919 = vmatprep.subr.bf16.mxu1 %v1042_v4  ;;  %921 = vmatprep.mubr.msk.bf16.mxu1 %vm1043_vm0, %v1042_v4  ;;  %s381_s25 = scalar_lea.vmem %s1193_s0, %s902_s15  ;;  %405 = vst.msk [vmem:[#allocation2] sm:$0xff] %vm404_vm1, %v1044_v7  ;;  %406 = vst.msk [vmem:[#allocation2 + $0x8] sm:$0xff] %vm404_vm1, %v1044_v7  ;;  %v890_v9 = vld [vmem:[%s389_s28] ss:$0 sm:$0xff]  ;;  %v989_v22 = vld [vmem:[%s327_s29 + $0x4] ss:$8 sps:$4 sm:$0xff]   ;;  %s398_s6 = scalar_lea.vmem %s1197_s4, %s902_s15 }
  0x22   : > { %914 = vmatpush3.bf16.xpose.msra.mxu0 %v983_v5  ;;  %v411_v6 = vld [vmem:[%s381_s25] sm:$0xff]  ;;  %981 = vset.pattern.permute.xlu0 %v1045_v16 }
  0x23   : > { %931 = vmatprep.subr.bf16.mxu0 %v1042_v4  ;;  %982 = vset.pattern.permute.xlu1 %v1045_v16  ;;  %v987_v21 = vld [vmem:[%s327_s29] ss:$8 sps:$4 sm:$0xff]   ;;  %v985_v27 = vld [vmem:[%s320_s21 + $0x4] ss:$8 sps:$4 sm:$0xff]   ;;  %v893_v29 = vcombine.high %v411_v6, %v411_v6 }
  0x24   : > { %920 = vmatpush3.bf16.msra.mxu1 %v987_v21 }
  0x25   : > { %925 = vmatprep.subr.bf16.mxu1 %v1042_v4 }
  0x27   : > { %v488_v56 = vld [vmem:[#allocation3] sm:$0xff]  ;;  %v624_v62 = vld [vmem:[#allocation3 + $0x8] sm:$0xff] }
  0x28   : > { %v471_v17 = vld [vmem:[#allocation2] sm:$0xff]  ;;  %v607_v41 = vld [vmem:[#allocation2 + $0x8] sm:$0xff] }
  0x29   : > { %916 = vmatmul.mubr.bf16.vlgmr.msra.gmra.mxu0 %v411_v6 }
  0x2a   : > { %933 = vmatprep.mubr.msk.bf16.mxu0 %vm1043_vm0, %v1042_v4  ;;  %932 = vmatpush3.bf16.msra.mxu0 %v989_v22 }
  0xe9   : > { %v457_v8 = vpop.f32.mrf.mxu0 }
  0xea   : > { %v463_v10 = vmul.f32 0.088388346, %v457_v8 }
  0xeb   : > { %v917_v11 = vpop.f32.mrf.mxu0 }
  0xec   : > { %v470_v12 = vadd.f32 %v890_v9, %v463_v10 }
  0xed   : > { %v460_v13 = vpop.f32.mrf.mxu0 }
  0xee   : > { %v473_v14 = vsel %vm472_vm2, %v470_v12, -inf }
  0xef   : > { %474 = vmax.xlane.f32.xlu0 %v473_v14  ;;  %v918_v15 = vpop.f32.mrf.mxu0 }
 0x178   : > { %v475_v18 = vpop.xlane.xlu0 %474 }
 0x179   : > { %v476_v19 = vmax.f32 %v471_v17, %v475_v18 }
 0x17b   : > { %v477_v20 = vsub.f32 %v471_v17, %v476_v19  ;;  %555 = vst.msk [vmem:[#allocation2] sm:$0xff] %vm404_vm1, %v476_v19  ;;  %482 = vperm.xlu0 %981, %v476_v19  }
 0x17d   : > { %v478_v44 = vmul.f32 1.442695, %v477_v20 }
 0x1f6   : > { %v483_v23 = vpop.permute.xlu0 %482 }
 0x1f7   : > { %v485_v24 = vsub.f32 %v470_v12, %v483_v23 }
 0x1f9   : > { %v486_v25 = vmul.f32 1.442695, %v485_v24 }
 0x1fb   : > { %990 = vpow2.f32 %v486_v25 }
 0x1fc   : > { %992 = vpow2.f32 %v478_v44 }
 0x208   : > { %v991_v26 = vpop.eup %990 }
 0x209   : > { %v503_v28 = vpack.c.bf16 %v991_v26, %v991_v26  ;;  %v490_v46 = vsel %vm472_vm2, %v991_v26, 0.0  ;;  %v993_v48 = vpop.eup %992 }
 0x20a   : > { %v489_v57 = vmul.f32 %v993_v48, %v488_v56 }
 0x20b   : > { %922 = vmatmul.mubr.msk.bf16.vlgmr.msra.gmra.mxu1 %vm472_vm2, %v503_v28 }
 0x20c   : > { %926 = vmatpush3.bf16.xpose.msra.mxu1 %v985_v27  ;;  %927 = vmatprep.mubr.msk.bf16.mxu1 %vm1043_vm0, %v1042_v4 }
 0x213   : > { %928 = vmatmul.mubr.bf16.vlgmr.msra.gmra.mxu1 %v893_v29 }
 0x2cb   : > { %v1163_v30 = vpop.f32.mrf.mxu1 }
 0x2cd   : > { %v923_v31 = vpop.f32.mrf.mxu1 }
 0x2cf   : > { %v550_v32 = vpop.f32.mrf.mxu1 }
 0x2d1   : > { %v924_v33 = vpop.f32.mrf.mxu1 }
 0x2d3   : > { %v598_v34 = vpop.f32.mrf.mxu1 }
 0x2d4   : > { %v604_v35 = vmul.f32 0.088388346, %v598_v34 }
 0x2d5   : > { %v929_v36 = vpop.f32.mrf.mxu1 }
 0x2d6   : > { %v605_v37 = vadd.f32 %v890_v9, %v604_v35 }
 0x2d7   : > { %v601_v38 = vpop.f32.mrf.mxu1 }
 0x2d8   : > { %v608_v39 = vsel %vm472_vm2, %v605_v37, -inf }
 0x2d9   : > { %609 = vmax.xlane.f32.xlu1 %v608_v39  ;;  %v930_v40 = vpop.f32.mrf.mxu1 }
 0x362   : > { %v610_v42 = vpop.xlane.xlu1 %609 }
 0x363   : > { %v611_v43 = vmax.f32 %v607_v41, %v610_v42 }
 0x365   : > { %689 = vst.msk [vmem:[#allocation2 + $0x8] sm:$0xff] %vm404_vm1, %v611_v43  ;;  %617 = vperm.xlu1 %982, %v611_v43   ;;  %v612_v45 = vsub.f32 %v607_v41, %v611_v43 }
 0x367   : > { %v613_v47 = vmul.f32 1.442695, %v612_v45 }
 0x369   : > { %994 = vpow2.f32 %v613_v47 }
 0x376   : > { %v995_v49 = vpop.eup %994 }
 0x377   : > { %v625_v63 = vmul.f32 %v995_v49, %v624_v62 }
 0x389   : > { %491 = vadd.xlane.f32.xlu1 %v490_v46 }
 0x39a   : > { %499 = vperm.xlu1 %982, %v993_v48  }
 0x39e   : > { %635 = vperm.xlu1 %982, %v995_v49  }
 0x3e0   : > { %v618_v50 = vpop.permute.xlu1 %617 }
 0x3e1   : > { %v620_v51 = vsub.f32 %v605_v37, %v618_v50 }
 0x3e3   : > { %v621_v52 = vmul.f32 1.442695, %v620_v51 }
 0x3e5   : > { %996 = vpow2.f32 %v621_v52 }
 0x3f2   : > { %v997_v53 = vpop.eup %996 }
 0x3f3   : > { %v626_v54 = vsel %vm472_vm2, %v997_v53, 0.0  ;;  %v639_v55 = vpack.c.bf16 %v997_v53, %v997_v53 }
 0x3f4   : > { %627 = vadd.xlane.f32.xlu0 %v626_v54 }
 0x3f5   : > { %934 = vmatmul.mubr.msk.bf16.vlgmr.msra.gmra.mxu0 %vm472_vm2, %v639_v55 }
 0x412   : > { %v492_v58 = vpop.xlane.xlu1 %491 }
 0x413   : > { %v493_v59 = vadd.f32 %v492_v58, %v489_v57 }
 0x415   : > { %495 = vst.msk [vmem:[#allocation3] sm:$0xff] %vm404_vm1, %v493_v59 }
 0x416   : > { %v500_v8 = vpop.permute.xlu1 %499 }
 0x417   : > { %v502_v10 = vmul.f32 0.0, %v500_v8 }
 0x419   : > { %v553_v13 = vadd.f32 %v1163_v30, %v502_v10 }
 0x41a   : > { %v636_v9 = vpop.permute.xlu1 %635 }
 0x41b   : > { %v638_v11 = vmul.f32 0.0, %v636_v9 }
 0x41c   : > { %v694_v60 = vld [vmem:[#allocation3] sm:$0xff] }
 0x41d   : > { %998 = vrcp.f32 %v694_v60 }
 0x42a   : > { %v999_v61 = vpop.eup %998 }
 0x42b   : > { %698 = vperm.xlu1 %982, %v999_v61  }
 0x47d   : > { %v628_v0 = vpop.xlane.xlu0 %627 }
 0x47e   : > { %v629_v1 = vadd.f32 %v628_v0, %v625_v63 }
 0x480   : > { %630 = vst.msk [vmem:[#allocation3 + $0x8] sm:$0xff] %vm404_vm1, %v629_v1 }
 0x487   : > { %v703_v2 = vld [vmem:[#allocation3 + $0x8] sm:$0xff] }
 0x488   : > { %1000 = vrcp.f32 %v703_v2 }
 0x495   : > { %v1001_v3 = vpop.eup %1000 }
 0x496   : > { %707 = vperm.xlu0 %981, %v1001_v3  }
 0x4a6   : > { %v699_v12 = vpop.permute.xlu1 %698 }
 0x4a7   : > { %v701_v16 = vmul.f32 %v699_v12, %v553_v13 }
 0x4b5   : > { %v681_v4 = vpop.f32.mrf.mxu0 }
 0x4b6   : > { %v687_v14 = vadd.f32 %v681_v4, %v638_v11 }
 0x4b7   : > { %v935_v5 = vpop.f32.mrf.mxu0 }
 0x4b9   : > { %v684_v6 = vpop.f32.mrf.mxu0 }
 0x4bb   : > { %v936_v7 = vpop.f32.mrf.mxu0 }
 0x511   : > { %v708_v15 = vpop.permute.xlu0 %707 }
 0x512   : > { %v710_v17 = vmul.f32 %v708_v15, %v687_v14 }
 0x514   : > { %v904_v18 = vpack.c.bf16 %v710_v17, %v701_v16 }
 0x516   : > { %719 = vst [vmem:[%s398_s6] sm:$0xff] %v904_v18 }
 0x517 PF: > { %s14_s19 = sadd.s32 1, %s1040_s19   ;;  %s1199_s15 = smov %s1028_s16 }
 0x518   : > { %p11_p10 = scmp.ge.s32.totalorder %s14_s19, 4   ;;  %s1200_s16 = smov %s1110_s24 }
 0x519   : > { %s1201_s17 = smov %s1036_s18  ;;  %s1202_s18 = smov %s1204_s20 }
 0x51a   :  { %13 = sbr.rel (!%p11_p10) target bundleno = 3 (0x3), region = 172 }

// kernel: iia_forward.45
= control target key start
LH: loop header
LB: loop body
LE: loop exit
PB: predicated region body
PF: predicated region fallthrough
CT: control target
= control target key end

     0   :  { %s397_s9 = smov 0   ;;  %s399_s10 = smov 0   ;;  %s433_s0 = inlined_call_operand.vmem [shape: f32[16,512], index: 0, kind: input, shape index: {}, may-alias: {0,2}]   ;;  %s434_s1 = inlined_call_operand.vmem [shape: f32[16,1], index: 1, kind: input, shape index: {}]   ;;  %s435_s2 = inlined_call_operand.vmem [shape: f32[16,512], index: 2, kind: output, shape index: {}, may-alias: {0,2}]  }
   0x1   :  { %s401_s11 = smov 0  }
   0x2 LB: > { %s24_s12 = sadd.s32 1, %s375_s10  ;;  %p321_p0 = scmp.ge.s32.totalorder %s379_s11, 1  ;;  %s379_s11 = sphi %s401_s11, %s12_s11   ;;  %s375_s10 = sphi %s399_s10, %s437_s10   ;;  %s371_s9 = sphi %s397_s9, %s436_s9  }
   0x3   : > { %p26_p1 = scmp.ge.s32.totalorder %s24_s12, 2  ;;  %p142_p2 = scmp.lt.s32.totalorder %s379_s11, 3 }
   0x5   : > { %s439_s12 = smov (%p26_p1, %s24_s12), 0  ;;  %p143_p3 = pnand %p321_p0, %p142_p2 }
   0x6   : > { %p177_p4 = scmp.lt.s32.totalorder (!%p143_p3), %s371_s9, 1 }
   0x7   : > { %146 = sbr.rel (%p143_p3) target bundleno = 144 (0x90), region = 28 }
   0xc   : > { %v381_v0 = vmov 0   ;;  %s441_s9 = smov (!%p177_p4, %s371_s9), 1 }
   0xd   : > { %356 = vset.pattern.permute.xlu0 %v381_v0  ;;  %s324_s13 = sshll.u32 %s441_s9, 3  ;;  %s329_s17 = sshll.u32 %s441_s9, 5 }
   0xe   : > { %s189_s16 = scalar_lea.vmem %s434_s1, %s324_s13  ;;  %s184_s20 = scalar_lea.vmem %s433_s0, %s329_s17 }
   0xf   : > { %v204_v1 = vld [vmem:[%s189_s16] sm:$0xff]  ;;  %v201_v3 = vld [vmem:[%s184_s20 + $0x8] sm:$0xff]  ;;  %v202_v4 = vld [vmem:[%s184_s20 + $0x10] sm:$0xff]  ;;  %s198_s23 = scalar_lea.vmem %s435_s2, %s329_s17 }
  0x10   : > { %207 = vperm.xlu0 %356, %v204_v1   ;;  %v200_v2 = vld [vmem:[%s184_s20] sm:$0xff]  ;;  %v203_v5 = vld [vmem:[%s184_s20 + $0x18] sm:$0xff] }
  0x8b   : > { %v208_v6 = vpop.permute.xlu0 %207 }
  0x8c   : > { %v210_v7 = vsub.f32 %v200_v2, %v208_v6  ;;  %v211_v8 = vsub.f32 %v201_v3, %v208_v6  ;;  %v212_v9 = vsub.f32 %v202_v4, %v208_v6  ;;  %v213_v10 = vsub.f32 %v203_v5, %v208_v6 }
  0x8e   : > { %214 = vst [vmem:[%s198_s23] sm:$0xff] %v210_v7  ;;  %215 = vst [vmem:[%s198_s23 + $0x8] sm:$0xff] %v211_v8 }
  0x8f   : > { %216 = vst [vmem:[%s198_s23 + $0x10] sm:$0xff] %v212_v9  ;;  %217 = vst [vmem:[%s198_s23 + $0x18] sm:$0xff] %v213_v10 }
  0x90 PF: > { %s12_s11 = sadd.s32 1, %s379_s11   ;;  %s436_s9 = smov %s375_s10 }
  0x91   : > { %p9_p5 = scmp.ge.s32.totalorder %s12_s11, 4   ;;  %s437_s10 = smov %s439_s12 }
  0x93   :  { %11 = sbr.rel (!%p9_p5) target bundleno = 2 (0x2), region = 61 }

// kernel: iia_forward.44
= control target key start
LH: loop header
LB: loop body
LE: loop exit
PB: predicated region body
PF: predicated region fallthrough
CT: control target
= control target key end

     0   :  { %s1238_s15 = smov 0   ;;  %s1240_s16 = smov 0   ;;  %s1486_s0 = inlined_call_operand.vmem [shape: bf16[16,256], index: 0, kind: input, shape index: {}]   ;;  %s1487_s1 = inlined_call_operand.vmem [shape: bf16[256,512], index: 1, kind: input, shape index: {}]   ;;  %s1488_s2 = inlined_call_operand.vmem [shape: f32[1,512], index: 2, kind: input, shape index: {}]   ;;  %s1489_s3 = inlined_call_operand.vmem [shape: f32[16,512], index: 3, kind: output, shape index: {0}]   ;;  %s1490_s4 = inlined_call_operand.vmem [shape: f32[16,1], index: 4, kind: output, shape index: {1}]  }
   0x1   :  { %s1242_s17 = smov 0  }
   0x2 LB: > { %s27_s18 = sadd.s32 1, %s1204_s16  ;;  %p972_p0 = scmp.ge.s32.totalorder %s1208_s17, 1  ;;  %s1208_s17 = sphi %s1242_s17, %s15_s17   ;;  %s1204_s16 = sphi %s1240_s16, %s1492_s16   ;;  %s1200_s15 = sphi %s1238_s15, %s1491_s15  }
   0x3   : > { %p29_p1 = scmp.ge.s32.totalorder %s27_s18, 2  ;;  %p200_p2 = scmp.lt.s32.totalorder %s1208_s17, 3 }
   0x5   : > { %s1494_s18 = smov (%p29_p1, %s27_s18), 0  ;;  %p201_p3 = pnand %p972_p0, %p200_p2 }
   0x6   : > { %p243_p4 = scmp.lt.s32.totalorder (!%p201_p3), %s1200_s15, 1 }
   0x7   : > { %204 = sbr.rel (%p201_p3) target bundleno = 734 (0x2de), region = 32 }
   0xc   : > { %v1076_v0 = vld [vmem:[%s1487_s1 + $0xe4] ss:$16 sps:$4 sm:$0xff]   ;;  %v1078_v1 = vld [vmem:[%s1487_s1 + $0xec] ss:$16 sps:$4 sm:$0xff]   ;;  %v1080_v2 = vld [vmem:[%s1487_s1 + $0xe0] ss:$16 sps:$4 sm:$0xff]  }
   0xd   : > { %694 = vmatprep.subr.bf16.mxu0 %v1076_v0  ;;  %v1081_v3 = vld [vmem:[%s1487_s1 + $0xe8] ss:$16 sps:$4 sm:$0xff]   ;;  %735 = vmatprep.subr.bf16.mxu1 %v1078_v1  ;;  %v1082_v4 = vld [vmem:[%s1487_s1 + $0xc4] ss:$16 sps:$4 sm:$0xff]   ;;  %v1084_v5 = vld [vmem:[%s1487_s1 + $0xcc] ss:$16 sps:$4 sm:$0xff]  }
   0xe   : > { %695 = vmatpush1.bf16.msra.mxu0 %v1080_v2  ;;  %736 = vmatpush1.bf16.msra.mxu1 %v1081_v3  ;;  %v1086_v6 = vld [vmem:[%s1487_s1 + $0xc0] ss:$16 sps:$4 sm:$0xff]   ;;  %v1087_v7 = vld [vmem:[%s1487_s1 + $0xc8] ss:$16 sps:$4 sm:$0xff]   ;;  %v1088_v8 = vld [vmem:[%s1487_s1 + $0xa4] ss:$16 sps:$4 sm:$0xff]  }
   0xf   : > { %696 = vmatprep.subr.bf16.mxu0 %v1082_v4  ;;  %737 = vmatprep.subr.bf16.mxu1 %v1084_v5  ;;  %v1090_v9 = vld [vmem:[%s1487_s1 + $0xac] ss:$16 sps:$4 sm:$0xff]   ;;  %v1092_v10 = vld [vmem:[%s1487_s1 + $0xa0] ss:$16 sps:$4 sm:$0xff]   ;;  %v1093_v11 = vld [vmem:[%s1487_s1 + $0xa8] ss:$16 sps:$4 sm:$0xff]   ;;  %v347_v4 = vlaneseq }
  0x10   : > { %v1094_v12 = vld [vmem:[%s1487_s1 + $0x84] ss:$16 sps:$4 sm:$0xff]   ;;  %v1096_v13 = vld [vmem:[%s1487_s1 + $0x8c] ss:$16 sps:$4 sm:$0xff]   ;;  %v1098_v14 = vld [vmem:[%s1487_s1 + $0x80] ss:$16 sps:$4 sm:$0xff]  }
  0x11   : > { %v1099_v15 = vld [vmem:[%s1487_s1 + $0x88] ss:$16 sps:$4 sm:$0xff]   ;;  %v1100_v16 = vld [vmem:[%s1487_s1 + $0x64] ss:$16 sps:$4 sm:$0xff]   ;;  %v1102_v17 = vld [vmem:[%s1487_s1 + $0x6c] ss:$16 sps:$4 sm:$0xff]  }
  0x12   : > { %697 = vmatpush1.bf16.msra.mxu0 %v1086_v6  ;;  %738 = vmatpush1.bf16.msra.mxu1 %v1087_v7  ;;  %v1104_v18 = vld [vmem:[%s1487_s1 + $0x60] ss:$16 sps:$4 sm:$0xff]   ;;  %v1105_v19 = vld [vmem:[%s1487_s1 + $0x68] ss:$16 sps:$4 sm:$0xff]   ;;  %v1106_v20 = vld [vmem:[%s1487_s1 + $0x44] ss:$16 sps:$4 sm:$0xff]  }
  0x13   : > { %698 = vmatprep.subr.bf16.mxu0 %v1088_v8  ;;  %739 = vmatprep.subr.bf16.mxu1 %v1090_v9  ;;  %v1108_v21 = vld [vmem:[%s1487_s1 + $0x4c] ss:$16 sps:$4 sm:$0xff]   ;;  %v1110_v22 = vld [vmem:[%s1487_s1 + $0x40] ss:$16 sps:$4 sm:$0xff]   ;;  %v1111_v23 = vld [vmem:[%s1487_s1 + $0x48] ss:$16 sps:$4 sm:$0xff]  }
  0x14   : > { %v1112_v24 = vld [vmem:[%s1487_s1 + $0x24] ss:$16 sps:$4 sm:$0xff]   ;;  %v1114_v25 = vld [vmem:[%s1487_s1 + $0x2c] ss:$16 sps:$4 sm:$0xff]   ;;  %v1116_v26 = vld [vmem:[%s1487_s1 + $0x20] ss:$16 sps:$4 sm:$0xff]  }
  0x15   : > { %v1117_v27 = vld [vmem:[%s1487_s1 + $0x28] ss:$16 sps:$4 sm:$0xff]   ;;  %v1118_v28 = vld [vmem:[%s1487_s1 + $0x4] ss:$16 sps:$4 sm:$0xff]   ;;  %v1120_v29 = vld [vmem:[%s1487_s1 + $0xc] ss:$16 sps:$4 sm:$0xff]  }
  0x16   : > { %699 = vmatpush1.bf16.msra.mxu0 %v1092_v10  ;;  %740 = vmatpush1.bf16.msra.mxu1 %v1093_v11  ;;  %v1122_v30 = vld [vmem:[%s1487_s1] ss:$16 sps:$4 sm:$0xff]   ;;  %v1123_v31 = vld [vmem:[%s1487_s1 + $0x8] ss:$16 sps:$4 sm:$0xff]   ;;  %v1124_v32 = vld [vmem:[%s1487_s1 + $0x1e4] ss:$16 sps:$4 sm:$0xff]  }
  0x17   : > { %700 = vmatprep.subr.bf16.mxu0 %v1094_v12  ;;  %741 = vmatprep.subr.bf16.mxu1 %v1096_v13  ;;  %v1126_v33 = vld [vmem:[%s1487_s1 + $0x1ec] ss:$16 sps:$4 sm:$0xff]   ;;  %v1128_v34 = vld [vmem:[%s1487_s1 + $0x1e0] ss:$16 sps:$4 sm:$0xff]   ;;  %v1129_v35 = vld [vmem:[%s1487_s1 + $0x1e8] ss:$16 sps:$4 sm:$0xff]  }
  0x18   : > { %v1130_v36 = vld [vmem:[%s1487_s1 + $0x1c4] ss:$16 sps:$4 sm:$0xff]   ;;  %s1496_s15 = smov (!%p243_p4, %s1200_s15), 1  ;;  %v1132_v37 = vld [vmem:[%s1487_s1 + $0x1cc] ss:$16 sps:$4 sm:$0xff]   ;;  %vm277_vm0 = vcmask 7168  }
  0x19   : > { %v1134_v38 = vld [vmem:[%s1487_s1 + $0x1c0] ss:$16 sps:$4 sm:$0xff]   ;;  %v1135_v39 = vld [vmem:[%s1487_s1 + $0x1c8] ss:$16 sps:$4 sm:$0xff]   ;;  %v1136_v40 = vld [vmem:[%s1487_s1 + $0x1a4] ss:$16 sps:$4 sm:$0xff]  }
  0x1a   : > { %701 = vmatpush1.bf16.msra.mxu0 %v1098_v14  ;;  %742 = vmatpush1.bf16.msra.mxu1 %v1099_v15  ;;  %s1046_s9 = sshll.u32 %s1496_s15, 3  ;;  %v1138_v41 = vld [vmem:[%s1487_s1 + $0x1ac] ss:$16 sps:$4 sm:$0xff]   ;;  %v1140_v42 = vld [vmem:[%s1487_s1 + $0x1a0] ss:$16 sps:$4 sm:$0xff]   ;;  %v1210_v3 = vmov -inf  }
  0x1b   : > { %702 = vmatprep.subr.bf16.mxu0 %v1100_v16  ;;  %743 = vmatprep.subr.bf16.mxu1 %v1102_v17  ;;  %v1141_v43 = vld [vmem:[%s1487_s1 + $0x1a8] ss:$16 sps:$4 sm:$0xff]   ;;  %s247_s22 = scalar_lea.vmem %s1486_s0, %s1046_s9  ;;  %v1142_v44 = vld [vmem:[%s1487_s1 + $0x184] ss:$16 sps:$4 sm:$0xff]   ;;  %v1144_v45 = vld [vmem:[%s1487_s1 + $0x18c] ss:$16 sps:$4 sm:$0xff]   ;;  %s272_s29 = scalar_lea.vmem %s1490_s4, %s1046_s9 }
  0x1c   : > { %v280_v46 = vld [vmem:[%s247_s22] sm:$0xff]  ;;  %v1147_v49 = vld [vmem:[%s1487_s1 + $0x188] ss:$16 sps:$4 sm:$0xff]   ;;  %v1150_v51 = vld [vmem:[%s1487_s1 + $0x16c] ss:$16 sps:$4 sm:$0xff]   ;;  %278 = vst.msk [vmem:[#allocation2] sm:$0xff] %vm277_vm0, %v1210_v3 }
  0x1d   : > { %v979_v47 = vcombine.high %v280_v46, %v280_v46  ;;  %v1146_v48 = vld [vmem:[%s1487_s1 + $0x180] ss:$16 sps:$4 sm:$0xff]   ;;  %v1148_v50 = vld [vmem:[%s1487_s1 + $0x164] ss:$16 sps:$4 sm:$0xff]   ;;  %v1153_v53 = vld [vmem:[%s1487_s1 + $0x168] ss:$16 sps:$4 sm:$0xff]   ;;  %v978_v2 = vcombine.low %v280_v46, %v280_v46 }
  0x1e   : > { %703 = vmatpush1.bf16.msra.mxu0 %v1104_v18  ;;  %744 = vmatpush1.bf16.msra.mxu1 %v1105_v19  ;;  %v1152_v52 = vld [vmem:[%s1487_s1 + $0x160] ss:$16 sps:$4 sm:$0xff]   ;;  %v1154_v54 = vld [vmem:[%s1487_s1 + $0x144] ss:$16 sps:$4 sm:$0xff]   ;;  %v1156_v55 = vld [vmem:[%s1487_s1 + $0x14c] ss:$16 sps:$4 sm:$0xff]  }
  0x1f   : > { %704 = vmatprep.subr.bf16.mxu0 %v1106_v20  ;;  %745 = vmatprep.subr.bf16.mxu1 %v1108_v21  ;;  %v1158_v56 = vld [vmem:[%s1487_s1 + $0x140] ss:$16 sps:$4 sm:$0xff]   ;;  %v1159_v57 = vld [vmem:[%s1487_s1 + $0x148] ss:$16 sps:$4 sm:$0xff]   ;;  %v1160_v58 = vld [vmem:[%s1487_s1 + $0x124] ss:$16 sps:$4 sm:$0xff]  }
  0x20   : > { %726 = vmatprep.mubr.bf16.mxu0 %v979_v47  ;;  %767 = vmatprep.mubr.bf16.mxu1 %v979_v47  ;;  %v1162_v59 = vld [vmem:[%s1487_s1 + $0x12c] ss:$16 sps:$4 sm:$0xff]   ;;  %v1164_v60 = vld [vmem:[%s1487_s1 + $0x120] ss:$16 sps:$4 sm:$0xff]   ;;  %v1165_v61 = vld [vmem:[%s1487_s1 + $0x128] ss:$16 sps:$4 sm:$0xff]  }
  0x21   : > { %v1166_v62 = vld [vmem:[%s1487_s1 + $0x104] ss:$16 sps:$4 sm:$0xff]   ;;  %v1168_v63 = vld [vmem:[%s1487_s1 + $0x10c] ss:$16 sps:$4 sm:$0xff]   ;;  %v1170_v0 = vld [vmem:[%s1487_s1 + $0x100] ss:$16 sps:$4 sm:$0xff]  }
  0x22   : > { %705 = vmatpush1.bf16.msra.mxu0 %v1110_v22  ;;  %746 = vmatpush1.bf16.msra.mxu1 %v1111_v23  ;;  %v1171_v1 = vld [vmem:[%s1487_s1 + $0x108] ss:$16 sps:$4 sm:$0xff]   ;;  %v348_v5 = vshrl.u32 %v347_v4, 7  ;;  %v345_v8 = vld [vmem:[%s1488_s2] sm:$0xf]  ;;  %s1047_s23 = sshll.u32 %s1496_s15, 5 }
  0x23   : > { %706 = vmatprep.subr.bf16.mxu0 %v1112_v24  ;;  %747 = vmatprep.subr.bf16.mxu1 %v1114_v25  ;;  %s267_s26 = scalar_lea.vmem %s1489_s3, %s1047_s23 }
  0x24   : > { %v349_v6 = vsub.s32 0, %v348_v5  ;;  %v357_v7 = vsub.s32 2, %v348_v5  ;;  %v353_v9 = vsub.s32 1, %v348_v5  ;;  %v361_v10 = vsub.s32 3, %v348_v5 }
  0x26   : > { %707 = vmatpush1.bf16.msra.mxu0 %v1116_v26  ;;  %748 = vmatpush1.bf16.msra.mxu1 %v1117_v27  ;;  %v350_v11 = vrot.slane %v345_v8, %v349_v6  ;;  %v358_v12 = vrot.slane %v345_v8, %v357_v7  ;;  %v354_v13 = vrot.slane %v345_v8, %v353_v9 }
  0x27   : > { %708 = vmatprep.subr.bf16.mxu0 %v1118_v28  ;;  %749 = vmatprep.subr.bf16.mxu1 %v1120_v29  ;;  %v362_v14 = vrot.slane %v345_v8, %v361_v10 }
  0x2a   : > { %709 = vmatpush1.bf16.msra.mxu0 %v1122_v30  ;;  %750 = vmatpush1.bf16.msra.mxu1 %v1123_v31  ;;  %v1211_v30 = vmov 0   ;;  %v1212_v31 = vmov 0.0  }
  0x2b   : > { %710 = vmatprep.subr.bf16.mxu0 %v1124_v32  ;;  %751 = vmatprep.subr.bf16.mxu1 %v1126_v33  ;;  %279 = vst.msk [vmem:[#allocation3] sm:$0xff] %vm277_vm0, %v1212_v31  ;;  %v780_v32 = vld [vmem:[#allocation2] sm:$0xff] }
  0x2c   : > { %1075 = vset.pattern.permute.xlu0 %v1211_v30 }
  0x2e   : > { %711 = vmatpush2.bf16.msra.mxu0 %v1128_v34  ;;  %752 = vmatpush2.bf16.msra.mxu1 %v1129_v35 }
  0x2f   : > { %712 = vmatprep.subr.bf16.mxu0 %v1130_v36  ;;  %753 = vmatprep.subr.bf16.mxu1 %v1132_v37 }
  0x32   : > { %713 = vmatpush2.bf16.msra.mxu0 %v1134_v38  ;;  %754 = vmatpush2.bf16.msra.mxu1 %v1135_v39 }
  0x33   : > { %714 = vmatprep.subr.bf16.mxu0 %v1136_v40  ;;  %755 = vmatprep.subr.bf16.mxu1 %v1138_v41 }
  0x36   : > { %715 = vmatpush2.bf16.msra.mxu0 %v1140_v42  ;;  %756 = vmatpush2.bf16.msra.mxu1 %v1141_v43 }
  0x37   : > { %716 = vmatprep.subr.bf16.mxu0 %v1142_v44  ;;  %757 = vmatprep.subr.bf16.mxu1 %v1144_v45 }
  0x3a   : > { %717 = vmatpush2.bf16.msra.mxu0 %v1146_v48  ;;  %758 = vmatpush2.bf16.msra.mxu1 %v1147_v49 }
  0x3b   : > { %718 = vmatprep.subr.bf16.mxu0 %v1148_v50  ;;  %759 = vmatprep.subr.bf16.mxu1 %v1150_v51 }
  0x3e   : > { %719 = vmatpush2.bf16.msra.mxu0 %v1152_v52  ;;  %760 = vmatpush2.bf16.msra.mxu1 %v1153_v53 }
  0x3f   : > { %720 = vmatprep.subr.bf16.mxu0 %v1154_v54  ;;  %761 = vmatprep.subr.bf16.mxu1 %v1156_v55  ;;  %v787_v54 = vld [vmem:[#allocation3] sm:$0xff] }
  0x42   : > { %721 = vmatpush2.bf16.msra.mxu0 %v1158_v56  ;;  %762 = vmatpush2.bf16.msra.mxu1 %v1159_v57 }
  0x43   : > { %722 = vmatprep.subr.bf16.mxu0 %v1160_v58  ;;  %763 = vmatprep.subr.bf16.mxu1 %v1162_v59 }
  0x46   : > { %723 = vmatpush2.bf16.msra.mxu0 %v1164_v60  ;;  %764 = vmatpush2.bf16.msra.mxu1 %v1165_v61 }
  0x47   : > { %724 = vmatprep.subr.bf16.mxu0 %v1166_v62  ;;  %765 = vmatprep.subr.bf16.mxu1 %v1168_v63 }
  0x4a   : > { %725 = vmatpush2.bf16.msra.mxu0 %v1170_v0  ;;  %766 = vmatpush2.bf16.msra.mxu1 %v1171_v1 }
  0x4d   : > { %727 = vmatmul.mubr.bf16.vlgmr.msra.gmra.mxu0 %v978_v2  ;;  %768 = vmatmul.mubr.bf16.vlgmr.msra.gmra.mxu1 %v978_v2 }
 0x10d   : > { %v728_v15 = vpop.f32.mrf.mxu0  ;;  %v769_v16 = vpop.f32.mrf.mxu1 }
 0x10e   : > { %v729_v17 = vadd.f32 %v728_v15, %v350_v11  ;;  %v770_v18 = vadd.f32 %v769_v16, %v358_v12 }
 0x10f   : > { %v730_v19 = vpop.f32.mrf.mxu0  ;;  %v771_v20 = vpop.f32.mrf.mxu1 }
 0x110   : > { %776 = vst [vmem:[%s267_s26] sm:$0xff] %v729_v17  ;;  %778 = vst [vmem:[%s267_s26 + $0x10] sm:$0xff] %v770_v18  ;;  %v731_v21 = vadd.f32 %v730_v19, %v354_v13  ;;  %v772_v22 = vadd.f32 %v771_v20, %v362_v14 }
 0x111   : > { %v732_v23 = vpop.f32.mrf.mxu0  ;;  %v773_v24 = vpop.f32.mrf.mxu1 }
 0x112   : > { %777 = vst [vmem:[%s267_s26 + $0x8] sm:$0xff] %v731_v21  ;;  %779 = vst [vmem:[%s267_s26 + $0x18] sm:$0xff] %v772_v22  ;;  %v781_v25 = vmax.f32 %v729_v17, %v731_v21  ;;  %v782_v26 = vmax.f32 %v770_v18, %v772_v22 }
 0x113   : > { %v733_v27 = vpop.f32.mrf.mxu0  ;;  %v774_v28 = vpop.f32.mrf.mxu1 }
 0x114   : > { %v783_v29 = vmax.f32 %v781_v25, %v782_v26 }
 0x116   : > { %784 = vmax.xlane.f32.xlu0 %v783_v29 }
 0x19f   : > { %v785_v33 = vpop.xlane.xlu0 %784 }
 0x1a0   : > { %v786_v34 = vmax.f32 %v780_v32, %v785_v33 }
 0x1a2   : > { %v788_v35 = vsub.f32 %v780_v32, %v786_v34  ;;  %817 = vst.msk [vmem:[#allocation2] sm:$0xff] %vm277_vm0, %v786_v34  ;;  %794 = vperm.xlu0 %1075, %v786_v34  }
 0x1a4   : > { %v789_v52 = vmul.f32 1.442695, %v788_v35 }
 0x1a9   : > { %v821_v61 = vld [vmem:[#allocation2] sm:$0xff] }
 0x21d   : > { %v795_v36 = vpop.permute.xlu0 %794 }
 0x21e   : > { %v797_v37 = vsub.f32 %v729_v17, %v795_v36  ;;  %v798_v38 = vsub.f32 %v731_v21, %v795_v36  ;;  %v799_v39 = vsub.f32 %v770_v18, %v795_v36  ;;  %v800_v40 = vsub.f32 %v772_v22, %v795_v36 }
 0x220   : > { %v801_v41 = vmul.f32 1.442695, %v797_v37  ;;  %v803_v42 = vmul.f32 1.442695, %v798_v38  ;;  %v805_v43 = vmul.f32 1.442695, %v799_v39 }
 0x221   : > { %v807_v44 = vmul.f32 1.442695, %v800_v40 }
 0x222   : > { %1174 = vpow2.f32 %v801_v41 }
 0x223   : > { %1176 = vpow2.f32 %v803_v42 }
 0x224   : > { %1178 = vpow2.f32 %v805_v43 }
 0x225   : > { %1180 = vpow2.f32 %v807_v44 }
 0x226   : > { %1182 = vpow2.f32 %v789_v52 }
 0x22f   : > { %v1175_v45 = vpop.eup %1174 }
 0x230   : > { %v1177_v46 = vpop.eup %1176 }
 0x231   : > { %v809_v47 = vadd.f32 %v1177_v46, %v1175_v45  ;;  %v1179_v48 = vpop.eup %1178 }
 0x232   : > { %v1181_v50 = vpop.eup %1180 }
 0x233   : > { %v810_v49 = vadd.f32 %v1179_v48, %v809_v47  ;;  %v1183_v53 = vpop.eup %1182 }
 0x234   : > { %v791_v55 = vmul.f32 %v1183_v53, %v787_v54 }
 0x235   : > { %v811_v51 = vadd.f32 %v1181_v50, %v810_v49 }
 0x237   : > { %812 = vadd.xlane.f32.xlu1 %v811_v51 }
 0x2c0   : > { %v813_v56 = vpop.xlane.xlu1 %812 }
 0x2c1   : > { %v814_v57 = vadd.f32 %v813_v56, %v791_v55 }
 0x2c3   : > { %816 = vst.msk [vmem:[#allocation3] sm:$0xff] %vm277_vm0, %v814_v57 }
 0x2ca   : > { %v822_v58 = vld [vmem:[#allocation3] sm:$0xff] }
 0x2cb   : > { %1184 = vlog2.f32 %v822_v58 }
 0x2d8   : > { %v1185_v59 = vpop.eup %1184 }
 0x2d9   : > { %v824_v60 = vmul.f32 0.6931472, %v1185_v59 }
 0x2db   : > { %v825_v62 = vadd.f32 %v824_v60, %v821_v61 }
 0x2dd   : > { %826 = vst.msk [vmem:[%s272_s29] sm:$0xff] %vm277_vm0, %v825_v62 }
 0x2de PF: > { %s15_s17 = sadd.s32 1, %s1208_s17   ;;  %s1491_s15 = smov %s1204_s16 }
 0x2df   : > { %p12_p5 = scmp.ge.s32.totalorder %s15_s17, 4   ;;  %s1492_s16 = smov %s1494_s18 }
 0x2e1   :  { %14 = sbr.rel (!%p12_p5) target bundleno = 2 (0x2), region = 88 }

</bundles_post_ra>
